<compile_context>
chip_gen: v7x
topology: tpu7x:2x2x1
jax: 0.10.0
libtpu: 0.0.40
codegen_flags: <defaults>
</compile_context>

<pallas_src>
import functools

import jax
import jax.numpy as jnp
from jax import lax
from jax.experimental import pallas as pl
from jax.experimental.pallas import tpu as pltpu


IN_SHAPE = 512             # default `in_shape` of the module
HID = 512
BOTTLENECK = 256
VMEM_LIMIT_BYTES = 32 * 1024 * 1024


# --------------------------------------------------------------------------
# Kernel
# --------------------------------------------------------------------------
def _cae_kernel(x_ref,
                w1, b1, w2, b2, w3, b3,        # encoder (weights bf16)
                w4, b4, w5, b5, w6, b6,        # decoder (biases  f32)
                o_ref):
    """Fused encoder -> decoder -> L2 row-normalization for one batch tile."""

    def dense(h_bf16, w_ref, b_ref):
        # bf16 operands feed the MXU at full rate; accumulation + bias in f32.
        return jnp.dot(h_bf16, w_ref[...],
                       preferred_element_type=jnp.float32) + b_ref[...]

    def relu_bf16(acc_f32):
        # ReLU on the f32 accumulator, then one cast to bf16 so the
        # inter-layer activation round-trips through VMEM at half the bytes.
        return jnp.maximum(acc_f32, 0.0).astype(jnp.bfloat16)

    h = x_ref[...].astype(jnp.bfloat16)

    # ---- encoder ----
    h = relu_bf16(dense(h, w1, b1))
    h = relu_bf16(dense(h, w2, b2))
    h = dense(h, w3, b3).astype(jnp.bfloat16)      # bottleneck, no ReLU

    # ---- decoder ----
    h = relu_bf16(dense(h, w4, b4))
    h = relu_bf16(dense(h, w5, b5))
    h = dense(h, w6, b6)                           # f32 for the norm epilogue

    # ---- x / x.norm(dim=1, keepdim=True) ----
    # rsqrt sits on the EUP slot; multiply replaces a per-element divide.
    # (No epsilon, matching PyTorch's x / x.norm() exactly.)
    inv_norm = lax.rsqrt(jnp.sum(h * h, axis=-1, keepdims=True))
    o_ref[...] = (h * inv_norm).astype(o_ref.dtype)


# --------------------------------------------------------------------------
# Parameters
# --------------------------------------------------------------------------
def init_params(key, in_shape=IN_SHAPE, dtype=jnp.float32):
    """Deterministic synthetic parameters (weights stored as (in, out))."""
    dims = [
        (in_shape, HID), (HID, HID), (HID, BOTTLENECK),        # encoder
        (BOTTLENECK, HID), (HID, HID), (HID, in_shape),        # decoder
    ]
    params = []
    for fan_in, fan_out in dims:
        kw, kb, key = jax.random.split(key, 3)
        bound = 1.0 / jnp.sqrt(jnp.float32(fan_in))
        w = jax.random.uniform(kw, (fan_in, fan_out), dtype, -bound, bound)
        b = jax.random.uniform(kb, (1, fan_out), dtype, -bound, bound)
        params.extend([w, b])
    return params


def prepare_params(params):
    """One-time cast: weights -> bf16 (MXU operands), biases stay f32.

    Call this ONCE at setup; `cae_forward` does no per-call casting."""
    return [p.astype(jnp.bfloat16) if i % 2 == 0 else p.astype(jnp.float32)
            for i, p in enumerate(params)]


# --------------------------------------------------------------------------
# Tiling
# --------------------------------------------------------------------------
def _round_up(n, m):
    return ((n + m - 1) // m) * m


def _max_tile_for_device():
    """v5e is MXU-bound at 256-row tiles; v6e/v7x benefit from 512."""
    try:
        kind = jax.devices()[0].device_kind.lower()
        if "v5 lite" in kind or "v5e" in kind or "v5litepod" in kind:
            return 256
    except Exception:
        pass
    return 512


def _pick_batch_tile(batch, max_tile=None):
    """Sublane-aligned tile; prefers >=4 grid steps (2 steps per v7x core)."""
    if max_tile is None:
        max_tile = _max_tile_for_device()
    if batch <= 256:
        return _round_up(batch, 8)                 # one (padded) full block
    for tile in (512, 256, 128):
        if tile <= max_tile and pl.cdiv(batch, tile) >= 4:
            return tile
    return 128                                     # 2-3 steps, still pipelined


# --------------------------------------------------------------------------
# Wrapper
# --------------------------------------------------------------------------
@functools.partial(jax.jit, static_argnames=("batch_tile", "single_buffer_weights"))
def cae_forward(x, params, batch_tile, single_buffer_weights=True):
    """params must already be prepared via prepare_params()."""
    B, D = x.shape
    Bp = _round_up(B, batch_tile)
    if Bp != B:
        # Pad with zero rows; they normalize to NaN but are sliced off below
        # and never contaminate real rows (row-wise op).
        x = jnp.pad(x, ((0, Bp - B), (0, 0)))

    # Batch-tiled activations; full, grid-invariant parameter blocks.
    x_spec = pl.BlockSpec((batch_tile, D), lambda i: (i, 0))
    out_spec = pl.BlockSpec((batch_tile, D), lambda i: (i, 0))
    weight_mode = pl.Buffered(1) if single_buffer_weights else None
    param_specs = [
        pl.BlockSpec(p.shape, lambda i: (0, 0), pipeline_mode=weight_mode)
        for p in params
    ]

    # Advisory cost hint for XLA's scheduler around the custom call.
    flops = 2 * Bp * (D * HID + HID * HID + HID * BOTTLENECK
                      + BOTTLENECK * HID + HID * HID + HID * D)
    bytes_accessed = (Bp * D * x.dtype.itemsize * 2        # input + output
                      + sum(p.size * p.dtype.itemsize for p in params))
    cost = pl.CostEstimate(flops=flops, transcendentals=Bp,
                           bytes_accessed=bytes_accessed)

    out = pl.pallas_call(
        _cae_kernel,
        out_shape=jax.ShapeDtypeStruct((Bp, D), x.dtype),
        grid_spec=pltpu.PrefetchScalarGridSpec(
            num_scalar_prefetch=0,
            grid=(Bp // batch_tile,),
            in_specs=[x_spec] + param_specs,
            out_specs=out_spec,
        ),
        compiler_params=pltpu.CompilerParams(
            dimension_semantics=("parallel",),
            vmem_limit_bytes=VMEM_LIMIT_BYTES,
        ),
        cost_estimate=cost,
    )(x, *params)

    return out[:B] if Bp != B else out


# --------------------------------------------------------------------------
# References
# --------------------------------------------------------------------------
def cae_reference_bf16(x, prepared_params):
    """Pure-JAX reference mirroring the kernel's bf16 operand / f32-acc chain."""
    w1, b1, w2, b2, w3, b3, w4, b4, w5, b5, w6, b6 = prepared_params

    def dense(h, w, b):
        return jnp.dot(h.astype(jnp.bfloat16), w,
                       preferred_element_type=jnp.float32) + b

    h = x.astype(jnp.bfloat16)
    h = jnp.maximum(dense(h, w1, b1), 0.0).astype(jnp.bfloat16)
    h = jnp.maximum(dense(h, w2, b2), 0.0).astype(jnp.bfloat16)
    h = dense(h, w3, b3).astype(jnp.bfloat16)
    h = jnp.maximum(dense(h, w4, b4), 0.0).astype(jnp.bfloat16)
    h = jnp.maximum(dense(h, w5, b5), 0.0).astype(jnp.bfloat16)
    h = dense(h, w6, b6)
    return h * lax.rsqrt(jnp.sum(h * h, axis=-1, keepdims=True))


def cae_reference_f32(x, params):
    """Exact f32 semantics of the PyTorch module."""
    w1, b1, w2, b2, w3, b3, w4, b4, w5, b5, w6, b6 = params

    def dense(h, w, b):
        return jnp.dot(h, w, preferred_element_type=jnp.float32) + b

    h = x.astype(jnp.float32)
    h = jnp.maximum(dense(h, w1, b1), 0.0)
    h = jnp.maximum(dense(h, w2, b2), 0.0)
    h = dense(h, w3, b3)
    h = jnp.maximum(dense(h, w4, b4), 0.0)
    h = jnp.maximum(dense(h, w5, b5), 0.0)
    h = dense(h, w6, b6)
    return h / jnp.linalg.norm(h, axis=1, keepdims=True)


# --------------------------------------------------------------------------
# Test harness
# --------------------------------------------------------------------------
if __name__ == "__main__":
    key = jax.random.PRNGKey(0)
    kx, kp = jax.random.split(key)

    # 512 rows -> tile 128 -> 4 grid steps, so both TensorCores of a v7x chip
    # each get >=2 pipelined steps (DMA prologue/epilogue hidden).
    B = 512
    x = jax.random.normal(kx, (B, IN_SHAPE), jnp.float32)
    params = init_params(kp)
    prepared = prepare_params(params)          # bf16 weight cast hoisted here

    batch_tile = _pick_batch_tile(B)
    try:
        out = jax.block_until_ready(cae_forward(x, prepared, batch_tile))
    except pltpu.LoweringException:
        # Only if this build rejects single-buffered (Buffered(1)) parameter
        # blocks on the top-level grid pipeline.
        out = jax.block_until_ready(
            cae_forward(x, prepared, batch_tile, single_buffer_weights=False))

    assert out.shape == (B, IN_SHAPE)
    assert bool(jnp.all(jnp.isfinite(out)))

    # (a) reference matching the kernel's bf16 operand chain (tight tolerance)
    # (b) exact f32 PyTorch semantics (loose tolerance: 6 chained bf16 matmuls)
    ref_bf16 = cae_reference_bf16(x, prepared)
    ref_f32 = cae_reference_f32(x, params)
    assert jnp.allclose(out, ref_bf16, atol=1e-4, rtol=1e-4), \
        "mismatch vs bf16-matched reference"
    assert jnp.allclose(out, ref_f32, atol=5e-3, rtol=5e-2), \
        "mismatch vs f32 reference"

    print("KERNEL_OK")
</pallas_src>

<mosaic_0001>
module attributes {stable_mosaic.version = 11 : i64} {
  func.func @_cae_kernel(%arg0: i32, %arg1: memref<128x512xf32, #tpu.memory_space<vmem>>, %arg2: memref<512x512xbf16, #tpu.memory_space<vmem>>, %arg3: memref<1x512xf32, #tpu.memory_space<vmem>>, %arg4: memref<512x512xbf16, #tpu.memory_space<vmem>>, %arg5: memref<1x512xf32, #tpu.memory_space<vmem>>, %arg6: memref<512x256xbf16, #tpu.memory_space<vmem>>, %arg7: memref<1x256xf32, #tpu.memory_space<vmem>>, %arg8: memref<256x512xbf16, #tpu.memory_space<vmem>>, %arg9: memref<1x512xf32, #tpu.memory_space<vmem>>, %arg10: memref<512x512xbf16, #tpu.memory_space<vmem>>, %arg11: memref<1x512xf32, #tpu.memory_space<vmem>>, %arg12: memref<512x512xbf16, #tpu.memory_space<vmem>>, %arg13: memref<1x512xf32, #tpu.memory_space<vmem>>, %arg14: memref<128x512xf32, #tpu.memory_space<vmem>>) attributes {dimension_semantics = [#tpu.dimension_semantics<parallel>], iteration_bounds = array<i64: 4>, scalar_prefetch = 0 : i64, scratch_operands = 0 : i64, tpu.core_type = #tpu.core_type<tc>, window_params = [{transform_indices = @transform_0, window_bounds = array<i64: 128, 512>}, {pipeline_mode = #tpu.pipeline_mode<synchronous>, transform_indices = @transform_1, window_bounds = array<i64: 512, 512>}, {pipeline_mode = #tpu.pipeline_mode<synchronous>, transform_indices = @transform_2, window_bounds = array<i64: 1, 512>}, {pipeline_mode = #tpu.pipeline_mode<synchronous>, transform_indices = @transform_3, window_bounds = array<i64: 512, 512>}, {pipeline_mode = #tpu.pipeline_mode<synchronous>, transform_indices = @transform_4, window_bounds = array<i64: 1, 512>}, {pipeline_mode = #tpu.pipeline_mode<synchronous>, transform_indices = @transform_5, window_bounds = array<i64: 512, 256>}, {pipeline_mode = #tpu.pipeline_mode<synchronous>, transform_indices = @transform_6, window_bounds = array<i64: 1, 256>}, {pipeline_mode = #tpu.pipeline_mode<synchronous>, transform_indices = @transform_7, window_bounds = array<i64: 256, 512>}, {pipeline_mode = #tpu.pipeline_mode<synchronous>, transform_indices = @transform_8, window_bounds = array<i64: 1, 512>}, {pipeline_mode = #tpu.pipeline_mode<synchronous>, transform_indices = @transform_9, window_bounds = array<i64: 512, 512>}, {pipeline_mode = #tpu.pipeline_mode<synchronous>, transform_indices = @transform_10, window_bounds = array<i64: 1, 512>}, {pipeline_mode = #tpu.pipeline_mode<synchronous>, transform_indices = @transform_11, window_bounds = array<i64: 512, 512>}, {pipeline_mode = #tpu.pipeline_mode<synchronous>, transform_indices = @transform_12, window_bounds = array<i64: 1, 512>}, {transform_indices = @transform_13, window_bounds = array<i64: 128, 512>}]} {
    %c0 = arith.constant 0 : index
    %c0_0 = arith.constant 0 : index
    %0 = vector.load %arg1[%c0, %c0_0] : memref<128x512xf32, #tpu.memory_space<vmem>>, vector<128x512xf32>
    %1 = arith.truncf %0 : vector<128x512xf32> to vector<128x512xbf16>
    %c0_1 = arith.constant 0 : index
    %c0_2 = arith.constant 0 : index
    %2 = vector.load %arg2[%c0_1, %c0_2] : memref<512x512xbf16, #tpu.memory_space<vmem>>, vector<512x512xbf16>
    %cst = arith.constant dense<0.000000e+00> : vector<128x512xf32>
    %3 = tpu.matmul %1, %2, %cst {dimension_numbers = #tpu.dot_dimension_numbers<[1], [0], [0], [1], [0, 0, 1, 1], [], []>} : vector<128x512xbf16>, vector<512x512xbf16>, vector<128x512xf32> -> vector<128x512xf32>
    %c0_3 = arith.constant 0 : index
    %c0_4 = arith.constant 0 : index
    %4 = vector.load %arg3[%c0_3, %c0_4] : memref<1x512xf32, #tpu.memory_space<vmem>>, vector<1x512xf32>
    %5 = vector.broadcast %4 : vector<1x512xf32> to vector<128x512xf32>
    %6 = arith.addf %3, %5 : vector<128x512xf32>
    %cst_5 = arith.constant 0.000000e+00 : f32
    %7 = vector.broadcast %cst_5 : f32 to vector<128x512xf32>
    %8 = arith.maximumf %6, %7 : vector<128x512xf32>
    %9 = arith.truncf %8 : vector<128x512xf32> to vector<128x512xbf16>
    %c0_6 = arith.constant 0 : index
    %c0_7 = arith.constant 0 : index
    %10 = vector.load %arg4[%c0_6, %c0_7] : memref<512x512xbf16, #tpu.memory_space<vmem>>, vector<512x512xbf16>
    %cst_8 = arith.constant dense<0.000000e+00> : vector<128x512xf32>
    %11 = tpu.matmul %9, %10, %cst_8 {dimension_numbers = #tpu.dot_dimension_numbers<[1], [0], [0], [1], [0, 0, 1, 1], [], []>} : vector<128x512xbf16>, vector<512x512xbf16>, vector<128x512xf32> -> vector<128x512xf32>
    %c0_9 = arith.constant 0 : index
    %c0_10 = arith.constant 0 : index
    %12 = vector.load %arg5[%c0_9, %c0_10] : memref<1x512xf32, #tpu.memory_space<vmem>>, vector<1x512xf32>
    %13 = vector.broadcast %12 : vector<1x512xf32> to vector<128x512xf32>
    %14 = arith.addf %11, %13 : vector<128x512xf32>
    %cst_11 = arith.constant 0.000000e+00 : f32
    %15 = vector.broadcast %cst_11 : f32 to vector<128x512xf32>
    %16 = arith.maximumf %14, %15 : vector<128x512xf32>
    %17 = arith.truncf %16 : vector<128x512xf32> to vector<128x512xbf16>
    %c0_12 = arith.constant 0 : index
    %c0_13 = arith.constant 0 : index
    %18 = vector.load %arg6[%c0_12, %c0_13] : memref<512x256xbf16, #tpu.memory_space<vmem>>, vector<512x256xbf16>
    %cst_14 = arith.constant dense<0.000000e+00> : vector<128x256xf32>
    %19 = tpu.matmul %17, %18, %cst_14 {dimension_numbers = #tpu.dot_dimension_numbers<[1], [0], [0], [1], [0, 0, 1, 1], [], []>} : vector<128x512xbf16>, vector<512x256xbf16>, vector<128x256xf32> -> vector<128x256xf32>
    %c0_15 = arith.constant 0 : index
    %c0_16 = arith.constant 0 : index
    %20 = vector.load %arg7[%c0_15, %c0_16] : memref<1x256xf32, #tpu.memory_space<vmem>>, vector<1x256xf32>
    %21 = vector.broadcast %20 : vector<1x256xf32> to vector<128x256xf32>
    %22 = arith.addf %19, %21 : vector<128x256xf32>
    %23 = arith.truncf %22 : vector<128x256xf32> to vector<128x256xbf16>
    %c0_17 = arith.constant 0 : index
    %c0_18 = arith.constant 0 : index
    %24 = vector.load %arg8[%c0_17, %c0_18] : memref<256x512xbf16, #tpu.memory_space<vmem>>, vector<256x512xbf16>
    %cst_19 = arith.constant dense<0.000000e+00> : vector<128x512xf32>
    %25 = tpu.matmul %23, %24, %cst_19 {dimension_numbers = #tpu.dot_dimension_numbers<[1], [0], [0], [1], [0, 0, 1, 1], [], []>} : vector<128x256xbf16>, vector<256x512xbf16>, vector<128x512xf32> -> vector<128x512xf32>
    %c0_20 = arith.constant 0 : index
    %c0_21 = arith.constant 0 : index
    %26 = vector.load %arg9[%c0_20, %c0_21] : memref<1x512xf32, #tpu.memory_space<vmem>>, vector<1x512xf32>
    %27 = vector.broadcast %26 : vector<1x512xf32> to vector<128x512xf32>
    %28 = arith.addf %25, %27 : vector<128x512xf32>
    %cst_22 = arith.constant 0.000000e+00 : f32
    %29 = vector.broadcast %cst_22 : f32 to vector<128x512xf32>
    %30 = arith.maximumf %28, %29 : vector<128x512xf32>
    %31 = arith.truncf %30 : vector<128x512xf32> to vector<128x512xbf16>
    %c0_23 = arith.constant 0 : index
    %c0_24 = arith.constant 0 : index
    %32 = vector.load %arg10[%c0_23, %c0_24] : memref<512x512xbf16, #tpu.memory_space<vmem>>, vector<512x512xbf16>
    %cst_25 = arith.constant dense<0.000000e+00> : vector<128x512xf32>
    %33 = tpu.matmul %31, %32, %cst_25 {dimension_numbers = #tpu.dot_dimension_numbers<[1], [0], [0], [1], [0, 0, 1, 1], [], []>} : vector<128x512xbf16>, vector<512x512xbf16>, vector<128x512xf32> -> vector<128x512xf32>
    %c0_26 = arith.constant 0 : index
    %c0_27 = arith.constant 0 : index
    %34 = vector.load %arg11[%c0_26, %c0_27] : memref<1x512xf32, #tpu.memory_space<vmem>>, vector<1x512xf32>
    %35 = vector.broadcast %34 : vector<1x512xf32> to vector<128x512xf32>
    %36 = arith.addf %33, %35 : vector<128x512xf32>
    %cst_28 = arith.constant 0.000000e+00 : f32
    %37 = vector.broadcast %cst_28 : f32 to vector<128x512xf32>
    %38 = arith.maximumf %36, %37 : vector<128x512xf32>
    %39 = arith.truncf %38 : vector<128x512xf32> to vector<128x512xbf16>
    %c0_29 = arith.constant 0 : index
    %c0_30 = arith.constant 0 : index
    %40 = vector.load %arg12[%c0_29, %c0_30] : memref<512x512xbf16, #tpu.memory_space<vmem>>, vector<512x512xbf16>
    %cst_31 = arith.constant dense<0.000000e+00> : vector<128x512xf32>
    %41 = tpu.matmul %39, %40, %cst_31 {dimension_numbers = #tpu.dot_dimension_numbers<[1], [0], [0], [1], [0, 0, 1, 1], [], []>} : vector<128x512xbf16>, vector<512x512xbf16>, vector<128x512xf32> -> vector<128x512xf32>
    %c0_32 = arith.constant 0 : index
    %c0_33 = arith.constant 0 : index
    %42 = vector.load %arg13[%c0_32, %c0_33] : memref<1x512xf32, #tpu.memory_space<vmem>>, vector<1x512xf32>
    %43 = vector.broadcast %42 : vector<1x512xf32> to vector<128x512xf32>
    %44 = arith.addf %41, %43 : vector<128x512xf32>
    %45 = arith.mulf %44, %44 : vector<128x512xf32>
    %cst_34 = arith.constant dense<0.000000e+00> : vector<128xf32>
    %46 = vector.multi_reduction <add>, %45, %cst_34 [1] : vector<128x512xf32> to vector<128xf32>
    %47 = vector.shape_cast %46 : vector<128xf32> to vector<128x1xf32>
    %48 = math.rsqrt %47 : vector<128x1xf32>
    %49 = vector.broadcast %48 : vector<128x1xf32> to vector<128x512xf32>
    %50 = arith.mulf %44, %49 : vector<128x512xf32>
    %c0_35 = arith.constant 0 : index
    %c0_36 = arith.constant 0 : index
    %51 = vector.load %arg14[%c0_35, %c0_36] : memref<128x512xf32, #tpu.memory_space<vmem>>, vector<128x512xf32>
    tpu.vector_store %arg14[%c0_35, %c0_36], %50 {strides = array<i32>} : memref<128x512xf32, #tpu.memory_space<vmem>>, vector<128x512xf32>,
    return
  }
  func.func @transform_0(%arg0: i32) -> (i32, i32) {
    %c0_i32 = arith.constant 0 : i32
    %c0_i32_0 = arith.constant 0 : i32
    return %arg0, %c0_i32 : i32, i32
  }
  func.func @transform_1(%arg0: i32) -> (i32, i32) {
    %c0_i32 = arith.constant 0 : i32
    %c0_i32_0 = arith.constant 0 : i32
    %c0_i32_1 = arith.constant 0 : i32
    return %c0_i32, %c0_i32_0 : i32, i32
  }
  func.func @transform_2(%arg0: i32) -> (i32, i32) {
    %c0_i32 = arith.constant 0 : i32
    %c0_i32_0 = arith.constant 0 : i32
    %c0_i32_1 = arith.constant 0 : i32
    return %c0_i32, %c0_i32_0 : i32, i32
  }
  func.func @transform_3(%arg0: i32) -> (i32, i32) {
    %c0_i32 = arith.constant 0 : i32
    %c0_i32_0 = arith.constant 0 : i32
    %c0_i32_1 = arith.constant 0 : i32
    return %c0_i32, %c0_i32_0 : i32, i32
  }
  func.func @transform_4(%arg0: i32) -> (i32, i32) {
    %c0_i32 = arith.constant 0 : i32
    %c0_i32_0 = arith.constant 0 : i32
    %c0_i32_1 = arith.constant 0 : i32
    return %c0_i32, %c0_i32_0 : i32, i32
  }
  func.func @transform_5(%arg0: i32) -> (i32, i32) {
    %c0_i32 = arith.constant 0 : i32
    %c0_i32_0 = arith.constant 0 : i32
    %c0_i32_1 = arith.constant 0 : i32
    return %c0_i32, %c0_i32_0 : i32, i32
  }
  func.func @transform_6(%arg0: i32) -> (i32, i32) {
    %c0_i32 = arith.constant 0 : i32
    %c0_i32_0 = arith.constant 0 : i32
    %c0_i32_1 = arith.constant 0 : i32
    return %c0_i32, %c0_i32_0 : i32, i32
  }
  func.func @transform_7(%arg0: i32) -> (i32, i32) {
    %c0_i32 = arith.constant 0 : i32
    %c0_i32_0 = arith.constant 0 : i32
    %c0_i32_1 = arith.constant 0 : i32
    return %c0_i32, %c0_i32_0 : i32, i32
  }
  func.func @transform_8(%arg0: i32) -> (i32, i32) {
    %c0_i32 = arith.constant 0 : i32
    %c0_i32_0 = arith.constant 0 : i32
    %c0_i32_1 = arith.constant 0 : i32
    return %c0_i32, %c0_i32_0 : i32, i32
  }
  func.func @transform_9(%arg0: i32) -> (i32, i32) {
    %c0_i32 = arith.constant 0 : i32
    %c0_i32_0 = arith.constant 0 : i32
    %c0_i32_1 = arith.constant 0 : i32
    return %c0_i32, %c0_i32_0 : i32, i32
  }
  func.func @transform_10(%arg0: i32) -> (i32, i32) {
    %c0_i32 = arith.constant 0 : i32
    %c0_i32_0 = arith.constant 0 : i32
    %c0_i32_1 = arith.constant 0 : i32
    return %c0_i32, %c0_i32_0 : i32, i32
  }
  func.func @transform_11(%arg0: i32) -> (i32, i32) {
    %c0_i32 = arith.constant 0 : i32
    %c0_i32_0 = arith.constant 0 : i32
    %c0_i32_1 = arith.constant 0 : i32
    return %c0_i32, %c0_i32_0 : i32, i32
  }
  func.func @transform_12(%arg0: i32) -> (i32, i32) {
    %c0_i32 = arith.constant 0 : i32
    %c0_i32_0 = arith.constant 0 : i32
    %c0_i32_1 = arith.constant 0 : i32
    return %c0_i32, %c0_i32_0 : i32, i32
  }
  func.func @transform_13(%arg0: i32) -> (i32, i32) {
    %c0_i32 = arith.constant 0 : i32
    %c0_i32_0 = arith.constant 0 : i32
    return %arg0, %c0_i32 : i32, i32
  }
}

</mosaic_0001>

<bundles_post_ra>
// kernel: cae_forward.1
= control target key start
LH: loop header
LB: loop body
LE: loop exit
PB: predicated region body
PF: predicated region fallthrough
CT: control target
= control target key end

     0   :  { %s11883_s0 = inlined_call_operand.hbm [shape: f32[512,512], index: 0, kind: input, shape index: {}]   ;;  %s11884_s1 = inlined_call_operand.hbm [shape: bf16[512,512], index: 1, kind: input, shape index: {}]   ;;  %s11885_s2 = inlined_call_operand.vmem [shape: f32[1,512], index: 2, kind: input, shape index: {}]   ;;  %s11886_s3 = inlined_call_operand.hbm [shape: bf16[512,512], index: 3, kind: input, shape index: {}]   ;;  %s11887_s4 = inlined_call_operand.vmem [shape: f32[1,512], index: 4, kind: input, shape index: {}]   ;;  %s11888_s5 = inlined_call_operand.hbm [shape: bf16[512,256], index: 5, kind: input, shape index: {}]   ;;  %s11889_s6 = inlined_call_operand.vmem [shape: f32[1,256], index: 6, kind: input, shape index: {}]   ;;  %s11890_s7 = inlined_call_operand.hbm [shape: bf16[256,512], index: 7, kind: input, shape index: {}]   ;;  %s11891_s8 = inlined_call_operand.vmem [shape: f32[1,512], index: 8, kind: input, shape index: {}]   ;;  %s11892_s9 = inlined_call_operand.hbm [shape: bf16[512,512], index: 9, kind: input, shape index: {}]   ;;  %s11893_s10 = inlined_call_operand.vmem [shape: f32[1,512], index: 10, kind: input, shape index: {}]   ;;  %s11894_s11 = inlined_call_operand.hbm [shape: bf16[512,512], index: 11, kind: input, shape index: {}]   ;;  %s11895_s12 = inlined_call_operand.vmem [shape: f32[1,512], index: 12, kind: input, shape index: {}]   ;;  %s11896_s13 = inlined_call_operand.hbm [shape: f32[512,512], index: 13, kind: output, shape index: {}]  }
   0x1   :  { %11920 = sst [smem:[#allocation37_spill]] %s11884_s1 }
   0x2   :  { %11921 = sst [smem:[#allocation38_spill]] %s11889_s6 }
   0x3   :  { %11922 = sst [smem:[#allocation39_spill]] %s11891_s8 }
   0x4   :  { %11923 = sst [smem:[#allocation40_spill]] %s11893_s10 }
   0x5   :  { %11924 = sst [smem:[#allocation41_spill]] %s11895_s12 }
   0x6   :  { %11925 = sst [smem:[#allocation42_spill]] %s11896_s13 }
   0x7   :  { %18 = vsyncpa [#allocation3], 0 }
   0x8   :  { %20 = vsyncpa [#allocation3 + $0x1], 0 }
   0x9   :  { %21 = vsyncpa [#allocation6], 0 }
   0xa   :  { %22 = vsyncpa [#allocation9], 0 }
   0xb   :  { %23 = vsyncpa [#allocation12], 0 }
   0xc   :  { %24 = vsyncpa [#allocation4], 0 }
   0xd   :  { %26 = vsyncpa [#allocation4 + $0x1], 0  ;;  %s10419_s25 = smov 0   ;;  %s10421_s26 = smov 0  }
   0xe   :  { %s10423_s27 = smov 0   ;;  %s10425_s28 = smov 0  }
   0xf LB: > { %s10333_s29 = smov [#allocation5]   ;;  %s10440_s14 = sadd.s32 4294967295, %s10331_s28   ;;  %s10331_s28 = sphi %s10425_s28, %s11988_s28   ;;  %s10327_s27 = sphi %s10423_s27, %s11987_s27   ;;  %s10323_s26 = sphi %s10421_s26, %s11986_s26   ;;  %s10319_s25 = sphi %s10419_s25, %s11985_s25  }
  0x10   : > { %s353_s30 = sshll.u32 %s10333_s29, 4  ;;  %p7701_p0 = scmp.ge.s32.totalorder %s10331_s28, 1  ;;  %s10445_s30 = int_to_ptr.vmem [resolvable:$true] %s353_s30 }
  0x11   : > { %p11900_p1 = scmp.eq.s32.totalorder %s10440_s14, 0  ;;  %p341_p2 = scmp.lt.s32.totalorder %s10331_s28, 5 }
  0x12   : > { %s10334_s16 = smov [#allocation8]   ;;  %s10335_s19 = smov [#allocation11]  }
  0x13   : > { %p10447_p3 = pnand %p7701_p0, %p341_p2  ;;  %s385_s17 = sshll.u32 %s10334_s16, 4  ;;  %s10459_s17 = int_to_ptr.vmem [resolvable:$true] %s385_s17 }
  0x14   : > { %s10461_s20 = sshll.u32 %s10335_s19, 4  ;;  %s11928_s1 = sld [smem:[#allocation37_spill]]  ;;  %s418_s20 = int_to_ptr.vmem [resolvable:$true] %s10461_s20 }
  0x15   : > { %s11926_s15 = scalar_select %p10447_p3, 1, 0 }
  0x16   : > { %p8976_p4 = pneg %p10447_p3 }
  0x18   : > { %p10455_p5 = pnand %p8976_p4, %p11900_p1 }
  0x1a   : > { %s10055_s23 = scalar_lea.hbm %s11928_s1, 16384  ;;  %p10471_p7 = pneg %p10455_p5 }
  0x1b   : > { %p10056_p6 = scmp.ne.s32.totalorder %s11928_s1, %s10055_s23  ;;  %p10062_p10 = scmp.lt.u32.totalorder %s10055_s23, %s11928_s1 }
  0x1d   : > { %p10058_p8 = pnand %p10471_p7, %p10056_p6 }
  0x1f   : > { %p10059_p9 = pneg %p10058_p8 }
  0x21   : > { %p10064_p11 = pnand %p10062_p10, %p10059_p9 }
  0x23   : > { %10067 = shalt.err (!%p10064_p11)
}
  0x24   : > { %s10068_s21 = scalar_lea.vmem %s10445_s30, 16384  ;;  %p10076_p2 = scmp.lt.s32.totalorder %s10445_s30, %s10445_s30 }
  0x25   : > { %p10069_p12 = scmp.ne.s32.totalorder %s10445_s30, %s10068_s21  ;;  %p10077_p4 = scmp.lt.s32.totalorder %s10068_s21, %s10068_s21 }
  0x27   : > { %p10071_p13 = pnand %p10069_p12, %p10471_p7  ;;  %p10078_p6 = por %p10077_p4, %p10076_p2 }
  0x29   : > { %p10072_p0 = pneg %p10071_p13 }
  0x2b   : > { %p10079_p8 = pnand %p10078_p6, %p10072_p0 }
  0x2d   : > { %10082 = shalt.err (!%p10079_p8)
}
  0x2e   : > { %s11898_s22 = smov 256   ;;  %s10337_s13 = smov 16  }
  0x2f   : > { %8979 = dma.hbm_to_vmem [thread:$0]  (!%p10455_p5), %s11928_s1, 16384, %s10445_s30, [#allocation6], %s11898_s22, %s11898_s22, %s10337_s13  }
  0x30   : > { %s10083_s21 = scalar_lea.hbm %s11888_s5, 8192 }
  0x31   : > { %p10084_p9 = scmp.ne.s32.totalorder %s11888_s5, %s10083_s21  ;;  %p10090_p12 = scmp.lt.u32.totalorder %s10083_s21, %s11888_s5 }
  0x33   : > { %p10086_p10 = pnand %p10084_p9, %p10471_p7 }
  0x35   : > { %p10087_p11 = pneg %p10086_p10 }
  0x37   : > { %p10092_p13 = pnand %p10090_p12, %p10087_p11 }
  0x39   : > { %10095 = shalt.err (!%p10092_p13)
}
  0x3a   : > { %s10096_s30 = scalar_lea.vmem %s10459_s17, 8192  ;;  %p10104_p6 = scmp.lt.s32.totalorder %s10459_s17, %s10459_s17 }
  0x3b   : > { %p10097_p0 = scmp.ne.s32.totalorder %s10459_s17, %s10096_s30  ;;  %p10105_p8 = scmp.lt.s32.totalorder %s10096_s30, %s10096_s30 }
  0x3d   : > { %p10099_p2 = pnand %p10097_p0, %p10471_p7  ;;  %p10106_p9 = por %p10105_p8, %p10104_p6 }
  0x3f   : > { %p10100_p4 = pneg %p10099_p2 }
  0x41   : > { %p10107_p10 = pnand %p10106_p9, %p10100_p4 }
  0x43   : > { %10110 = shalt.err (!%p10107_p10)
}
  0x44   : > { %s10338_s10 = smov 128   ;;  %s10339_s6 = smov 8  }
  0x45   : > { %8985 = dma.hbm_to_vmem [thread:$0]  (!%p10455_p5), %s11888_s5, 8192, %s10459_s17, [#allocation9], %s10338_s10, %s10338_s10, %s10339_s6  }
  0x46   : > { %s10111_s29 = scalar_lea.hbm %s11892_s9, 16384 }
  0x47   : > { %p10112_p11 = scmp.ne.s32.totalorder %s11892_s9, %s10111_s29  ;;  %p10118_p0 = scmp.lt.u32.totalorder %s10111_s29, %s11892_s9 }
  0x49   : > { %p10114_p12 = pnand %p10112_p11, %p10471_p7 }
  0x4b   : > { %p10115_p13 = pneg %p10114_p12 }
  0x4d   : > { %p10120_p2 = pnand %p10118_p0, %p10115_p13 }
  0x4f   : > { %10123 = shalt.err (!%p10120_p2)
}
  0x50   : > { %s10124_s8 = scalar_lea.vmem %s418_s20, 16384  ;;  %p10132_p9 = scmp.lt.s32.totalorder %s418_s20, %s418_s20 }
  0x51   : > { %p10125_p4 = scmp.ne.s32.totalorder %s418_s20, %s10124_s8  ;;  %p10133_p10 = scmp.lt.s32.totalorder %s10124_s8, %s10124_s8 }
  0x53   : > { %p10127_p6 = pnand %p10125_p4, %p10471_p7  ;;  %p10134_p1 = por %p10133_p10, %p10132_p9 }
  0x55   : > { %p10128_p8 = pneg %p10127_p6 }
  0x57   : > { %p10135_p3 = pnand %p10134_p1, %p10128_p8 }
  0x59   : > { %10138 = shalt.err (!%p10135_p3)
}
  0x5a   : > { %s11930_s17 = smov 256   ;;  %s10340_s6 = smov [#allocation7]  }
  0x5b   : > { %8991 = dma.hbm_to_vmem [thread:$0]  (!%p10455_p5), %s11892_s9, 16384, %s418_s20, [#allocation12], %s11930_s17, %s11930_s17, %s10337_s13  }
  0x5c   : > { %s369_s12 = sshll.u32 %s10340_s6, 4  ;;  %s10341_s23 = smov [#allocation10]   ;;  %s370_s12 = int_to_ptr.vmem [resolvable:$true] %s369_s12 }
  0x5d   : > { %s401_s24 = sshll.u32 %s10341_s23, 4  ;;  %s10139_s21 = scalar_lea.hbm %s11886_s3, 16384  ;;  %s402_s24 = int_to_ptr.vmem [resolvable:$true] %s401_s24 }
  0x5e   : > { %p10140_p1 = scmp.ne.s32.totalorder %s11886_s3, %s10139_s21  ;;  %p10146_p12 = scmp.lt.u32.totalorder %s10139_s21, %s11886_s3 }
  0x60   : > { %p10142_p3 = pnand %p10140_p1, %p10471_p7 }
  0x62   : > { %p10143_p11 = pneg %p10142_p3 }
  0x64   : > { %p10148_p13 = pnand %p10146_p12, %p10143_p11 }
  0x66   : > { %10151 = shalt.err (!%p10148_p13)
}
  0x67   : > { %s10152_s20 = scalar_lea.vmem %s370_s12, 16384  ;;  %p10160_p6 = scmp.lt.s32.totalorder %s370_s12, %s370_s12 }
  0x68   : > { %p10153_p0 = scmp.ne.s32.totalorder %s370_s12, %s10152_s20  ;;  %p10161_p8 = scmp.lt.s32.totalorder %s10152_s20, %s10152_s20 }
  0x6a   : > { %p10155_p2 = pnand %p10153_p0, %p10471_p7  ;;  %p10162_p9 = por %p10161_p8, %p10160_p6 }
  0x6c   : > { %p10156_p4 = pneg %p10155_p2 }
  0x6e   : > { %p10163_p10 = pnand %p10162_p9, %p10156_p4 }
  0x70   : > { %10166 = shalt.err (!%p10163_p10)
}
  0x71   : > { %8982 = dma.hbm_to_vmem [thread:$0]  (!%p10455_p5), %s11886_s3, 16384, %s370_s12, [#allocation6], %s11930_s17, %s11930_s17, %s10337_s13  }
  0x72   : > { %s10167_s29 = scalar_lea.hbm %s11890_s7, 8192 }
  0x73   : > { %p10168_p1 = scmp.ne.s32.totalorder %s11890_s7, %s10167_s29  ;;  %p10174_p12 = scmp.lt.u32.totalorder %s10167_s29, %s11890_s7 }
  0x75   : > { %p10170_p3 = pnand %p10168_p1, %p10471_p7 }
  0x77   : > { %p10171_p11 = pneg %p10170_p3 }
  0x79   : > { %p10176_p13 = pnand %p10174_p12, %p10171_p11 }
  0x7b   : > { %10179 = shalt.err (!%p10176_p13)
}
  0x7c   : > { %s10180_s22 = scalar_lea.vmem %s402_s24, 8192  ;;  %p10188_p6 = scmp.lt.s32.totalorder %s402_s24, %s402_s24 }
  0x7d   : > { %p10181_p0 = scmp.ne.s32.totalorder %s402_s24, %s10180_s22  ;;  %p10189_p8 = scmp.lt.s32.totalorder %s10180_s22, %s10180_s22 }
  0x7f   : > { %p10183_p2 = pnand %p10181_p0, %p10471_p7  ;;  %p10190_p9 = por %p10189_p8, %p10188_p6 }
  0x81   : > { %p10184_p4 = pneg %p10183_p2 }
  0x83   : > { %p10191_p10 = pnand %p10190_p9, %p10184_p4 }
  0x85   : > { %10194 = shalt.err (!%p10191_p10)
}
  0x86   : > { %8988 = dma.hbm_to_vmem [thread:$0]  (!%p10455_p5), %s11890_s7, 8192, %s402_s24, [#allocation9], %s11930_s17, %s11930_s17, %s10337_s13  }
  0x87   : > { %s10342_s1 = smov [#allocation13]   ;;  %s10195_s29 = scalar_lea.hbm %s11894_s11, 16384 }
  0x88   : > { %s433_s10 = sshll.u32 %s10342_s1, 4  ;;  %p10196_p1 = scmp.ne.s32.totalorder %s11894_s11, %s10195_s29  ;;  %s434_s10 = int_to_ptr.vmem [resolvable:$true] %s433_s10 }
  0x89   : > { %p10202_p12 = scmp.lt.u32.totalorder %s10195_s29, %s11894_s11 }
  0x8a   : > { %p10198_p3 = pnand %p10196_p1, %p10471_p7 }
  0x8c   : > { %p10199_p11 = pneg %p10198_p3 }
  0x8e   : > { %p10204_p13 = pnand %p10202_p12, %p10199_p11 }
  0x90   : > { %10207 = shalt.err (!%p10204_p13)
}
  0x91   : > { %s10208_s24 = scalar_lea.vmem %s434_s10, 16384  ;;  %p10216_p6 = scmp.lt.s32.totalorder %s434_s10, %s434_s10 }
  0x92   : > { %p10209_p0 = scmp.ne.s32.totalorder %s434_s10, %s10208_s24  ;;  %p10217_p8 = scmp.lt.s32.totalorder %s10208_s24, %s10208_s24 }
  0x94   : > { %p10211_p2 = pnand %p10209_p0, %p10471_p7  ;;  %p10218_p9 = por %p10217_p8, %p10216_p6 }
  0x96   : > { %p10212_p4 = pneg %p10211_p2 }
  0x98   : > { %p10219_p10 = pnand %p10218_p9, %p10212_p4 }
  0x9a   : > { %10222 = shalt.err (!%p10219_p10)
}
  0x9b   : > { %8994 = dma.hbm_to_vmem [thread:$0]  (!%p10455_p5), %s11894_s11, 16384, %s434_s10, [#allocation12], %s11930_s17, %s11930_s17, %s10337_s13  }
  0x9c   : > { %s7700_s18 = sadd.s32 4294967294, %s10331_s28   ;;  %s10605_s16 = sadd.s32 1, %s10331_s28  }
  0x9d   : > { %s36_s20 = ssub.s32 %s10331_s28, %s10605_s16  ;;  %s39_s1 = sadd.s32 1, %s10327_s27 }
  0x9e   : > { %p37_p7 = scmp.eq.s32.totalorder %s36_s20, 0  ;;  %p46_p1 = scmp.ne.s32.totalorder %s10327_s27, %s10323_s26 }
  0x9f   : > { %p47_p3 = scmp.eq.s32.totalorder %s10331_s28, 0  ;;  %p52_p11 = scmp.ne.s32.totalorder %s10323_s26, %s10319_s25 }
  0xa0   : > { %s10616_s6 = scalar_select %p37_p7, %s10327_s27, %s39_s1  }
  0xa1   : > { %p10618_p12 = por %p47_p3, %p46_p1  ;;  %p11932_p13 = scmp.eq.s32.totalorder %s10440_s14, 0 }
  0xa2   : > { %p328_p0 = scmp.eq.s32.totalorder %s10440_s14, 3  ;;  %p334_p2 = scmp.eq.s32.totalorder %s7700_s18, 3 }
  0xa3   : > { %p10624_p5 = por %p11932_p13, %p52_p11  ;;  %p9009_p4 = scmp.lt.s32.totalorder %s10331_s28, 4 }
  0xa4   : > { %s450_s17 = sand.u32 1, %s10327_s27   ;;  %p10631_p6 = por %p328_p0, %p46_p1 }
  0xa5   : > { %p10635_p8 = por %p334_p2, %p52_p11  ;;  %s7709_s19 = sshll.u32 %s450_s17, 9 }
  0xa6   : > { %s11934_s10 = scalar_select %p10631_p6, 1, 0 }
  0xa7   : > { %s11935_s29 = scalar_select %p10635_p8, 1, 0 }
  0xa8   : > { %s8369_s21 = sshll.u32 %s10331_s28, 13  ;;  %s454_s22 = scalar_lea.vmem [#allocation2], %s7709_s19 }
  0xa9   : > { %s10643_s24 = scalar_lea.hbm %s11883_s0, %s8369_s21  ;;  %s462_s12 = sshll.u32 %s454_s22, 4  ;;  %s10645_s12 = int_to_ptr.vmem [resolvable:$true] %s462_s12 }
  0xaa   : > { %p10649_p9 = pnand %p9009_p4, %p10618_p12  ;;  %s10653_s20 = scalar_lea.sflag [#allocation3], %s450_s17 }
  0xab   : > { %s10223_s1 = scalar_lea.hbm %s10643_s24, 8192  ;;  %s10228_s23 = scalar_lea.hbm %s11883_s0, 32768 }
  0xac   : > { %p10224_p10 = scmp.ne.s32.totalorder %s10643_s24, %s10223_s1  ;;  %p10225_p7 = pneg %p10649_p9 }
  0xad   : > { %p10229_p11 = scmp.lt.u32.totalorder %s10643_s24, %s11883_s0  ;;  %p10230_p12 = scmp.lt.u32.totalorder %s10228_s23, %s10223_s1 }
  0xae   : > { %p10226_p1 = pnand %p10225_p7, %p10224_p10  ;;  %p10232_p0 = scmp.lt.u32.totalorder %s10223_s1, %s10643_s24 }
  0xaf   : > { %p10231_p13 = por %p10230_p12, %p10229_p11 }
  0xb0   : > { %p10227_p3 = pneg %p10226_p1 }
  0xb1   : > { %p10233_p2 = por %p10232_p0, %p10231_p13 }
  0xb3   : > { %p10234_p4 = pnand %p10233_p2, %p10227_p3 }
  0xb5   : > { %10237 = shalt.err (!%p10234_p4)
}
  0xb6   : > { %s10238_s17 = scalar_lea.vmem %s10645_s12, 8192  ;;  %s10343_s22 = smov [#allocation2]  }
  0xb7   : > { %p10239_p10 = scmp.ne.s32.totalorder %s10645_s12, %s10238_s17  ;;  %s10243_s19 = sshll.u32 %s10343_s22, 4  ;;  %s10244_s19 = int_to_ptr.vmem [resolvable:$false] %s10243_s19 }
  0xb8   : > { %s10245_s21 = scalar_lea.vmem %s10244_s19, 16384  ;;  %p10246_p6 = scmp.lt.s32.totalorder %s10645_s12, %s10244_s19 }
  0xb9   : > { %p10241_p1 = pnand %p10239_p10, %p10225_p7  ;;  %p10247_p11 = scmp.lt.s32.totalorder %s10245_s21, %s10238_s17 }
  0xbb   : > { %p10242_p8 = pneg %p10241_p1  ;;  %p10248_p12 = por %p10247_p11, %p10246_p6 }
  0xbd   : > { %p10249_p13 = pnand %p10248_p12, %p10242_p8 }
  0xbf   : > { %10252 = shalt.err (!%p10249_p13)
}
  0xc0   : > { %s10344_s1 = smov 512   ;;  %s10345_s23 = smov 32  }
  0xc1   : > { %8998 = dma.hbm_to_vmem [thread:$0]  (!%p10649_p9), %s10643_s24, 8192, %s10645_s12, %s10653_s20, %s10344_s1, %s10344_s1, %s10345_s23  }
  0xc2   : > { %p11937_p7 = scmp.ne.s32.totalorder %s11926_s15, 0 }
  0xc4   : > { %474 = sbr.rel (%p11937_p7) target bundleno = 2162 (0x872), region = 72 }
  0xcb   : > { %s10684_s30 = sand.u32 1, %s10323_s26  }
  0xcc   : > { %s7714_s8 = sshll.u32 %s10684_s30, 9  ;;  %s477_s17 = scalar_lea.sflag [#allocation3], %s10684_s30 }
  0xcd   : > { %s10690_s22 = scalar_lea.vmem [#allocation2], %s7714_s8 }
  0xce   : > { %10298 = dma.done.wait (%p10624_p5), %s477_s17, 8192  }
  0xcf   : > { %10300 = vsyncadd (%p10624_p5), %s477_s17, 4294959104  ;;  %p11938_p6 = scmp.eq.s32.totalorder %s10440_s14, 0 }
  0xd1   : > { %10302 = dma.done.wait (%p11938_p6), [#allocation6], 32768   ;;  %p11939_p8 = pmov %p11938_p6 }
  0xd2   : > { %p11940_p9 = pmov %p11938_p6 }
  0xd3   : > { %10304 = vsyncadd (%p11939_p8), [#allocation6], 4294934528 }
  0xd4   : > { %10306 = dma.done.wait (%p11940_p9), [#allocation9], 16384   ;;  %p11941_p3 = pmov %p11938_p6 }
  0xd6   : > { %10308 = vsyncadd (%p11941_p3), [#allocation9], 4294950912  ;;  %p11942_p0 = pmov %p11941_p3 }
  0xd8   : > { %10310 = dma.done.wait (%p11942_p0), [#allocation12], 32768   ;;  %p11943_p2 = pmov %p11942_p0 }
  0xd9   : > { %v9063_v0 = vld [vmem:[#allocation5 + $0x4] ss:$16 sps:$4 sm:$0xff]   ;;  %v9065_v1 = vld [vmem:[#allocation5 + $0xc] ss:$16 sps:$4 sm:$0xff]   ;;  %v9067_v2 = vld [vmem:[#allocation5] ss:$16 sps:$4 sm:$0xff]  }
  0xda   : > { %10312 = vsyncadd (%p11943_p2), [#allocation12], 4294934528  ;;  %1435 = vmatprep.subr.bf16.mxu0 %v9063_v0  ;;  %v9068_v3 = vld [vmem:[#allocation5 + $0x8] ss:$16 sps:$4 sm:$0xff]   ;;  %1661 = vmatprep.subr.bf16.mxu1 %v9065_v1  ;;  %v9069_v4 = vld [vmem:[#allocation5 + $0x24] ss:$16 sps:$4 sm:$0xff]  }
  0xdb   : > { %1436 = vmatpush1.bf16.msra.mxu0 %v9067_v2  ;;  %1662 = vmatpush1.bf16.msra.mxu1 %v9068_v3  ;;  %v9071_v5 = vld [vmem:[#allocation5 + $0x2c] ss:$16 sps:$4 sm:$0xff]   ;;  %v9073_v6 = vld [vmem:[#allocation5 + $0x20] ss:$16 sps:$4 sm:$0xff]   ;;  %v9074_v7 = vld [vmem:[#allocation5 + $0x28] ss:$16 sps:$4 sm:$0xff]  }
  0xdc   : > { %1437 = vmatprep.subr.bf16.mxu0 %v9069_v4  ;;  %1663 = vmatprep.subr.bf16.mxu1 %v9071_v5  ;;  %v9075_v8 = vld [vmem:[#allocation5 + $0x44] ss:$16 sps:$4 sm:$0xff]   ;;  %v9077_v9 = vld [vmem:[#allocation5 + $0x4c] ss:$16 sps:$4 sm:$0xff]   ;;  %v9079_v10 = vld [vmem:[#allocation5 + $0x40] ss:$16 sps:$4 sm:$0xff]  }
  0xdd   : > { %v9080_v11 = vld [vmem:[#allocation5 + $0x48] ss:$16 sps:$4 sm:$0xff]   ;;  %v9081_v12 = vld [vmem:[#allocation5 + $0x64] ss:$16 sps:$4 sm:$0xff]   ;;  %v9083_v13 = vld [vmem:[#allocation5 + $0x6c] ss:$16 sps:$4 sm:$0xff]  }
  0xde   : > { %v9085_v14 = vld [vmem:[#allocation5 + $0x60] ss:$16 sps:$4 sm:$0xff]   ;;  %v9086_v15 = vld [vmem:[#allocation5 + $0x68] ss:$16 sps:$4 sm:$0xff]   ;;  %v9087_v16 = vld [vmem:[#allocation5 + $0x84] ss:$16 sps:$4 sm:$0xff]  }
  0xdf   : > { %1438 = vmatpush1.bf16.msra.mxu0 %v9073_v6  ;;  %1664 = vmatpush1.bf16.msra.mxu1 %v9074_v7  ;;  %v9089_v17 = vld [vmem:[#allocation5 + $0x8c] ss:$16 sps:$4 sm:$0xff]   ;;  %v9091_v18 = vld [vmem:[#allocation5 + $0x80] ss:$16 sps:$4 sm:$0xff]   ;;  %v9092_v19 = vld [vmem:[#allocation5 + $0x88] ss:$16 sps:$4 sm:$0xff]  }
  0xe0   : > { %1439 = vmatprep.subr.bf16.mxu0 %v9075_v8  ;;  %1665 = vmatprep.subr.bf16.mxu1 %v9077_v9  ;;  %v9093_v20 = vld [vmem:[#allocation5 + $0xa4] ss:$16 sps:$4 sm:$0xff]   ;;  %v9095_v21 = vld [vmem:[#allocation5 + $0xac] ss:$16 sps:$4 sm:$0xff]   ;;  %v9097_v22 = vld [vmem:[#allocation5 + $0xa0] ss:$16 sps:$4 sm:$0xff]  }
  0xe1   : > { %v9098_v23 = vld [vmem:[#allocation5 + $0xa8] ss:$16 sps:$4 sm:$0xff]   ;;  %v9099_v24 = vld [vmem:[#allocation5 + $0xc4] ss:$16 sps:$4 sm:$0xff]   ;;  %v9101_v25 = vld [vmem:[#allocation5 + $0xcc] ss:$16 sps:$4 sm:$0xff]  }
  0xe2   : > { %v9103_v26 = vld [vmem:[#allocation5 + $0xc0] ss:$16 sps:$4 sm:$0xff]   ;;  %v9104_v27 = vld [vmem:[#allocation5 + $0xc8] ss:$16 sps:$4 sm:$0xff]   ;;  %v9105_v28 = vld [vmem:[#allocation5 + $0xe4] ss:$16 sps:$4 sm:$0xff]  }
  0xe3   : > { %1440 = vmatpush1.bf16.msra.mxu0 %v9079_v10  ;;  %1666 = vmatpush1.bf16.msra.mxu1 %v9080_v11  ;;  %v9107_v29 = vld [vmem:[#allocation5 + $0xec] ss:$16 sps:$4 sm:$0xff]   ;;  %v9109_v30 = vld [vmem:[#allocation5 + $0xe0] ss:$16 sps:$4 sm:$0xff]   ;;  %v9110_v31 = vld [vmem:[#allocation5 + $0xe8] ss:$16 sps:$4 sm:$0xff]  }
  0xe4   : > { %1441 = vmatprep.subr.bf16.mxu0 %v9081_v12  ;;  %1667 = vmatprep.subr.bf16.mxu1 %v9083_v13  ;;  %v9111_v32 = vld [vmem:[#allocation5 + $0x104] ss:$16 sps:$4 sm:$0xff]   ;;  %v9113_v33 = vld [vmem:[#allocation5 + $0x10c] ss:$16 sps:$4 sm:$0xff]   ;;  %v9115_v34 = vld [vmem:[#allocation5 + $0x100] ss:$16 sps:$4 sm:$0xff]  }
  0xe5   : > { %v9116_v35 = vld [vmem:[#allocation5 + $0x108] ss:$16 sps:$4 sm:$0xff]   ;;  %v9117_v36 = vld [vmem:[#allocation5 + $0x124] ss:$16 sps:$4 sm:$0xff]   ;;  %v9119_v37 = vld [vmem:[#allocation5 + $0x12c] ss:$16 sps:$4 sm:$0xff]  }
  0xe6   : > { %v9121_v38 = vld [vmem:[#allocation5 + $0x120] ss:$16 sps:$4 sm:$0xff]   ;;  %v9122_v39 = vld [vmem:[#allocation5 + $0x128] ss:$16 sps:$4 sm:$0xff]   ;;  %v9123_v40 = vld [vmem:[#allocation5 + $0x144] ss:$16 sps:$4 sm:$0xff]  }
  0xe7   : > { %1442 = vmatpush1.bf16.msra.mxu0 %v9085_v14  ;;  %1668 = vmatpush1.bf16.msra.mxu1 %v9086_v15  ;;  %v9125_v41 = vld [vmem:[#allocation5 + $0x14c] ss:$16 sps:$4 sm:$0xff]   ;;  %v9127_v42 = vld [vmem:[#allocation5 + $0x140] ss:$16 sps:$4 sm:$0xff]   ;;  %v9128_v43 = vld [vmem:[#allocation5 + $0x148] ss:$16 sps:$4 sm:$0xff]  }
  0xe8   : > { %1443 = vmatprep.subr.bf16.mxu0 %v9087_v16  ;;  %1669 = vmatprep.subr.bf16.mxu1 %v9089_v17  ;;  %v9129_v44 = vld [vmem:[#allocation5 + $0x164] ss:$16 sps:$4 sm:$0xff]   ;;  %v9131_v45 = vld [vmem:[#allocation5 + $0x16c] ss:$16 sps:$4 sm:$0xff]   ;;  %v9133_v47 = vld [vmem:[#allocation5 + $0x160] ss:$16 sps:$4 sm:$0xff]  }
  0xe9   : > { %v550_v46 = vld [vmem:[%s10690_s22 + $0x8] sm:$0xff]  ;;  %v9135_v50 = vld [vmem:[#allocation5 + $0x184] ss:$16 sps:$4 sm:$0xff]   ;;  %v9139_v53 = vld [vmem:[#allocation5 + $0x180] ss:$16 sps:$4 sm:$0xff]   ;;  %s11944_s19 = sld [smem:[#allocation38_spill]] }
  0xea   : > { %v9134_v48 = vld [vmem:[#allocation5 + $0x168] ss:$16 sps:$4 sm:$0xff]   ;;  %v9137_v52 = vld [vmem:[#allocation5 + $0x18c] ss:$16 sps:$4 sm:$0xff]   ;;  %v9141_v55 = vld [vmem:[#allocation5 + $0x1a4] ss:$16 sps:$4 sm:$0xff]  }
  0xeb   : > { %1444 = vmatpush1.bf16.msra.mxu0 %v9091_v18  ;;  %1670 = vmatpush1.bf16.msra.mxu1 %v9092_v19  ;;  %v554_v49 = vld [vmem:[%s10690_s22 + $0x28] sm:$0xff]  ;;  %v9145_v57 = vld [vmem:[#allocation5 + $0x1a0] ss:$16 sps:$4 sm:$0xff]   ;;  %v9147_v59 = vld [vmem:[#allocation5 + $0x1c4] ss:$16 sps:$4 sm:$0xff]   ;;  %s11945_s23 = sld [smem:[#allocation39_spill]] }
  0xec   : > { %1445 = vmatprep.subr.bf16.mxu0 %v9093_v20  ;;  %1671 = vmatprep.subr.bf16.mxu1 %v9095_v21  ;;  %v614_v51 = vpack.c.bf16 %v554_v49, %v550_v46  ;;  %v9140_v54 = vld [vmem:[#allocation5 + $0x188] ss:$16 sps:$4 sm:$0xff]   ;;  %v9143_v56 = vld [vmem:[#allocation5 + $0x1ac] ss:$16 sps:$4 sm:$0xff]   ;;  %v9151_v61 = vld [vmem:[#allocation5 + $0x1c0] ss:$16 sps:$4 sm:$0xff]  }
  0xed   : > { %v9146_v58 = vld [vmem:[#allocation5 + $0x1a8] ss:$16 sps:$4 sm:$0xff]   ;;  %v9149_v60 = vld [vmem:[#allocation5 + $0x1cc] ss:$16 sps:$4 sm:$0xff]   ;;  %v9153_v63 = vld [vmem:[#allocation5 + $0x1e4] ss:$16 sps:$4 sm:$0xff]  }
  0xee   : > { %1467 = vmatprep.mubr.bf16.mxu0 %v614_v51  ;;  %1693 = vmatprep.mubr.bf16.mxu1 %v614_v51  ;;  %v9152_v62 = vld [vmem:[#allocation5 + $0x1c8] ss:$16 sps:$4 sm:$0xff]   ;;  %v9155_v0 = vld [vmem:[#allocation5 + $0x1ec] ss:$16 sps:$4 sm:$0xff]   ;;  %v9157_v1 = vld [vmem:[#allocation5 + $0x1e0] ss:$16 sps:$4 sm:$0xff]  }
  0xef   : > { %1446 = vmatpush1.bf16.msra.mxu0 %v9097_v22  ;;  %1672 = vmatpush1.bf16.msra.mxu1 %v9098_v23  ;;  %v9158_v2 = vld [vmem:[#allocation5 + $0x1e8] ss:$16 sps:$4 sm:$0xff]   ;;  %v549_v3 = vld [vmem:[%s10690_s22] sm:$0xff]  ;;  %v9164_v6 = vld [vmem:[#allocation5 + $0x20c] ss:$16 sps:$4 sm:$0xff]   ;;  %s11946_s15 = sld [smem:[#allocation40_spill]] }
  0xf0   : > { %1447 = vmatprep.subr.bf16.mxu0 %v9099_v24  ;;  %1673 = vmatprep.subr.bf16.mxu1 %v9101_v25  ;;  %v553_v4 = vld [vmem:[%s10690_s22 + $0x20] sm:$0xff]  ;;  %v9162_v9 = vld [vmem:[#allocation5 + $0x208] ss:$16 sps:$4 sm:$0xff]   ;;  %v9170_v13 = vld [vmem:[#allocation5 + $0x22c] ss:$16 sps:$4 sm:$0xff]   ;;  %s11947_s12 = sld [smem:[#allocation41_spill]] }
  0xf1   : > { %v9161_v5 = vld [vmem:[#allocation5 + $0x204] ss:$16 sps:$4 sm:$0xff]   ;;  %v9159_v7 = vld [vmem:[#allocation5 + $0x200] ss:$16 sps:$4 sm:$0xff]   ;;  %v613_v8 = vpack.c.bf16 %v553_v4, %v549_v3  ;;  %v558_v10 = vld [vmem:[%s10690_s22 + $0x48] sm:$0xff]  ;;  %s11707_s18 = scalar_lea.vmem [#allocation14], %s7714_s8 }
  0xf2   : > { %v562_v11 = vld [vmem:[%s10690_s22 + $0x68] sm:$0xff]  ;;  %v9167_v12 = vld [vmem:[#allocation5 + $0x224] ss:$16 sps:$4 sm:$0xff]   ;;  %v9165_v14 = vld [vmem:[#allocation5 + $0x220] ss:$16 sps:$4 sm:$0xff]   ;;  %s8371_s8 = sshll.u32 %s10440_s14, 13 }
  0xf3   : > { %1448 = vmatpush1.bf16.msra.mxu0 %v9103_v26  ;;  %1674 = vmatpush1.bf16.msra.mxu1 %v9104_v27  ;;  %v618_v15 = vpack.c.bf16 %v562_v11, %v558_v10  ;;  %v9168_v16 = vld [vmem:[#allocation5 + $0x228] ss:$16 sps:$4 sm:$0xff]   ;;  %v557_v17 = vld [vmem:[%s10690_s22 + $0x40] sm:$0xff]  ;;  %v9176_v20 = vld [vmem:[#allocation5 + $0x24c] ss:$16 sps:$4 sm:$0xff]   ;;  %s7570_s20 = sshll.u32 %s11707_s18, 4  ;;  %s11828_s20 = int_to_ptr.vmem [resolvable:$true] %s7570_s20 }
  0xf4   : > { %1449 = vmatprep.subr.bf16.mxu0 %v9105_v28  ;;  %1675 = vmatprep.subr.bf16.mxu1 %v9107_v29  ;;  %v561_v18 = vld [vmem:[%s10690_s22 + $0x60] sm:$0xff]  ;;  %v9174_v22 = vld [vmem:[#allocation5 + $0x248] ss:$16 sps:$4 sm:$0xff]   ;;  %v9182_v27 = vld [vmem:[#allocation5 + $0x26c] ss:$16 sps:$4 sm:$0xff]   ;;  %s11981_s1 = sld [smem:[#allocation42_spill]] }
  0xf5   : > { %v9173_v19 = vld [vmem:[#allocation5 + $0x244] ss:$16 sps:$4 sm:$0xff]   ;;  %v9171_v21 = vld [vmem:[#allocation5 + $0x240] ss:$16 sps:$4 sm:$0xff]   ;;  %v617_v23 = vpack.c.bf16 %v561_v18, %v557_v17  ;;  %v566_v24 = vld [vmem:[%s10690_s22 + $0x88] sm:$0xff]  ;;  %s10253_s17 = scalar_lea.vmem %s11828_s20, 8192 }
  0xf6   : > { %v570_v25 = vld [vmem:[%s10690_s22 + $0xa8] sm:$0xff]  ;;  %v9179_v26 = vld [vmem:[#allocation5 + $0x264] ss:$16 sps:$4 sm:$0xff]   ;;  %v9177_v29 = vld [vmem:[#allocation5 + $0x260] ss:$16 sps:$4 sm:$0xff]   ;;  %p10254_p5 = scmp.ne.s32.totalorder %s11828_s20, %s10253_s17  ;;  %p11983_p4 = scmp.ne.s32.totalorder %s11934_s10, 0 }
  0xf7   : > { %1450 = vmatpush1.bf16.msra.mxu0 %v9109_v30  ;;  %1676 = vmatpush1.bf16.msra.mxu1 %v9110_v31  ;;  %v622_v28 = vpack.c.bf16 %v570_v25, %v566_v24  ;;  %v9180_v30 = vld [vmem:[#allocation5 + $0x268] ss:$16 sps:$4 sm:$0xff]   ;;  %v565_v31 = vld [vmem:[%s10690_s22 + $0x80] sm:$0xff] }
  0xf8   : > { %1451 = vmatprep.subr.bf16.mxu0 %v9111_v32  ;;  %1677 = vmatprep.subr.bf16.mxu1 %v9113_v33  ;;  %v569_v32 = vld [vmem:[%s10690_s22 + $0xa0] sm:$0xff]  ;;  %v582_v51 = vld [vmem:[%s10690_s22 + $0x108] sm:$0xff]  ;;  %p10255_p10 = pnand %p10254_p5, %p11983_p4 }
  0xf9   : > { %v9185_v33 = vld [vmem:[#allocation5 + $0x284] ss:$16 sps:$4 sm:$0xff]   ;;  %v9195_v49 = vld [vmem:[#allocation5 + $0x2c0] ss:$16 sps:$4 sm:$0xff]   ;;  %v9210_v3 = vld [vmem:[#allocation5 + $0x308] ss:$16 sps:$4 sm:$0xff]  }
  0xfa   : > { %v577_v46 = vld [vmem:[%s10690_s22 + $0xe0] sm:$0xff]  ;;  %v9222_v17 = vld [vmem:[#allocation5 + $0x348] ss:$16 sps:$4 sm:$0xff]   ;;  %s11826_s14 = scalar_lea.hbm %s11981_s1, %s8371_s8  ;;  %p10256_p1 = pneg %p10255_p10 }
  0xfb   : > { %1452 = vmatpush1.bf16.msra.mxu0 %v9115_v34  ;;  %1678 = vmatpush1.bf16.msra.mxu1 %v9116_v35  ;;  %v9188_v34 = vld [vmem:[#allocation5 + $0x28c] ss:$16 sps:$4 sm:$0xff]   ;;  %v9183_v35 = vld [vmem:[#allocation5 + $0x280] ss:$16 sps:$4 sm:$0xff]   ;;  %v9215_v4 = vld [vmem:[#allocation5 + $0x324] ss:$16 sps:$4 sm:$0xff]  }
  0xfc   : > { %1453 = vmatprep.subr.bf16.mxu0 %v9117_v36  ;;  %1679 = vmatprep.subr.bf16.mxu1 %v9119_v37  ;;  %v9186_v36 = vld [vmem:[#allocation5 + $0x288] ss:$16 sps:$4 sm:$0xff]   ;;  %v621_v37 = vpack.c.bf16 %v569_v32, %v565_v31  ;;  %v593_v10 = vld [vmem:[%s10690_s22 + $0x160] sm:$0xff] }
  0xfd   : > { %v9221_v11 = vld [vmem:[#allocation5 + $0x344] ss:$16 sps:$4 sm:$0xff]   ;;  %v610_v31 = vld [vmem:[%s10690_s22 + $0x1e8] sm:$0xff] }
  0xfe   : > { %v9227_v18 = vld [vmem:[#allocation5 + $0x364] ss:$16 sps:$4 sm:$0xff]  }
  0xff   : > { %1454 = vmatpush1.bf16.msra.mxu0 %v9121_v38  ;;  %1680 = vmatpush1.bf16.msra.mxu1 %v9122_v39  ;;  %v574_v38 = vld [vmem:[%s10690_s22 + $0xc8] sm:$0xff]  ;;  %v601_v24 = vld [vmem:[%s10690_s22 + $0x1a0] sm:$0xff] }
 0x100   : > { %1455 = vmatprep.subr.bf16.mxu0 %v9123_v40  ;;  %1681 = vmatprep.subr.bf16.mxu1 %v9125_v41  ;;  %v578_v39 = vld [vmem:[%s10690_s22 + $0xe8] sm:$0xff]  ;;  %v9191_v40 = vld [vmem:[#allocation5 + $0x2a4] ss:$16 sps:$4 sm:$0xff]  }
 0x101   : > { %v9194_v41 = vld [vmem:[#allocation5 + $0x2ac] ss:$16 sps:$4 sm:$0xff]   ;;  %v9233_v25 = vld [vmem:[#allocation5 + $0x384] ss:$16 sps:$4 sm:$0xff]  }
 0x102   : > { %v9239_v32 = vld [vmem:[#allocation5 + $0x3a4] ss:$16 sps:$4 sm:$0xff]  }
 0x103   : > { %1456 = vmatpush1.bf16.msra.mxu0 %v9127_v42  ;;  %1682 = vmatpush1.bf16.msra.mxu1 %v9128_v43  ;;  %v9189_v42 = vld [vmem:[#allocation5 + $0x2a0] ss:$16 sps:$4 sm:$0xff]   ;;  %v626_v43 = vpack.c.bf16 %v578_v39, %v574_v38  ;;  %v9245_v39 = vld [vmem:[#allocation5 + $0x3c4] ss:$16 sps:$4 sm:$0xff]  }
 0x104   : > { %1457 = vmatprep.subr.bf16.mxu0 %v9129_v44  ;;  %1683 = vmatprep.subr.bf16.mxu1 %v9131_v45  ;;  %v9192_v44 = vld [vmem:[#allocation5 + $0x2a8] ss:$16 sps:$4 sm:$0xff]   ;;  %v573_v45 = vld [vmem:[%s10690_s22 + $0xc0] sm:$0xff] }
 0x105   : > { %v609_v38 = vld [vmem:[%s10690_s22 + $0x1e0] sm:$0xff] }
 0x107   : > { %1458 = vmatpush1.bf16.msra.mxu0 %v9133_v47  ;;  %1684 = vmatpush1.bf16.msra.mxu1 %v9134_v48  ;;  %v9197_v47 = vld [vmem:[#allocation5 + $0x2c4] ss:$16 sps:$4 sm:$0xff]   ;;  %v9200_v48 = vld [vmem:[#allocation5 + $0x2cc] ss:$16 sps:$4 sm:$0xff]  }
 0x108   : > { %1459 = vmatprep.subr.bf16.mxu0 %v9135_v50  ;;  %1685 = vmatprep.subr.bf16.mxu1 %v9137_v52  ;;  %v625_v50 = vpack.c.bf16 %v577_v46, %v573_v45  ;;  %v586_v52 = vld [vmem:[%s10690_s22 + $0x128] sm:$0xff]  ;;  %v556_v45 = vld [vmem:[%s10690_s22 + $0x38] sm:$0xff]  ;;  %v9251_v46 = vld [vmem:[#allocation5 + $0x3e4] ss:$16 sps:$4 sm:$0xff]  }
 0x10b   : > { %1460 = vmatpush1.bf16.msra.mxu0 %v9139_v53  ;;  %1686 = vmatpush1.bf16.msra.mxu1 %v9140_v54  ;;  %v9198_v53 = vld [vmem:[#allocation5 + $0x2c8] ss:$16 sps:$4 sm:$0xff]   ;;  %v9203_v54 = vld [vmem:[#allocation5 + $0x2e4] ss:$16 sps:$4 sm:$0xff]  }
 0x10c   : > { %1461 = vmatprep.subr.bf16.mxu0 %v9141_v55  ;;  %1687 = vmatprep.subr.bf16.mxu1 %v9143_v56  ;;  %v9206_v55 = vld [vmem:[#allocation5 + $0x2ec] ss:$16 sps:$4 sm:$0xff]   ;;  %v9201_v56 = vld [vmem:[#allocation5 + $0x2e0] ss:$16 sps:$4 sm:$0xff]  }
 0x10f   : > { %1462 = vmatpush1.bf16.msra.mxu0 %v9145_v57  ;;  %1688 = vmatpush1.bf16.msra.mxu1 %v9146_v58  ;;  %v9204_v57 = vld [vmem:[#allocation5 + $0x2e8] ss:$16 sps:$4 sm:$0xff]   ;;  %v630_v58 = vpack.c.bf16 %v586_v52, %v582_v51  ;;  %v551_v51 = vld [vmem:[%s10690_s22 + $0x10] sm:$0xff] }
 0x110   : > { %1463 = vmatprep.subr.bf16.mxu0 %v9147_v59  ;;  %1689 = vmatprep.subr.bf16.mxu1 %v9149_v60  ;;  %v581_v59 = vld [vmem:[%s10690_s22 + $0x100] sm:$0xff]  ;;  %v555_v52 = vld [vmem:[%s10690_s22 + $0x30] sm:$0xff] }
 0x111   : > { %v585_v60 = vld [vmem:[%s10690_s22 + $0x120] sm:$0xff] }
 0x113   : > { %1464 = vmatpush1.bf16.msra.mxu0 %v9151_v61  ;;  %1690 = vmatpush1.bf16.msra.mxu1 %v9152_v62  ;;  %v9209_v61 = vld [vmem:[#allocation5 + $0x304] ss:$16 sps:$4 sm:$0xff]   ;;  %v9212_v62 = vld [vmem:[#allocation5 + $0x30c] ss:$16 sps:$4 sm:$0xff]  }
 0x114   : > { %1465 = vmatprep.subr.bf16.mxu0 %v9153_v63  ;;  %1691 = vmatprep.subr.bf16.mxu1 %v9155_v0  ;;  %v629_v63 = vpack.c.bf16 %v585_v60, %v581_v59  ;;  %v590_v0 = vld [vmem:[%s10690_s22 + $0x148] sm:$0xff]  ;;  %v9255_v59 = vld [vmem:[#allocation7] ss:$16 sps:$4 sm:$0xff]  }
 0x115   : > { %v9258_v60 = vld [vmem:[#allocation7 + $0x8] ss:$16 sps:$4 sm:$0xff]  }
 0x117   : > { %1466 = vmatpush1.bf16.msra.mxu0 %v9157_v1  ;;  %1692 = vmatpush1.bf16.msra.mxu1 %v9158_v2  ;;  %v594_v1 = vld [vmem:[%s10690_s22 + $0x168] sm:$0xff]  ;;  %v9207_v2 = vld [vmem:[#allocation5 + $0x300] ss:$16 sps:$4 sm:$0xff]  }
 0x118   : > { %1548 = vmatprep.subr.bf16.mxu0 %v9161_v5  ;;  %1774 = vmatprep.subr.bf16.mxu1 %v9164_v6  ;;  %v9218_v5 = vld [vmem:[#allocation5 + $0x32c] ss:$16 sps:$4 sm:$0xff]   ;;  %v634_v6 = vpack.c.bf16 %v594_v1, %v590_v0 }
 0x119   : > { %v9266_v0 = vld [vmem:[#allocation7 + $0x2c] ss:$16 sps:$4 sm:$0xff]  }
 0x11a   : > { %1468 = vmatmul.mubr.bf16.vlgmr.msra.gmra.mrb[0].mxu0 %v613_v8  ;;  %1694 = vmatmul.mubr.bf16.vlgmr.msra.gmra.mrb[0].mxu1 %v613_v8  ;;  %v9216_v8 = vld [vmem:[#allocation5 + $0x328] ss:$16 sps:$4 sm:$0xff]  }
 0x11b   : > { %1549 = vmatpush1.bf16.msra.mxu0 %v9159_v7  ;;  %1775 = vmatpush1.bf16.msra.mxu1 %v9162_v9  ;;  %v9213_v7 = vld [vmem:[#allocation5 + $0x320] ss:$16 sps:$4 sm:$0xff]   ;;  %v568_v1 = vld [vmem:[%s10690_s22 + $0x98] sm:$0xff] }
 0x11c   : > { %1550 = vmatprep.subr.bf16.mxu0 %v9167_v12  ;;  %1776 = vmatprep.subr.bf16.mxu1 %v9170_v13  ;;  %v589_v9 = vld [vmem:[%s10690_s22 + $0x140] sm:$0xff]  ;;  %v9224_v12 = vld [vmem:[#allocation5 + $0x34c] ss:$16 sps:$4 sm:$0xff]  }
 0x11d   : > { %1477 = vmatprep.mubr.bf16.mxu0 %v618_v15  ;;  %1703 = vmatprep.mubr.bf16.mxu1 %v618_v15  ;;  %v633_v13 = vpack.c.bf16 %v593_v10, %v589_v9  ;;  %v602_v15 = vld [vmem:[%s10690_s22 + $0x1a8] sm:$0xff]  ;;  %v9267_v9 = vld [vmem:[#allocation7 + $0x40] ss:$16 sps:$4 sm:$0xff]  }
 0x11e   : > { %v9270_v10 = vld [vmem:[#allocation7 + $0x48] ss:$16 sps:$4 sm:$0xff]  }
 0x11f   : > { %1551 = vmatpush1.bf16.msra.mxu0 %v9165_v14  ;;  %1777 = vmatpush1.bf16.msra.mxu1 %v9168_v16  ;;  %v598_v14 = vld [vmem:[%s10690_s22 + $0x188] sm:$0xff]  ;;  %v9219_v16 = vld [vmem:[#allocation5 + $0x340] ss:$16 sps:$4 sm:$0xff]  }
 0x120   : > { %1552 = vmatprep.subr.bf16.mxu0 %v9173_v19  ;;  %1778 = vmatprep.subr.bf16.mxu1 %v9176_v20  ;;  %v9230_v19 = vld [vmem:[#allocation5 + $0x36c] ss:$16 sps:$4 sm:$0xff]   ;;  %v9225_v20 = vld [vmem:[#allocation5 + $0x360] ss:$16 sps:$4 sm:$0xff]  }
 0x122   : > { %1478 = vmatmul.mubr.bf16.gmra.mrb[4].mxu0 %v617_v23  ;;  %1704 = vmatmul.mubr.bf16.gmra.mrb[4].mxu1 %v617_v23  ;;  %v597_v23 = vld [vmem:[%s10690_s22 + $0x180] sm:$0xff] }
 0x123   : > { %1553 = vmatpush1.bf16.msra.mxu0 %v9171_v21  ;;  %1779 = vmatpush1.bf16.msra.mxu1 %v9174_v22  ;;  %v9228_v21 = vld [vmem:[#allocation5 + $0x368] ss:$16 sps:$4 sm:$0xff]   ;;  %v638_v22 = vpack.c.bf16 %v602_v15, %v598_v14  ;;  %v9278_v14 = vld [vmem:[#allocation7 + $0x6c] ss:$16 sps:$4 sm:$0xff]  }
 0x124   : > { %1554 = vmatprep.subr.bf16.mxu0 %v9179_v26  ;;  %1780 = vmatprep.subr.bf16.mxu1 %v9182_v27  ;;  %v9236_v26 = vld [vmem:[#allocation5 + $0x38c] ss:$16 sps:$4 sm:$0xff]   ;;  %v9231_v27 = vld [vmem:[#allocation5 + $0x380] ss:$16 sps:$4 sm:$0xff]  }
 0x125   : > { %1487 = vmatprep.mubr.bf16.mxu0 %v622_v28  ;;  %1713 = vmatprep.mubr.bf16.mxu1 %v622_v28  ;;  %v9234_v28 = vld [vmem:[#allocation5 + $0x388] ss:$16 sps:$4 sm:$0xff]  }
 0x126   : > { %v576_v15 = vld [vmem:[%s10690_s22 + $0xd8] sm:$0xff] }
 0x127   : > { %1555 = vmatpush1.bf16.msra.mxu0 %v9177_v29  ;;  %1781 = vmatpush1.bf16.msra.mxu1 %v9180_v30  ;;  %v637_v29 = vpack.c.bf16 %v601_v24, %v597_v23  ;;  %v606_v30 = vld [vmem:[%s10690_s22 + $0x1c8] sm:$0xff] }
 0x128   : > { %1556 = vmatprep.subr.bf16.mxu0 %v9185_v33  ;;  %1782 = vmatprep.subr.bf16.mxu1 %v9188_v34  ;;  %v9242_v33 = vld [vmem:[#allocation5 + $0x3ac] ss:$16 sps:$4 sm:$0xff]   ;;  %v9237_v34 = vld [vmem:[#allocation5 + $0x3a0] ss:$16 sps:$4 sm:$0xff]   ;;  %v9282_v23 = vld [vmem:[#allocation7 + $0x88] ss:$16 sps:$4 sm:$0xff]  }
 0x12a   : > { %1488 = vmatmul.mubr.bf16.gmra.mrb[8].mxu0 %v621_v37  ;;  %1714 = vmatmul.mubr.bf16.gmra.mrb[8].mxu1 %v621_v37  ;;  %v605_v37 = vld [vmem:[%s10690_s22 + $0x1c0] sm:$0xff] }
 0x12b   : > { %1557 = vmatpush1.bf16.msra.mxu0 %v9183_v35  ;;  %1783 = vmatpush1.bf16.msra.mxu1 %v9186_v36  ;;  %v9240_v35 = vld [vmem:[#allocation5 + $0x3a8] ss:$16 sps:$4 sm:$0xff]   ;;  %v642_v36 = vpack.c.bf16 %v610_v31, %v606_v30  ;;  %v9285_v31 = vld [vmem:[#allocation7 + $0xa0] ss:$16 sps:$4 sm:$0xff]  }
 0x12c   : > { %1558 = vmatprep.subr.bf16.mxu0 %v9191_v40  ;;  %1784 = vmatprep.subr.bf16.mxu1 %v9194_v41  ;;  %v9248_v40 = vld [vmem:[#allocation5 + $0x3cc] ss:$16 sps:$4 sm:$0xff]   ;;  %v9243_v41 = vld [vmem:[#allocation5 + $0x3c0] ss:$16 sps:$4 sm:$0xff]  }
 0x12d   : > { %1497 = vmatprep.mubr.bf16.mxu0 %v626_v43  ;;  %1723 = vmatprep.mubr.bf16.mxu1 %v626_v43  ;;  %v641_v43 = vpack.c.bf16 %v609_v38, %v605_v37  ;;  %v588_v30 = vld [vmem:[%s10690_s22 + $0x138] sm:$0xff] }
 0x12e   : > { %v9294_v37 = vld [vmem:[#allocation7 + $0xc8] ss:$16 sps:$4 sm:$0xff]  }
 0x12f   : > { %1559 = vmatpush1.bf16.msra.mxu0 %v9189_v42  ;;  %1785 = vmatpush1.bf16.msra.mxu1 %v9192_v44  ;;  %v9246_v42 = vld [vmem:[#allocation5 + $0x3c8] ss:$16 sps:$4 sm:$0xff]  }
 0x130   : > { %1560 = vmatprep.subr.bf16.mxu0 %v9197_v47  ;;  %1786 = vmatprep.subr.bf16.mxu1 %v9200_v48  ;;  %v552_v44 = vld [vmem:[%s10690_s22 + $0x18] sm:$0xff]  ;;  %v9249_v48 = vld [vmem:[#allocation5 + $0x3e0] ss:$16 sps:$4 sm:$0xff]  }
 0x131   : > { %v9254_v47 = vld [vmem:[#allocation5 + $0x3ec] ss:$16 sps:$4 sm:$0xff]  }
 0x132   : > { %1498 = vmatmul.mubr.bf16.gmra.mrb[12].mxu0 %v625_v50  ;;  %1724 = vmatmul.mubr.bf16.gmra.mrb[12].mxu1 %v625_v50  ;;  %v616_v50 = vpack.c.bf16 %v556_v45, %v552_v44  ;;  %v596_v44 = vld [vmem:[%s10690_s22 + $0x178] sm:$0xff]  ;;  %v9297_v45 = vld [vmem:[#allocation7 + $0xe0] ss:$16 sps:$4 sm:$0xff]  }
 0x133   : > { %1561 = vmatpush1.bf16.msra.mxu0 %v9195_v49  ;;  %1787 = vmatpush1.bf16.msra.mxu1 %v9198_v53  ;;  %v9252_v49 = vld [vmem:[#allocation5 + $0x3e8] ss:$16 sps:$4 sm:$0xff]  }
 0x134   : > { %1562 = vmatprep.subr.bf16.mxu0 %v9203_v54  ;;  %1788 = vmatprep.subr.bf16.mxu1 %v9206_v55  ;;  %v560_v53 = vld [vmem:[%s10690_s22 + $0x58] sm:$0xff]  ;;  %v9257_v55 = vld [vmem:[#allocation7 + $0x4] ss:$16 sps:$4 sm:$0xff]  }
 0x135   : > { %1507 = vmatprep.mubr.bf16.mxu0 %v630_v58  ;;  %1733 = vmatprep.mubr.bf16.mxu1 %v630_v58  ;;  %v564_v54 = vld [vmem:[%s10690_s22 + $0x78] sm:$0xff] }
 0x136   : > { %v620_v58 = vpack.c.bf16 %v564_v54, %v560_v53  ;;  %v9311_v53 = vld [vmem:[#allocation7 + $0x124] ss:$16 sps:$4 sm:$0xff]   ;;  %v9314_v54 = vld [vmem:[#allocation7 + $0x12c] ss:$16 sps:$4 sm:$0xff]  }
 0x137   : > { %1563 = vmatpush1.bf16.msra.mxu0 %v9201_v56  ;;  %1789 = vmatpush1.bf16.msra.mxu1 %v9204_v57  ;;  %v9260_v56 = vld [vmem:[#allocation7 + $0xc] ss:$16 sps:$4 sm:$0xff]   ;;  %v615_v57 = vpack.c.bf16 %v555_v52, %v551_v51  ;;  %v9306_v51 = vld [vmem:[#allocation7 + $0x108] ss:$16 sps:$4 sm:$0xff]  }
 0x138   : > { %1564 = vmatprep.subr.bf16.mxu0 %v9209_v61  ;;  %1790 = vmatprep.subr.bf16.mxu1 %v9212_v62  ;;  %v559_v61 = vld [vmem:[%s10690_s22 + $0x50] sm:$0xff] }
 0x139   : > { %v563_v62 = vld [vmem:[%s10690_s22 + $0x70] sm:$0xff] }
 0x13a   : > { %1508 = vmatmul.mubr.bf16.gmra.mrb[16].mxu0 %v629_v63  ;;  %1734 = vmatmul.mubr.bf16.gmra.mrb[16].mxu1 %v629_v63  ;;  %v9263_v63 = vld [vmem:[#allocation7 + $0x24] ss:$16 sps:$4 sm:$0xff]  }
 0x13b   : > { %1565 = vmatpush1.bf16.msra.mxu0 %v9207_v2  ;;  %1791 = vmatpush1.bf16.msra.mxu1 %v9210_v3  ;;  %v572_v2 = vld [vmem:[%s10690_s22 + $0xb8] sm:$0xff]  ;;  %v9261_v3 = vld [vmem:[#allocation7 + $0x20] ss:$16 sps:$4 sm:$0xff]  }
 0x13c   : > { %1566 = vmatprep.subr.bf16.mxu0 %v9215_v4  ;;  %1792 = vmatprep.subr.bf16.mxu1 %v9218_v5  ;;  %v9264_v4 = vld [vmem:[#allocation7 + $0x28] ss:$16 sps:$4 sm:$0xff]   ;;  %v9269_v5 = vld [vmem:[#allocation7 + $0x44] ss:$16 sps:$4 sm:$0xff]  }
 0x13d   : > { %1517 = vmatprep.mubr.bf16.mxu0 %v634_v6  ;;  %1743 = vmatprep.mubr.bf16.mxu1 %v634_v6  ;;  %v9272_v6 = vld [vmem:[#allocation7 + $0x4c] ss:$16 sps:$4 sm:$0xff]  }
 0x13f   : > { %1567 = vmatpush1.bf16.msra.mxu0 %v9213_v7  ;;  %1793 = vmatpush1.bf16.msra.mxu1 %v9216_v8  ;;  %v619_v7 = vpack.c.bf16 %v563_v62, %v559_v61  ;;  %v624_v8 = vpack.c.bf16 %v572_v2, %v568_v1  ;;  %v9317_v61 = vld [vmem:[#allocation7 + $0x144] ss:$16 sps:$4 sm:$0xff]   ;;  %v9320_v62 = vld [vmem:[#allocation7 + $0x14c] ss:$16 sps:$4 sm:$0xff]   ;;  %v9318_v1 = vld [vmem:[#allocation7 + $0x148] ss:$16 sps:$4 sm:$0xff]  }
 0x140   : > { %1568 = vmatprep.subr.bf16.mxu0 %v9221_v11  ;;  %1794 = vmatprep.subr.bf16.mxu1 %v9224_v12  ;;  %v567_v11 = vld [vmem:[%s10690_s22 + $0x90] sm:$0xff] }
 0x141   : > { %v571_v12 = vld [vmem:[%s10690_s22 + $0xb0] sm:$0xff] }
 0x142   : > { %1518 = vmatmul.mubr.bf16.gmra.mrb[20].mxu0 %v633_v13  ;;  %1744 = vmatmul.mubr.bf16.gmra.mrb[20].mxu1 %v633_v13  ;;  %v9275_v13 = vld [vmem:[#allocation7 + $0x64] ss:$16 sps:$4 sm:$0xff]  }
 0x143   : > { %1569 = vmatpush1.bf16.msra.mxu0 %v9219_v16  ;;  %1795 = vmatpush1.bf16.msra.mxu1 %v9222_v17  ;;  %v580_v16 = vld [vmem:[%s10690_s22 + $0xf8] sm:$0xff]  ;;  %v9273_v17 = vld [vmem:[#allocation7 + $0x60] ss:$16 sps:$4 sm:$0xff]  }
 0x144   : > { %1570 = vmatprep.subr.bf16.mxu0 %v9227_v18  ;;  %1796 = vmatprep.subr.bf16.mxu1 %v9230_v19  ;;  %v9276_v18 = vld [vmem:[#allocation7 + $0x68] ss:$16 sps:$4 sm:$0xff]   ;;  %v9281_v19 = vld [vmem:[#allocation7 + $0x84] ss:$16 sps:$4 sm:$0xff]   ;;  %v628_v24 = vpack.c.bf16 %v580_v16, %v576_v15 }
 0x145   : > { %1527 = vmatprep.mubr.bf16.mxu0 %v638_v22  ;;  %1753 = vmatprep.mubr.bf16.mxu1 %v638_v22  ;;  %v9279_v22 = vld [vmem:[#allocation7 + $0x80] ss:$16 sps:$4 sm:$0xff]   ;;  %v9330_v15 = vld [vmem:[#allocation7 + $0x188] ss:$16 sps:$4 sm:$0xff]  }
 0x147   : > { %1571 = vmatpush1.bf16.msra.mxu0 %v9225_v20  ;;  %1797 = vmatpush1.bf16.msra.mxu1 %v9228_v21  ;;  %v9284_v20 = vld [vmem:[#allocation7 + $0x8c] ss:$16 sps:$4 sm:$0xff]   ;;  %v623_v21 = vpack.c.bf16 %v571_v12, %v567_v11  ;;  %v9329_v11 = vld [vmem:[#allocation7 + $0x184] ss:$16 sps:$4 sm:$0xff]  }
 0x148   : > { %1572 = vmatprep.subr.bf16.mxu0 %v9233_v25  ;;  %1798 = vmatprep.subr.bf16.mxu1 %v9236_v26  ;;  %v9287_v25 = vld [vmem:[#allocation7 + $0xa4] ss:$16 sps:$4 sm:$0xff]   ;;  %v9290_v26 = vld [vmem:[#allocation7 + $0xac] ss:$16 sps:$4 sm:$0xff]  }
 0x149   : > { %v9332_v12 = vld [vmem:[#allocation7 + $0x18c] ss:$16 sps:$4 sm:$0xff]  }
 0x14a   : > { %1528 = vmatmul.mubr.bf16.gmra.mrb[24].mxu0 %v637_v29  ;;  %1754 = vmatmul.mubr.bf16.gmra.mrb[24].mxu1 %v637_v29  ;;  %v584_v29 = vld [vmem:[%s10690_s22 + $0x118] sm:$0xff] }
 0x14b   : > { %1573 = vmatpush1.bf16.msra.mxu0 %v9231_v27  ;;  %1799 = vmatpush1.bf16.msra.mxu1 %v9234_v28  ;;  %v575_v27 = vld [vmem:[%s10690_s22 + $0xd0] sm:$0xff]  ;;  %v632_v38 = vpack.c.bf16 %v588_v30, %v584_v29  ;;  %v9350_v29 = vld [vmem:[#allocation7 + $0x1ec] ss:$16 sps:$4 sm:$0xff]  }
 0x14c   : > { %1574 = vmatprep.subr.bf16.mxu0 %v9239_v32  ;;  %1800 = vmatprep.subr.bf16.mxu1 %v9242_v33  ;;  %v579_v28 = vld [vmem:[%s10690_s22 + $0xf0] sm:$0xff]  ;;  %v9288_v32 = vld [vmem:[#allocation7 + $0xa8] ss:$16 sps:$4 sm:$0xff]  }
 0x14d   : > { %1537 = vmatprep.mubr.bf16.mxu0 %v642_v36  ;;  %1763 = vmatprep.mubr.bf16.mxu1 %v642_v36  ;;  %v9293_v33 = vld [vmem:[#allocation7 + $0xc4] ss:$16 sps:$4 sm:$0xff]   ;;  %v9291_v36 = vld [vmem:[#allocation7 + $0xc0] ss:$16 sps:$4 sm:$0xff]  }
 0x14e   : > { %v9345_v30 = vld [vmem:[#allocation7 + $0x1e0] ss:$16 sps:$4 sm:$0xff]  }
 0x14f   : > { %1575 = vmatpush1.bf16.msra.mxu0 %v9237_v34  ;;  %1801 = vmatpush1.bf16.msra.mxu1 %v9240_v35  ;;  %v9296_v34 = vld [vmem:[#allocation7 + $0xcc] ss:$16 sps:$4 sm:$0xff]   ;;  %v627_v35 = vpack.c.bf16 %v579_v28, %v575_v27  ;;  %v9342_v27 = vld [vmem:[#allocation7 + $0x1c8] ss:$16 sps:$4 sm:$0xff]   ;;  %v9347_v28 = vld [vmem:[#allocation7 + $0x1e4] ss:$16 sps:$4 sm:$0xff]  }
 0x150   : > { %1576 = vmatprep.subr.bf16.mxu0 %v9245_v39  ;;  %1802 = vmatprep.subr.bf16.mxu1 %v9248_v40  ;;  %v9299_v39 = vld [vmem:[#allocation7 + $0xe4] ss:$16 sps:$4 sm:$0xff]   ;;  %v9302_v40 = vld [vmem:[#allocation7 + $0xec] ss:$16 sps:$4 sm:$0xff]  }
 0x152   : > { %1538 = vmatmul.mubr.bf16.gmra.mrb[28].mxu0 %v641_v43  ;;  %1764 = vmatmul.mubr.bf16.gmra.mrb[28].mxu1 %v641_v43  ;;  %v592_v43 = vld [vmem:[%s10690_s22 + $0x158] sm:$0xff] }
 0x153   : > { %1577 = vmatpush1.bf16.msra.mxu0 %v9243_v41  ;;  %1803 = vmatpush1.bf16.msra.mxu1 %v9246_v42  ;;  %v583_v41 = vld [vmem:[%s10690_s22 + $0x110] sm:$0xff]  ;;  %v636_v52 = vpack.c.bf16 %v596_v44, %v592_v43 }
 0x154   : > { %1578 = vmatprep.subr.bf16.mxu0 %v9251_v46  ;;  %1804 = vmatprep.subr.bf16.mxu1 %v9254_v47  ;;  %v587_v42 = vld [vmem:[%s10690_s22 + $0x130] sm:$0xff]  ;;  %v9300_v46 = vld [vmem:[#allocation7 + $0xe8] ss:$16 sps:$4 sm:$0xff]  }
 0x155   : > { %1580 = vmatprep.mubr.bf16.mxu0 %v616_v50  ;;  %1806 = vmatprep.mubr.bf16.mxu1 %v616_v50  ;;  %v9305_v47 = vld [vmem:[#allocation7 + $0x104] ss:$16 sps:$4 sm:$0xff]   ;;  %v9303_v50 = vld [vmem:[#allocation7 + $0x100] ss:$16 sps:$4 sm:$0xff]  }
 0x157   : > { %1579 = vmatpush1.bf16.msra.mxu0 %v9249_v48  ;;  %1805 = vmatpush1.bf16.msra.mxu1 %v9252_v49  ;;  %v9308_v48 = vld [vmem:[#allocation7 + $0x10c] ss:$16 sps:$4 sm:$0xff]   ;;  %v631_v49 = vpack.c.bf16 %v587_v42, %v583_v41 }
 0x158   : > { %2773 = vmatprep.subr.bf16.mxu0 %v9257_v55  ;;  %2999 = vmatprep.subr.bf16.mxu1 %v9260_v56  ;;  %v591_v55 = vld [vmem:[%s10690_s22 + $0x150] sm:$0xff] }
 0x159   : > { %v595_v56 = vld [vmem:[%s10690_s22 + $0x170] sm:$0xff] }
 0x15a   : > { %1581 = vmatmul.mubr.bf16.vlgmr.msra.gmra.mrb[0].mxu0 %v615_v57  ;;  %1807 = vmatmul.mubr.bf16.vlgmr.msra.gmra.mrb[0].mxu1 %v615_v57  ;;  %v600_v57 = vld [vmem:[%s10690_s22 + $0x198] sm:$0xff] }
 0x15b   : > { %1590 = vmatprep.mubr.bf16.mxu0 %v620_v58  ;;  %1816 = vmatprep.mubr.bf16.mxu1 %v620_v58  ;;  %v604_v58 = vld [vmem:[%s10690_s22 + $0x1b8] sm:$0xff] }
 0x15c   : > { %2774 = vmatpush1.bf16.msra.mxu0 %v9255_v59  ;;  %3000 = vmatpush1.bf16.msra.mxu1 %v9258_v60  ;;  %v9309_v59 = vld [vmem:[#allocation7 + $0x120] ss:$16 sps:$4 sm:$0xff]   ;;  %v9312_v60 = vld [vmem:[#allocation7 + $0x128] ss:$16 sps:$4 sm:$0xff]   ;;  %v640_v2 = vpack.c.bf16 %v604_v58, %v600_v57 }
 0x15d   : > { %2775 = vmatprep.subr.bf16.mxu0 %v9263_v63  ;;  %3001 = vmatprep.subr.bf16.mxu1 %v9266_v0  ;;  %v635_v63 = vpack.c.bf16 %v595_v56, %v591_v55  ;;  %v9315_v0 = vld [vmem:[#allocation7 + $0x140] ss:$16 sps:$4 sm:$0xff]  }
 0x160   : > { %2776 = vmatpush1.bf16.msra.mxu0 %v9261_v3  ;;  %3002 = vmatpush1.bf16.msra.mxu1 %v9264_v4  ;;  %v9323_v3 = vld [vmem:[#allocation7 + $0x164] ss:$16 sps:$4 sm:$0xff]   ;;  %v9326_v4 = vld [vmem:[#allocation7 + $0x16c] ss:$16 sps:$4 sm:$0xff]  }
 0x161   : > { %2777 = vmatprep.subr.bf16.mxu0 %v9269_v5  ;;  %3003 = vmatprep.subr.bf16.mxu1 %v9272_v6  ;;  %v599_v5 = vld [vmem:[%s10690_s22 + $0x190] sm:$0xff] }
 0x162   : > { %1591 = vmatmul.mubr.bf16.gmra.mrb[4].mxu0 %v619_v7  ;;  %1817 = vmatmul.mubr.bf16.gmra.mrb[4].mxu1 %v619_v7  ;;  %v603_v6 = vld [vmem:[%s10690_s22 + $0x1b0] sm:$0xff]  ;;  %v608_v7 = vld [vmem:[%s10690_s22 + $0x1d8] sm:$0xff] }
 0x163   : > { %1600 = vmatprep.mubr.bf16.mxu0 %v624_v8  ;;  %1826 = vmatprep.mubr.bf16.mxu1 %v624_v8  ;;  %v612_v8 = vld [vmem:[%s10690_s22 + $0x1f8] sm:$0xff] }
 0x164   : > { %2778 = vmatpush1.bf16.msra.mxu0 %v9267_v9  ;;  %3004 = vmatpush1.bf16.msra.mxu1 %v9270_v10  ;;  %v9321_v9 = vld [vmem:[#allocation7 + $0x160] ss:$16 sps:$4 sm:$0xff]   ;;  %v9324_v10 = vld [vmem:[#allocation7 + $0x168] ss:$16 sps:$4 sm:$0xff]   ;;  %v644_v16 = vpack.c.bf16 %v612_v8, %v608_v7 }
 0x165   : > { %2779 = vmatprep.subr.bf16.mxu0 %v9275_v13  ;;  %3005 = vmatprep.subr.bf16.mxu1 %v9278_v14  ;;  %v639_v13 = vpack.c.bf16 %v603_v6, %v599_v5  ;;  %v9327_v14 = vld [vmem:[#allocation7 + $0x180] ss:$16 sps:$4 sm:$0xff]  }
 0x168   : > { %2780 = vmatpush1.bf16.msra.mxu0 %v9273_v17  ;;  %3006 = vmatpush1.bf16.msra.mxu1 %v9276_v18  ;;  %v9335_v17 = vld [vmem:[#allocation7 + $0x1a4] ss:$16 sps:$4 sm:$0xff]   ;;  %v9338_v18 = vld [vmem:[#allocation7 + $0x1ac] ss:$16 sps:$4 sm:$0xff]  }
 0x169   : > { %2781 = vmatprep.subr.bf16.mxu0 %v9281_v19  ;;  %3007 = vmatprep.subr.bf16.mxu1 %v9284_v20  ;;  %v607_v19 = vld [vmem:[%s10690_s22 + $0x1d0] sm:$0xff] }
 0x16a   : > { %1601 = vmatmul.mubr.bf16.gmra.mrb[8].mxu0 %v623_v21  ;;  %1827 = vmatmul.mubr.bf16.gmra.mrb[8].mxu1 %v623_v21  ;;  %v611_v20 = vld [vmem:[%s10690_s22 + $0x1f0] sm:$0xff]  ;;  %s10346_s22 = smov [#allocation14]  }
 0x16b   : > { %1610 = vmatprep.mubr.bf16.mxu0 %v628_v24  ;;  %1836 = vmatprep.mubr.bf16.mxu1 %v628_v24  ;;  %v9333_v21 = vld [vmem:[#allocation7 + $0x1a0] ss:$16 sps:$4 sm:$0xff]   ;;  %v9341_v24 = vld [vmem:[#allocation7 + $0x1c4] ss:$16 sps:$4 sm:$0xff]  }
 0x16c   : > { %2782 = vmatpush1.bf16.msra.mxu0 %v9279_v22  ;;  %3008 = vmatpush1.bf16.msra.mxu1 %v9282_v23  ;;  %v9336_v22 = vld [vmem:[#allocation7 + $0x1a8] ss:$16 sps:$4 sm:$0xff]   ;;  %v643_v23 = vpack.c.bf16 %v611_v20, %v607_v19 }
 0x16d   : > { %2783 = vmatprep.subr.bf16.mxu0 %v9287_v25  ;;  %3009 = vmatprep.subr.bf16.mxu1 %v9290_v26  ;;  %v9344_v25 = vld [vmem:[#allocation7 + $0x1cc] ss:$16 sps:$4 sm:$0xff]   ;;  %v9339_v26 = vld [vmem:[#allocation7 + $0x1c0] ss:$16 sps:$4 sm:$0xff]  }
 0x170   : > { %2784 = vmatpush1.bf16.msra.mxu0 %v9285_v31  ;;  %3010 = vmatpush1.bf16.msra.mxu1 %v9288_v32  ;;  %v9348_v31 = vld [vmem:[#allocation7 + $0x1e8] ss:$16 sps:$4 sm:$0xff]   ;;  %v9353_v32 = vld [vmem:[#allocation7 + $0x204] ss:$16 sps:$4 sm:$0xff]  }
 0x171   : > { %2785 = vmatprep.subr.bf16.mxu0 %v9293_v33  ;;  %3011 = vmatprep.subr.bf16.mxu1 %v9296_v34  ;;  %v9356_v33 = vld [vmem:[#allocation7 + $0x20c] ss:$16 sps:$4 sm:$0xff]   ;;  %v775_v34 = vlaneseq }
 0x172   : > { %1611 = vmatmul.mubr.bf16.gmra.mrb[12].mxu0 %v627_v35  ;;  %1837 = vmatmul.mubr.bf16.gmra.mrb[12].mxu1 %v627_v35 }
 0x173   : > { %1620 = vmatprep.mubr.bf16.mxu0 %v632_v38  ;;  %1846 = vmatprep.mubr.bf16.mxu1 %v632_v38  ;;  %v776_v35 = vshrl.u32 %v775_v34, 7  ;;  %v773_v38 = vld [vmem:[%s11885_s2] sm:$0xf] }
 0x174   : > { %2786 = vmatpush1.bf16.msra.mxu0 %v9291_v36  ;;  %3012 = vmatpush1.bf16.msra.mxu1 %v9294_v37 }
 0x175   : > { %2787 = vmatprep.subr.bf16.mxu0 %v9299_v39  ;;  %3013 = vmatprep.subr.bf16.mxu1 %v9302_v40  ;;  %v10772_v36 = vsub.s32 0, %v776_v35  ;;  %v10774_v37 = vsub.s32 2, %v776_v35  ;;  %v10779_v39 = vsub.s32 1, %v776_v35  ;;  %v10781_v40 = vsub.s32 3, %v776_v35 }
 0x177   : > { %v10784_v41 = vrot.slane %v773_v38, %v10772_v36  ;;  %v10787_v42 = vrot.slane %v773_v38, %v10774_v37  ;;  %v10790_v43 = vrot.slane %v773_v38, %v10779_v39  ;;  %v10793_v44 = vrot.slane %v773_v38, %v10781_v40  ;;  %v9368_v38 = vld [vmem:[#allocation7 + $0x24c] ss:$16 sps:$4 sm:$0xff]  }
 0x178   : > { %2788 = vmatpush1.bf16.msra.mxu0 %v9297_v45  ;;  %3014 = vmatpush1.bf16.msra.mxu1 %v9300_v46 }
 0x179   : > { %2789 = vmatprep.subr.bf16.mxu0 %v9305_v47  ;;  %3015 = vmatprep.subr.bf16.mxu1 %v9308_v48 }
 0x17a   : > { %1621 = vmatmul.mubr.bf16.gmra.mrb[16].mxu0 %v631_v49  ;;  %1847 = vmatmul.mubr.bf16.gmra.mrb[16].mxu1 %v631_v49 }
 0x17b   : > { %1630 = vmatprep.mubr.bf16.mxu0 %v636_v52  ;;  %1856 = vmatprep.mubr.bf16.mxu1 %v636_v52 }
 0x17c   : > { %2790 = vmatpush1.bf16.msra.mxu0 %v9303_v50  ;;  %3016 = vmatpush1.bf16.msra.mxu1 %v9306_v51 }
 0x17d   : > { %2791 = vmatprep.subr.bf16.mxu0 %v9311_v53  ;;  %3017 = vmatprep.subr.bf16.mxu1 %v9314_v54 }
 0x180   : > { %2792 = vmatpush1.bf16.msra.mxu0 %v9309_v59  ;;  %3018 = vmatpush1.bf16.msra.mxu1 %v9312_v60 }
 0x181   : > { %2793 = vmatprep.subr.bf16.mxu0 %v9317_v61  ;;  %3019 = vmatprep.subr.bf16.mxu1 %v9320_v62 }
 0x182   : > { %1631 = vmatmul.mubr.bf16.gmra.mrb[20].mxu0 %v635_v63  ;;  %1857 = vmatmul.mubr.bf16.gmra.mrb[20].mxu1 %v635_v63 }
 0x183   : > { %1640 = vmatprep.mubr.bf16.mxu0 %v640_v2  ;;  %1866 = vmatprep.mubr.bf16.mxu1 %v640_v2 }
 0x184   : > { %2794 = vmatpush1.bf16.msra.mxu0 %v9315_v0  ;;  %3020 = vmatpush1.bf16.msra.mxu1 %v9318_v1 }
 0x185   : > { %2795 = vmatprep.subr.bf16.mxu0 %v9323_v3  ;;  %3021 = vmatprep.subr.bf16.mxu1 %v9326_v4 }
 0x188   : > { %2796 = vmatpush1.bf16.msra.mxu0 %v9321_v9  ;;  %3022 = vmatpush1.bf16.msra.mxu1 %v9324_v10 }
 0x189   : > { %2797 = vmatprep.subr.bf16.mxu0 %v9329_v11  ;;  %3023 = vmatprep.subr.bf16.mxu1 %v9332_v12  ;;  %v9351_v11 = vld [vmem:[#allocation7 + $0x200] ss:$16 sps:$4 sm:$0xff]   ;;  %v9354_v12 = vld [vmem:[#allocation7 + $0x208] ss:$16 sps:$4 sm:$0xff]  }
 0x18a   : > { %1641 = vmatmul.mubr.bf16.gmra.mrb[24].mxu0 %v639_v13  ;;  %1867 = vmatmul.mubr.bf16.gmra.mrb[24].mxu1 %v639_v13 }
 0x18b   : > { %1650 = vmatprep.mubr.bf16.mxu0 %v644_v16  ;;  %1876 = vmatprep.mubr.bf16.mxu1 %v644_v16 }
 0x18c   : > { %2798 = vmatpush1.bf16.msra.mxu0 %v9327_v14  ;;  %3024 = vmatpush1.bf16.msra.mxu1 %v9330_v15 }
 0x18d   : > { %2799 = vmatprep.subr.bf16.mxu0 %v9335_v17  ;;  %3025 = vmatprep.subr.bf16.mxu1 %v9338_v18  ;;  %v9359_v17 = vld [vmem:[#allocation7 + $0x224] ss:$16 sps:$4 sm:$0xff]   ;;  %v9362_v18 = vld [vmem:[#allocation7 + $0x22c] ss:$16 sps:$4 sm:$0xff]  }
 0x190   : > { %2800 = vmatpush1.bf16.msra.mxu0 %v9333_v21  ;;  %3026 = vmatpush1.bf16.msra.mxu1 %v9336_v22 }
 0x191   : > { %2801 = vmatprep.subr.bf16.mxu0 %v9341_v24  ;;  %3027 = vmatprep.subr.bf16.mxu1 %v9344_v25 }
 0x192   : > { %1651 = vmatmul.mubr.bf16.gmra.mrb[28].mxu0 %v643_v23  ;;  %1877 = vmatmul.mubr.bf16.gmra.mrb[28].mxu1 %v643_v23 }
 0x194   : > { %2802 = vmatpush1.bf16.msra.mxu0 %v9339_v26  ;;  %3028 = vmatpush1.bf16.msra.mxu1 %v9342_v27 }
 0x195   : > { %2803 = vmatprep.subr.bf16.mxu0 %v9347_v28  ;;  %3029 = vmatprep.subr.bf16.mxu1 %v9350_v29  ;;  %v9357_v29 = vld [vmem:[#allocation7 + $0x220] ss:$16 sps:$4 sm:$0xff]  }
 0x198   : > { %2804 = vmatpush1.bf16.msra.mxu0 %v9345_v30  ;;  %3030 = vmatpush1.bf16.msra.mxu1 %v9348_v31  ;;  %v9360_v30 = vld [vmem:[#allocation7 + $0x228] ss:$16 sps:$4 sm:$0xff]   ;;  %v9365_v31 = vld [vmem:[#allocation7 + $0x244] ss:$16 sps:$4 sm:$0xff]  }
 0x199   : > { %2886 = vmatprep.subr.bf16.mxu0 %v9353_v32  ;;  %3112 = vmatprep.subr.bf16.mxu1 %v9356_v33 }
 0x22d   : > { %v1582_v45 = vpop.f32.mrb[0].mxu0  ;;  %v1808_v46 = vpop.f32.mrb[0].mxu1 }
 0x22e   : > { %v8372_v47 = vadd.f32 %v1582_v45, %v10784_v41  ;;  %v8404_v48 = vadd.f32 %v1808_v46, %v10787_v42  ;;  %v1584_v49 = vpop.f32.mrb[1].mxu0  ;;  %v1810_v50 = vpop.f32.mrb[1].mxu1 }
 0x22f   : > { %v8373_v51 = vadd.f32 %v1584_v49, %v10790_v43  ;;  %v8405_v52 = vadd.f32 %v1810_v50, %v10793_v44  ;;  %v1586_v53 = vpop.f32.mrb[2].mxu0  ;;  %v1812_v54 = vpop.f32.mrb[2].mxu1 }
 0x230   : > { %v8374_v55 = vadd.f32 %v1586_v53, %v10784_v41  ;;  %v8406_v56 = vadd.f32 %v1812_v54, %v10787_v42  ;;  %v1588_v57 = vpop.f32.mrb[3].mxu0  ;;  %v1814_v58 = vpop.f32.mrb[3].mxu1  ;;  %v1887_v61 = vmax.f32 %v8372_v47, 0.0  ;;  %v1889_v62 = vmax.f32 %v8404_v48, 0.0 }
 0x231   : > { %v8375_v59 = vadd.f32 %v1588_v57, %v10790_v43  ;;  %v8407_v60 = vadd.f32 %v1814_v58, %v10793_v44  ;;  %v1888_v1 = vmax.f32 %v8373_v51, 0.0  ;;  %v1890_v2 = vmax.f32 %v8405_v52, 0.0 }
 0x232   : > { %v1891_v63 = vmax.f32 %v8374_v55, 0.0  ;;  %v1893_v0 = vmax.f32 %v8406_v56, 0.0  ;;  %v9363_v55 = vld [vmem:[#allocation7 + $0x240] ss:$16 sps:$4 sm:$0xff]   ;;  %v9366_v56 = vld [vmem:[#allocation7 + $0x248] ss:$16 sps:$4 sm:$0xff]  }
 0x233   : > { %v1892_v3 = vmax.f32 %v8375_v59, 0.0  ;;  %v1894_v4 = vmax.f32 %v8407_v60, 0.0 }
 0x234   : > { %v1951_v5 = vpack.c.bf16 %v1891_v63, %v1887_v61  ;;  %v10803_v6 = vpack.c.bf16 %v1893_v0, %v1889_v62  ;;  %v9371_v61 = vld [vmem:[#allocation7 + $0x264] ss:$16 sps:$4 sm:$0xff]   ;;  %v9374_v62 = vld [vmem:[#allocation7 + $0x26c] ss:$16 sps:$4 sm:$0xff]  }
 0x235   : > { %v1952_v7 = vpack.c.bf16 %v1892_v3, %v1888_v1  ;;  %v10805_v8 = vpack.c.bf16 %v1894_v4, %v1890_v2  ;;  %v1592_v9 = vpop.f32.mrb[4].mxu0  ;;  %v1818_v10 = vpop.f32.mrb[4].mxu1 }
 0x236   : > { %v8376_v13 = vadd.f32 %v1592_v9, %v10784_v41  ;;  %v8408_v14 = vadd.f32 %v1818_v10, %v10787_v42  ;;  %v1594_v15 = vpop.f32.mrb[5].mxu0  ;;  %v1820_v16 = vpop.f32.mrb[5].mxu1 }
 0x237   : > { %v8377_v19 = vadd.f32 %v1594_v15, %v10790_v43  ;;  %v8409_v20 = vadd.f32 %v1820_v16, %v10793_v44  ;;  %v1596_v21 = vpop.f32.mrb[6].mxu0  ;;  %v1822_v22 = vpop.f32.mrb[6].mxu1  ;;  %2805 = vmatprep.mubr.bf16.mxu0 %v1952_v7  ;;  %3031 = vmatprep.mubr.bf16.mxu1 %v1952_v7 }
 0x238   : > { %v8378_v23 = vadd.f32 %v1596_v21, %v10784_v41  ;;  %v8410_v24 = vadd.f32 %v1822_v22, %v10787_v42  ;;  %v1598_v25 = vpop.f32.mrb[7].mxu0  ;;  %v1824_v26 = vpop.f32.mrb[7].mxu1  ;;  %2806 = vmatmul.mubr.bf16.vlgmr.msra.gmra.mrb[32].mxu0 %v1951_v5  ;;  %3032 = vmatmul.mubr.bf16.vlgmr.msra.gmra.mrb[32].mxu1 %v1951_v5  ;;  %v1895_v32 = vmax.f32 %v8376_v13, 0.0  ;;  %v1897_v33 = vmax.f32 %v8408_v14, 0.0  ;;  %v9377_v13 = vld [vmem:[#allocation7 + $0x284] ss:$16 sps:$4 sm:$0xff]  }
 0x239   : > { %v8379_v27 = vadd.f32 %v1598_v25, %v10790_v43  ;;  %v8411_v28 = vadd.f32 %v1824_v26, %v10793_v44  ;;  %2887 = vmatpush1.bf16.msra.mxu0 %v9351_v11  ;;  %3113 = vmatpush1.bf16.msra.mxu1 %v9354_v12  ;;  %v1896_v45 = vmax.f32 %v8377_v19, 0.0  ;;  %v1898_v46 = vmax.f32 %v8409_v20, 0.0  ;;  %v9369_v11 = vld [vmem:[#allocation7 + $0x260] ss:$16 sps:$4 sm:$0xff]   ;;  %v9372_v12 = vld [vmem:[#allocation7 + $0x268] ss:$16 sps:$4 sm:$0xff]  }
 0x23a   : > { %v1899_v34 = vmax.f32 %v8378_v23, 0.0  ;;  %v1901_v35 = vmax.f32 %v8410_v24, 0.0  ;;  %2888 = vmatprep.subr.bf16.mxu0 %v9359_v17  ;;  %3114 = vmatprep.subr.bf16.mxu1 %v9362_v18  ;;  %v9380_v18 = vld [vmem:[#allocation7 + $0x28c] ss:$16 sps:$4 sm:$0xff]  }
 0x23b   : > { %v1900_v47 = vmax.f32 %v8379_v27, 0.0  ;;  %v1902_v48 = vmax.f32 %v8411_v28, 0.0 }
 0x23c   : > { %v1955_v49 = vpack.c.bf16 %v1899_v34, %v1895_v32  ;;  %v10815_v50 = vpack.c.bf16 %v1901_v35, %v1897_v33  ;;  %v9383_v35 = vld [vmem:[#allocation7 + $0x2a4] ss:$16 sps:$4 sm:$0xff]  }
 0x23d   : > { %v1956_v51 = vpack.c.bf16 %v1900_v47, %v1896_v45  ;;  %v10817_v52 = vpack.c.bf16 %v1902_v48, %v1898_v46  ;;  %v1602_v53 = vpop.f32.mrb[8].mxu0  ;;  %v1828_v54 = vpop.f32.mrb[8].mxu1  ;;  %2889 = vmatpush1.bf16.msra.mxu0 %v9357_v29  ;;  %3115 = vmatpush1.bf16.msra.mxu1 %v9360_v30  ;;  %v9375_v29 = vld [vmem:[#allocation7 + $0x280] ss:$16 sps:$4 sm:$0xff]   ;;  %v9378_v30 = vld [vmem:[#allocation7 + $0x288] ss:$16 sps:$4 sm:$0xff]  }
 0x23e   : > { %v8380_v57 = vadd.f32 %v1602_v53, %v10784_v41  ;;  %v8412_v58 = vadd.f32 %v1828_v54, %v10787_v42  ;;  %v1604_v59 = vpop.f32.mrb[9].mxu0  ;;  %v1830_v60 = vpop.f32.mrb[9].mxu1  ;;  %2890 = vmatprep.subr.bf16.mxu0 %v9365_v31  ;;  %3116 = vmatprep.subr.bf16.mxu1 %v9368_v38  ;;  %v9386_v38 = vld [vmem:[#allocation7 + $0x2ac] ss:$16 sps:$4 sm:$0xff]  }
 0x23f   : > { %v8381_v63 = vadd.f32 %v1604_v59, %v10790_v43  ;;  %v8413_v0 = vadd.f32 %v1830_v60, %v10793_v44  ;;  %v1606_v1 = vpop.f32.mrb[10].mxu0  ;;  %v1832_v2 = vpop.f32.mrb[10].mxu1  ;;  %2815 = vmatprep.mubr.bf16.mxu0 %v1956_v51  ;;  %3041 = vmatprep.mubr.bf16.mxu1 %v1956_v51  ;;  %v9389_v59 = vld [vmem:[#allocation7 + $0x2c4] ss:$16 sps:$4 sm:$0xff]  }
 0x240   : > { %v8382_v3 = vadd.f32 %v1606_v1, %v10784_v41  ;;  %v8414_v4 = vadd.f32 %v1832_v2, %v10787_v42  ;;  %v1608_v5 = vpop.f32.mrb[11].mxu0  ;;  %v1834_v7 = vpop.f32.mrb[11].mxu1  ;;  %2816 = vmatmul.mubr.bf16.gmra.mrb[36].mxu0 %v1955_v49  ;;  %3042 = vmatmul.mubr.bf16.gmra.mrb[36].mxu1 %v1955_v49  ;;  %v1903_v14 = vmax.f32 %v8380_v57, 0.0  ;;  %v1905_v15 = vmax.f32 %v8412_v58, 0.0  ;;  %v9381_v57 = vld [vmem:[#allocation7 + $0x2a0] ss:$16 sps:$4 sm:$0xff]  }
 0x241   : > { %v8383_v9 = vadd.f32 %v1608_v5, %v10790_v43  ;;  %v8415_v10 = vadd.f32 %v1834_v7, %v10793_v44  ;;  %2891 = vmatpush1.bf16.msra.mxu0 %v9363_v55  ;;  %3117 = vmatpush1.bf16.msra.mxu1 %v9366_v56  ;;  %v1904_v19 = vmax.f32 %v8381_v63, 0.0  ;;  %v1906_v20 = vmax.f32 %v8413_v0, 0.0  ;;  %v9384_v58 = vld [vmem:[#allocation7 + $0x2a8] ss:$16 sps:$4 sm:$0xff]   ;;  %v9392_v0 = vld [vmem:[#allocation7 + $0x2cc] ss:$16 sps:$4 sm:$0xff]  }
 0x242   : > { %v1907_v16 = vmax.f32 %v8382_v3, 0.0  ;;  %v1909_v17 = vmax.f32 %v8414_v4, 0.0  ;;  %2892 = vmatprep.subr.bf16.mxu0 %v9371_v61  ;;  %3118 = vmatprep.subr.bf16.mxu1 %v9374_v62 }
 0x243   : > { %v1908_v21 = vmax.f32 %v8383_v9, 0.0  ;;  %v1910_v22 = vmax.f32 %v8415_v10, 0.0 }
 0x244   : > { %v1959_v23 = vpack.c.bf16 %v1907_v16, %v1903_v14  ;;  %v10827_v24 = vpack.c.bf16 %v1909_v17, %v1905_v15  ;;  %v9390_v14 = vld [vmem:[#allocation7 + $0x2c8] ss:$16 sps:$4 sm:$0xff]  }
 0x245   : > { %v1960_v25 = vpack.c.bf16 %v1908_v21, %v1904_v19  ;;  %v10829_v26 = vpack.c.bf16 %v1910_v22, %v1906_v20  ;;  %v1612_v27 = vpop.f32.mrb[12].mxu0  ;;  %v1838_v28 = vpop.f32.mrb[12].mxu1  ;;  %2893 = vmatpush1.bf16.msra.mxu0 %v9369_v11  ;;  %3119 = vmatpush1.bf16.msra.mxu1 %v9372_v12  ;;  %v9395_v19 = vld [vmem:[#allocation7 + $0x2e4] ss:$16 sps:$4 sm:$0xff]   ;;  %v9398_v20 = vld [vmem:[#allocation7 + $0x2ec] ss:$16 sps:$4 sm:$0xff]  }
 0x246   : > { %v8384_v31 = vadd.f32 %v1612_v27, %v10784_v41  ;;  %v8416_v32 = vadd.f32 %v1838_v28, %v10787_v42  ;;  %v1614_v33 = vpop.f32.mrb[13].mxu0  ;;  %v1840_v34 = vpop.f32.mrb[13].mxu1  ;;  %2894 = vmatprep.subr.bf16.mxu0 %v9377_v13  ;;  %3120 = vmatprep.subr.bf16.mxu1 %v9380_v18  ;;  %v9387_v13 = vld [vmem:[#allocation7 + $0x2c0] ss:$16 sps:$4 sm:$0xff]  }
 0x247   : > { %v8385_v45 = vadd.f32 %v1614_v33, %v10790_v43  ;;  %v8417_v46 = vadd.f32 %v1840_v34, %v10793_v44  ;;  %v1616_v47 = vpop.f32.mrb[14].mxu0  ;;  %v1842_v48 = vpop.f32.mrb[14].mxu1  ;;  %2825 = vmatprep.mubr.bf16.mxu0 %v1960_v25  ;;  %3051 = vmatprep.mubr.bf16.mxu1 %v1960_v25  ;;  %v9393_v33 = vld [vmem:[#allocation7 + $0x2e0] ss:$16 sps:$4 sm:$0xff]   ;;  %v9396_v34 = vld [vmem:[#allocation7 + $0x2e8] ss:$16 sps:$4 sm:$0xff]  }
 0x248   : > { %v8386_v49 = vadd.f32 %v1616_v47, %v10784_v41  ;;  %v8418_v51 = vadd.f32 %v1842_v48, %v10787_v42  ;;  %v1618_v53 = vpop.f32.mrb[15].mxu0  ;;  %v1844_v54 = vpop.f32.mrb[15].mxu1  ;;  %2826 = vmatmul.mubr.bf16.gmra.mrb[40].mxu0 %v1959_v23  ;;  %3052 = vmatmul.mubr.bf16.gmra.mrb[40].mxu1 %v1959_v23  ;;  %v1911_v60 = vmax.f32 %v8384_v31, 0.0  ;;  %v1913_v61 = vmax.f32 %v8416_v32, 0.0  ;;  %v9404_v48 = vld [vmem:[#allocation7 + $0x30c] ss:$16 sps:$4 sm:$0xff]  }
 0x249   : > { %v8387_v55 = vadd.f32 %v1618_v53, %v10790_v43  ;;  %v8419_v56 = vadd.f32 %v1844_v54, %v10793_v44  ;;  %2895 = vmatpush1.bf16.msra.mxu0 %v9375_v29  ;;  %3121 = vmatpush1.bf16.msra.mxu1 %v9378_v30  ;;  %v1912_v1 = vmax.f32 %v8385_v45, 0.0  ;;  %v1914_v2 = vmax.f32 %v8417_v46, 0.0 }
 0x24a   : > { %v1915_v62 = vmax.f32 %v8386_v49, 0.0  ;;  %v1917_v63 = vmax.f32 %v8418_v51, 0.0  ;;  %2896 = vmatprep.subr.bf16.mxu0 %v9383_v35  ;;  %3122 = vmatprep.subr.bf16.mxu1 %v9386_v38  ;;  %v9401_v35 = vld [vmem:[#allocation7 + $0x304] ss:$16 sps:$4 sm:$0xff]  }
 0x24b   : > { %v1916_v3 = vmax.f32 %v8387_v55, 0.0  ;;  %v1918_v4 = vmax.f32 %v8419_v56, 0.0 }
 0x24c   : > { %v1963_v5 = vpack.c.bf16 %v1915_v62, %v1911_v60  ;;  %v10839_v7 = vpack.c.bf16 %v1917_v63, %v1913_v61  ;;  %v9399_v61 = vld [vmem:[#allocation7 + $0x300] ss:$16 sps:$4 sm:$0xff]   ;;  %v9402_v62 = vld [vmem:[#allocation7 + $0x308] ss:$16 sps:$4 sm:$0xff]  }
 0x24d   : > { %v1964_v9 = vpack.c.bf16 %v1916_v3, %v1912_v1  ;;  %v10841_v10 = vpack.c.bf16 %v1918_v4, %v1914_v2  ;;  %v1622_v11 = vpop.f32.mrb[16].mxu0  ;;  %v1848_v12 = vpop.f32.mrb[16].mxu1  ;;  %2897 = vmatpush1.bf16.msra.mxu0 %v9381_v57  ;;  %3123 = vmatpush1.bf16.msra.mxu1 %v9384_v58  ;;  %v9407_v3 = vld [vmem:[#allocation7 + $0x324] ss:$16 sps:$4 sm:$0xff]   ;;  %v9410_v4 = vld [vmem:[#allocation7 + $0x32c] ss:$16 sps:$4 sm:$0xff]  }
 0x24e   : > { %v8388_v15 = vadd.f32 %v1622_v11, %v10784_v41  ;;  %v8420_v16 = vadd.f32 %v1848_v12, %v10787_v42  ;;  %v1624_v17 = vpop.f32.mrb[17].mxu0  ;;  %v1850_v18 = vpop.f32.mrb[17].mxu1  ;;  %2898 = vmatprep.subr.bf16.mxu0 %v9389_v59  ;;  %3124 = vmatprep.subr.bf16.mxu1 %v9392_v0 }
 0x24f   : > { %v8389_v21 = vadd.f32 %v1624_v17, %v10790_v43  ;;  %v8421_v22 = vadd.f32 %v1850_v18, %v10793_v44  ;;  %v1626_v23 = vpop.f32.mrb[18].mxu0  ;;  %v1852_v25 = vpop.f32.mrb[18].mxu1  ;;  %2835 = vmatprep.mubr.bf16.mxu0 %v1964_v9  ;;  %3061 = vmatprep.mubr.bf16.mxu1 %v1964_v9 }
 0x250   : > { %v8390_v27 = vadd.f32 %v1626_v23, %v10784_v41  ;;  %v8422_v28 = vadd.f32 %v1852_v25, %v10787_v42  ;;  %v1628_v29 = vpop.f32.mrb[19].mxu0  ;;  %v1854_v30 = vpop.f32.mrb[19].mxu1  ;;  %2836 = vmatmul.mubr.bf16.gmra.mrb[44].mxu0 %v1963_v5  ;;  %3062 = vmatmul.mubr.bf16.gmra.mrb[44].mxu1 %v1963_v5  ;;  %v1919_v38 = vmax.f32 %v8388_v15, 0.0  ;;  %v1921_v45 = vmax.f32 %v8420_v16, 0.0 }
 0x251   : > { %v8391_v31 = vadd.f32 %v1628_v29, %v10790_v43  ;;  %v8423_v32 = vadd.f32 %v1854_v30, %v10793_v44  ;;  %2899 = vmatpush1.bf16.msra.mxu0 %v9387_v13  ;;  %3125 = vmatpush1.bf16.msra.mxu1 %v9390_v14  ;;  %v1920_v49 = vmax.f32 %v8389_v21, 0.0  ;;  %v1922_v51 = vmax.f32 %v8421_v22, 0.0  ;;  %v9413_v21 = vld [vmem:[#allocation7 + $0x344] ss:$16 sps:$4 sm:$0xff]  }
 0x252   : > { %v1923_v46 = vmax.f32 %v8390_v27, 0.0  ;;  %v1925_v47 = vmax.f32 %v8422_v28, 0.0  ;;  %2900 = vmatprep.subr.bf16.mxu0 %v9395_v19  ;;  %3126 = vmatprep.subr.bf16.mxu1 %v9398_v20  ;;  %v9405_v19 = vld [vmem:[#allocation7 + $0x320] ss:$16 sps:$4 sm:$0xff]   ;;  %v9408_v20 = vld [vmem:[#allocation7 + $0x328] ss:$16 sps:$4 sm:$0xff]  }
 0x253   : > { %v1924_v53 = vmax.f32 %v8391_v31, 0.0  ;;  %v1926_v54 = vmax.f32 %v8423_v32, 0.0  ;;  %v9416_v28 = vld [vmem:[#allocation7 + $0x34c] ss:$16 sps:$4 sm:$0xff]  }
 0x254   : > { %v1967_v55 = vpack.c.bf16 %v1923_v46, %v1919_v38  ;;  %v10851_v56 = vpack.c.bf16 %v1925_v47, %v1921_v45  ;;  %v9411_v47 = vld [vmem:[#allocation7 + $0x340] ss:$16 sps:$4 sm:$0xff]  }
 0x255   : > { %v1968_v57 = vpack.c.bf16 %v1924_v53, %v1920_v49  ;;  %v10853_v58 = vpack.c.bf16 %v1926_v54, %v1922_v51  ;;  %v1632_v59 = vpop.f32.mrb[20].mxu0  ;;  %v1858_v60 = vpop.f32.mrb[20].mxu1  ;;  %2901 = vmatpush1.bf16.msra.mxu0 %v9393_v33  ;;  %3127 = vmatpush1.bf16.msra.mxu1 %v9396_v34 }
 0x256   : > { %v8392_v63 = vadd.f32 %v1632_v59, %v10784_v41  ;;  %v8424_v0 = vadd.f32 %v1858_v60, %v10787_v42  ;;  %v1634_v1 = vpop.f32.mrb[21].mxu0  ;;  %v1860_v2 = vpop.f32.mrb[21].mxu1  ;;  %2902 = vmatprep.subr.bf16.mxu0 %v9401_v35  ;;  %3128 = vmatprep.subr.bf16.mxu1 %v9404_v48  ;;  %v9414_v48 = vld [vmem:[#allocation7 + $0x348] ss:$16 sps:$4 sm:$0xff]  }
 0x257   : > { %v8393_v5 = vadd.f32 %v1634_v1, %v10790_v43  ;;  %v8425_v9 = vadd.f32 %v1860_v2, %v10793_v44  ;;  %v1636_v11 = vpop.f32.mrb[22].mxu0  ;;  %v1862_v12 = vpop.f32.mrb[22].mxu1  ;;  %2845 = vmatprep.mubr.bf16.mxu0 %v1968_v57  ;;  %3071 = vmatprep.mubr.bf16.mxu1 %v1968_v57  ;;  %v9422_v57 = vld [vmem:[#allocation7 + $0x36c] ss:$16 sps:$4 sm:$0xff]  }
 0x258   : > { %v8394_v13 = vadd.f32 %v1636_v11, %v10784_v41  ;;  %v8426_v14 = vadd.f32 %v1862_v12, %v10787_v42  ;;  %v1638_v15 = vpop.f32.mrb[23].mxu0  ;;  %v1864_v16 = vpop.f32.mrb[23].mxu1  ;;  %2846 = vmatmul.mubr.bf16.gmra.mrb[48].mxu0 %v1967_v55  ;;  %3072 = vmatmul.mubr.bf16.gmra.mrb[48].mxu1 %v1967_v55  ;;  %v1927_v22 = vmax.f32 %v8392_v63, 0.0  ;;  %v1929_v23 = vmax.f32 %v8424_v0, 0.0  ;;  %v9419_v55 = vld [vmem:[#allocation7 + $0x364] ss:$16 sps:$4 sm:$0xff]  }
 0x259   : > { %v8395_v17 = vadd.f32 %v1638_v15, %v10790_v43  ;;  %v8427_v18 = vadd.f32 %v1864_v16, %v10793_v44  ;;  %2903 = vmatpush1.bf16.msra.mxu0 %v9399_v61  ;;  %3129 = vmatpush1.bf16.msra.mxu1 %v9402_v62  ;;  %v1928_v29 = vmax.f32 %v8393_v5, 0.0  ;;  %v1930_v30 = vmax.f32 %v8425_v9, 0.0  ;;  %v9417_v5 = vld [vmem:[#allocation7 + $0x360] ss:$16 sps:$4 sm:$0xff]   ;;  %v9420_v9 = vld [vmem:[#allocation7 + $0x368] ss:$16 sps:$4 sm:$0xff]  }
 0x25a   : > { %v1931_v25 = vmax.f32 %v8394_v13, 0.0  ;;  %v1933_v27 = vmax.f32 %v8426_v14, 0.0  ;;  %2904 = vmatprep.subr.bf16.mxu0 %v9407_v3  ;;  %3130 = vmatprep.subr.bf16.mxu1 %v9410_v4  ;;  %v9425_v11 = vld [vmem:[#allocation7 + $0x384] ss:$16 sps:$4 sm:$0xff]   ;;  %v9428_v16 = vld [vmem:[#allocation7 + $0x38c] ss:$16 sps:$4 sm:$0xff]  }
 0x25b   : > { %v1932_v31 = vmax.f32 %v8395_v17, 0.0  ;;  %v1934_v32 = vmax.f32 %v8427_v18, 0.0 }
 0x25c   : > { %v1971_v33 = vpack.c.bf16 %v1931_v25, %v1927_v22  ;;  %v10863_v34 = vpack.c.bf16 %v1933_v27, %v1929_v23 }
 0x25d   : > { %v1972_v35 = vpack.c.bf16 %v1932_v31, %v1928_v29  ;;  %v10865_v38 = vpack.c.bf16 %v1934_v32, %v1930_v30  ;;  %v1642_v45 = vpop.f32.mrb[24].mxu0  ;;  %v1868_v46 = vpop.f32.mrb[24].mxu1  ;;  %2905 = vmatpush1.bf16.msra.mxu0 %v9405_v19  ;;  %3131 = vmatpush1.bf16.msra.mxu1 %v9408_v20  ;;  %v9423_v29 = vld [vmem:[#allocation7 + $0x380] ss:$16 sps:$4 sm:$0xff]   ;;  %v9426_v30 = vld [vmem:[#allocation7 + $0x388] ss:$16 sps:$4 sm:$0xff]  }
 0x25e   : > { %v8396_v49 = vadd.f32 %v1642_v45, %v10784_v41  ;;  %v8428_v51 = vadd.f32 %v1868_v46, %v10787_v42  ;;  %v1644_v53 = vpop.f32.mrb[25].mxu0  ;;  %v1870_v54 = vpop.f32.mrb[25].mxu1  ;;  %2906 = vmatprep.subr.bf16.mxu0 %v9413_v21  ;;  %3132 = vmatprep.subr.bf16.mxu1 %v9416_v28  ;;  %v9431_v45 = vld [vmem:[#allocation7 + $0x3a4] ss:$16 sps:$4 sm:$0xff]   ;;  %v9434_v46 = vld [vmem:[#allocation7 + $0x3ac] ss:$16 sps:$4 sm:$0xff]  }
 0x25f   : > { %v8397_v59 = vadd.f32 %v1644_v53, %v10790_v43  ;;  %v8429_v60 = vadd.f32 %v1870_v54, %v10793_v44  ;;  %v1646_v61 = vpop.f32.mrb[26].mxu0  ;;  %v1872_v62 = vpop.f32.mrb[26].mxu1  ;;  %2855 = vmatprep.mubr.bf16.mxu0 %v1972_v35  ;;  %3081 = vmatprep.mubr.bf16.mxu1 %v1972_v35 }
 0x260   : > { %v8398_v63 = vadd.f32 %v1646_v61, %v10784_v41  ;;  %v8430_v0 = vadd.f32 %v1872_v62, %v10787_v42  ;;  %v1648_v1 = vpop.f32.mrb[27].mxu0  ;;  %v1874_v2 = vpop.f32.mrb[27].mxu1  ;;  %2856 = vmatmul.mubr.bf16.gmra.mrb[52].mxu0 %v1971_v33  ;;  %3082 = vmatmul.mubr.bf16.gmra.mrb[52].mxu1 %v1971_v33  ;;  %v1935_v12 = vmax.f32 %v8396_v49, 0.0  ;;  %v1937_v13 = vmax.f32 %v8428_v51, 0.0  ;;  %v9429_v61 = vld [vmem:[#allocation7 + $0x3a0] ss:$16 sps:$4 sm:$0xff]  }
 0x261   : > { %v8399_v3 = vadd.f32 %v1648_v1, %v10790_v43  ;;  %v8431_v4 = vadd.f32 %v1874_v2, %v10793_v44  ;;  %2907 = vmatpush1.bf16.msra.mxu0 %v9411_v47  ;;  %3133 = vmatpush1.bf16.msra.mxu1 %v9414_v48  ;;  %v1936_v17 = vmax.f32 %v8397_v59, 0.0  ;;  %v1938_v18 = vmax.f32 %v8429_v60, 0.0  ;;  %v9432_v62 = vld [vmem:[#allocation7 + $0x3a8] ss:$16 sps:$4 sm:$0xff]  }
 0x262   : > { %v1939_v14 = vmax.f32 %v8398_v63, 0.0  ;;  %v1941_v15 = vmax.f32 %v8430_v0, 0.0  ;;  %2908 = vmatprep.subr.bf16.mxu0 %v9419_v55  ;;  %3134 = vmatprep.subr.bf16.mxu1 %v9422_v57  ;;  %v9437_v63 = vld [vmem:[#allocation7 + $0x3c4] ss:$16 sps:$4 sm:$0xff]  }
 0x263   : > { %v1940_v19 = vmax.f32 %v8399_v3, 0.0  ;;  %v1942_v20 = vmax.f32 %v8431_v4, 0.0 }
 0x264   : > { %v1975_v21 = vpack.c.bf16 %v1939_v14, %v1935_v12  ;;  %v10875_v22 = vpack.c.bf16 %v1941_v15, %v1937_v13  ;;  %v9435_v13 = vld [vmem:[#allocation7 + $0x3c0] ss:$16 sps:$4 sm:$0xff]   ;;  %v9438_v14 = vld [vmem:[#allocation7 + $0x3c8] ss:$16 sps:$4 sm:$0xff]   ;;  %v9443_v15 = vld [vmem:[#allocation7 + $0x3e4] ss:$16 sps:$4 sm:$0xff]  }
 0x265   : > { %v1976_v23 = vpack.c.bf16 %v1940_v19, %v1936_v17  ;;  %v10877_v25 = vpack.c.bf16 %v1942_v20, %v1938_v18  ;;  %v1652_v27 = vpop.f32.mrb[28].mxu0  ;;  %v1878_v28 = vpop.f32.mrb[28].mxu1  ;;  %2909 = vmatpush1.bf16.msra.mxu0 %v9417_v5  ;;  %3135 = vmatpush1.bf16.msra.mxu1 %v9420_v9  ;;  %v9441_v17 = vld [vmem:[#allocation7 + $0x3e0] ss:$16 sps:$4 sm:$0xff]   ;;  %v9444_v18 = vld [vmem:[#allocation7 + $0x3e8] ss:$16 sps:$4 sm:$0xff]  }
 0x266   : > { %v8400_v31 = vadd.f32 %v1652_v27, %v10784_v41  ;;  %v8432_v32 = vadd.f32 %v1878_v28, %v10787_v42  ;;  %v1654_v33 = vpop.f32.mrb[29].mxu0  ;;  %v1880_v35 = vpop.f32.mrb[29].mxu1  ;;  %2910 = vmatprep.subr.bf16.mxu0 %v9425_v11  ;;  %3136 = vmatprep.subr.bf16.mxu1 %v9428_v16  ;;  %v9446_v16 = vld [vmem:[#allocation7 + $0x3ec] ss:$16 sps:$4 sm:$0xff]   ;;  %v9447_v20 = vld [vmem:[#allocation8] ss:$8 sps:$4 sm:$0xff]  }
 0x267   : > { %v8401_v47 = vadd.f32 %v1654_v33, %v10790_v43  ;;  %v8433_v48 = vadd.f32 %v1880_v35, %v10793_v44  ;;  %v1656_v49 = vpop.f32.mrb[30].mxu0  ;;  %v1882_v51 = vpop.f32.mrb[30].mxu1  ;;  %2865 = vmatprep.mubr.bf16.mxu0 %v1976_v23  ;;  %3091 = vmatprep.mubr.bf16.mxu1 %v1976_v23  ;;  %v9449_v19 = vld [vmem:[#allocation8 + $0x4] ss:$8 sps:$4 sm:$0xff]   ;;  %v9450_v23 = vld [vmem:[#allocation8 + $0x10] ss:$8 sps:$4 sm:$0xff]  }
 0x268   : > { %v8402_v53 = vadd.f32 %v1656_v49, %v10784_v41  ;;  %v8434_v54 = vadd.f32 %v1882_v51, %v10787_v42  ;;  %v1658_v55 = vpop.f32.mrb[31].mxu0  ;;  %v1884_v57 = vpop.f32.mrb[31].mxu1  ;;  %2866 = vmatmul.mubr.bf16.gmra.mrb[56].mxu0 %v1975_v21  ;;  %3092 = vmatmul.mubr.bf16.gmra.mrb[56].mxu1 %v1975_v21  ;;  %v1943_v0 = vmax.f32 %v8400_v31, 0.0  ;;  %v1945_v1 = vmax.f32 %v8432_v32, 0.0  ;;  %v9440_v41 = vld [vmem:[#allocation7 + $0x3cc] ss:$16 sps:$4 sm:$0xff]  }
 0x269   : > { %v8403_v59 = vadd.f32 %v1658_v55, %v10790_v43  ;;  %v8435_v60 = vadd.f32 %v1884_v57, %v10793_v44  ;;  %2911 = vmatpush1.bf16.msra.mxu0 %v9423_v29  ;;  %3137 = vmatpush1.bf16.msra.mxu1 %v9426_v30  ;;  %v1944_v42 = vmax.f32 %v8401_v47, 0.0  ;;  %v1946_v4 = vmax.f32 %v8433_v48, 0.0  ;;  %v9452_v21 = vld [vmem:[#allocation8 + $0x14] ss:$8 sps:$4 sm:$0xff]   ;;  %v9453_v27 = vld [vmem:[#allocation8 + $0x20] ss:$8 sps:$4 sm:$0xff]  }
 0x26a   : > { %v1947_v2 = vmax.f32 %v8402_v53, 0.0  ;;  %v1949_v3 = vmax.f32 %v8434_v54, 0.0  ;;  %2912 = vmatprep.subr.bf16.mxu0 %v9431_v45  ;;  %3138 = vmatprep.subr.bf16.mxu1 %v9434_v46  ;;  %v9458_v28 = vld [vmem:[#allocation8 + $0x34] ss:$8 sps:$4 sm:$0xff]   ;;  %v9459_v29 = vld [vmem:[#allocation8 + $0x40] ss:$8 sps:$4 sm:$0xff]  }
 0x26b   : > { %v1948_v5 = vmax.f32 %v8403_v59, 0.0  ;;  %v1950_v9 = vmax.f32 %v8435_v60, 0.0  ;;  %v9464_v30 = vld [vmem:[#allocation8 + $0x54] ss:$8 sps:$4 sm:$0xff]   ;;  %v9465_v31 = vld [vmem:[#allocation8 + $0x60] ss:$8 sps:$4 sm:$0xff]  }
 0x26c   : > { %v1979_v11 = vpack.c.bf16 %v1947_v2, %v1943_v0  ;;  %v10887_v43 = vpack.c.bf16 %v1949_v3, %v1945_v1  ;;  %v9470_v32 = vld [vmem:[#allocation8 + $0x74] ss:$8 sps:$4 sm:$0xff]   ;;  %v9471_v33 = vld [vmem:[#allocation8 + $0x80] ss:$8 sps:$4 sm:$0xff]   ;;  %v9492_v53 = vld [vmem:[#allocation8 + $0xf0] ss:$8 sps:$4 sm:$0xff]  }
 0x26d   : > { %v1980_v44 = vpack.c.bf16 %v1948_v5, %v1944_v42  ;;  %v10889_v12 = vpack.c.bf16 %v1950_v9, %v1946_v4  ;;  %2913 = vmatpush1.bf16.msra.mxu0 %v9429_v61  ;;  %3139 = vmatpush1.bf16.msra.mxu1 %v9432_v62  ;;  %v9476_v35 = vld [vmem:[#allocation8 + $0x94] ss:$8 sps:$4 sm:$0xff]   ;;  %v9477_v45 = vld [vmem:[#allocation8 + $0xa0] ss:$8 sps:$4 sm:$0xff]  }
 0x26e   : > { %2914 = vmatprep.subr.bf16.mxu0 %v9437_v63  ;;  %3140 = vmatprep.subr.bf16.mxu1 %v9440_v41  ;;  %v9482_v46 = vld [vmem:[#allocation8 + $0xb4] ss:$8 sps:$4 sm:$0xff]   ;;  %v9483_v47 = vld [vmem:[#allocation8 + $0xc0] ss:$8 sps:$4 sm:$0xff]  }
 0x26f   : > { %2875 = vmatprep.mubr.bf16.mxu0 %v1980_v44  ;;  %3101 = vmatprep.mubr.bf16.mxu1 %v1980_v44  ;;  %v9488_v48 = vld [vmem:[#allocation8 + $0xd4] ss:$8 sps:$4 sm:$0xff]   ;;  %v9489_v49 = vld [vmem:[#allocation8 + $0xe0] ss:$8 sps:$4 sm:$0xff]  }
 0x270   : > { %2876 = vmatmul.mubr.bf16.gmra.mrb[60].mxu0 %v1979_v11  ;;  %3102 = vmatmul.mubr.bf16.gmra.mrb[60].mxu1 %v1979_v11  ;;  %v9494_v51 = vld [vmem:[#allocation8 + $0xf4] ss:$8 sps:$4 sm:$0xff]   ;;  %v2111_v54 = vld [vmem:[%s11887_s4] sm:$0xf] }
 0x271   : > { %2915 = vmatpush1.bf16.msra.mxu0 %v9435_v13  ;;  %2918 = vmatprep.mubr.bf16.mxu0 %v10805_v8  ;;  %v10927_v55 = vrot.slane %v2111_v54, %v10772_v36  ;;  %v10930_v57 = vrot.slane %v2111_v54, %v10774_v37  ;;  %v10933_v59 = vrot.slane %v2111_v54, %v10779_v39  ;;  %v9543_v11 = vld [vmem:[#allocation10] ss:$16 sps:$4 sm:$0xff]   ;;  %v9545_v13 = vld [vmem:[#allocation10 + $0x4] ss:$16 sps:$4 sm:$0xff]  }
 0x272   : > { %3141 = vmatpush1.bf16.msra.mxu1 %v9438_v14  ;;  %3144 = vmatprep.mubr.bf16.mxu1 %v10805_v8  ;;  %v9455_v8 = vld [vmem:[#allocation8 + $0x24] ss:$8 sps:$4 sm:$0xff]   ;;  %v10936_v60 = vrot.slane %v2111_v54, %v10781_v40 }
 0x273   : > { %2916 = vmatprep.subr.bf16.mxu0 %v9443_v15  ;;  %3142 = vmatprep.subr.bf16.mxu1 %v9446_v16 }
 0x275   : > { %2917 = vmatpush1.bf16.msra.mxu0 %v9441_v17  ;;  %v9548_v17 = vld [vmem:[#allocation10 + $0x24] ss:$16 sps:$4 sm:$0xff]  }
 0x276   : > { %3143 = vmatpush1.bf16.msra.mxu1 %v9444_v18  ;;  %3717 = vmatprep.subr.bf16.mxu0 %v9449_v19 }
 0x277   : > { %4365 = vmatprep.subr.bf16.mxu1 %v9545_v13 }
 0x278   : > { %2919 = vmatmul.mubr.bf16.vlgmr.msra.gmra.mrb[32].mxu0 %v10803_v6 }
 0x279   : > { %3145 = vmatmul.mubr.bf16.vlgmr.msra.gmra.mrb[32].mxu1 %v10803_v6  ;;  %2928 = vmatprep.mubr.bf16.mxu0 %v10817_v52  ;;  %v9456_v6 = vld [vmem:[#allocation8 + $0x30] ss:$8 sps:$4 sm:$0xff]  }
 0x27a   : > { %3154 = vmatprep.mubr.bf16.mxu1 %v10817_v52  ;;  %3718 = vmatpush1.bf16.msra.mxu0 %v9447_v20  ;;  %v9461_v52 = vld [vmem:[#allocation8 + $0x44] ss:$8 sps:$4 sm:$0xff]  }
 0x27b   : > { %3719 = vmatprep.subr.bf16.mxu0 %v9452_v21  ;;  %4366 = vmatpush1.bf16.msra.mxu1 %v9543_v11  ;;  %v9501_v11 = vld [vmem:[#allocation8 + $0x120] ss:$8 sps:$4 sm:$0xff]  }
 0x27c   : > { %4367 = vmatprep.subr.bf16.mxu1 %v9548_v17 }
 0x27e   : > { %3720 = vmatpush1.bf16.msra.mxu0 %v9450_v23 }
 0x27f   : > { %3721 = vmatprep.subr.bf16.mxu0 %v9455_v8 }
 0x280   : > { %2929 = vmatmul.mubr.bf16.gmra.mrb[36].mxu0 %v10815_v50 }
 0x281   : > { %3155 = vmatmul.mubr.bf16.gmra.mrb[36].mxu1 %v10815_v50  ;;  %2938 = vmatprep.mubr.bf16.mxu0 %v10829_v26  ;;  %v9462_v50 = vld [vmem:[#allocation8 + $0x50] ss:$8 sps:$4 sm:$0xff]  }
 0x282   : > { %3164 = vmatprep.mubr.bf16.mxu1 %v10829_v26  ;;  %3722 = vmatpush1.bf16.msra.mxu0 %v9453_v27  ;;  %v9467_v26 = vld [vmem:[#allocation8 + $0x64] ss:$8 sps:$4 sm:$0xff]  }
 0x283   : > { %3723 = vmatprep.subr.bf16.mxu0 %v9458_v28  ;;  %v9546_v28 = vld [vmem:[#allocation10 + $0x20] ss:$16 sps:$4 sm:$0xff]  }
 0x284   : > { %4368 = vmatpush1.bf16.msra.mxu1 %v9546_v28 }
 0x286   : > { %3724 = vmatpush1.bf16.msra.mxu0 %v9456_v6 }
 0x287   : > { %3725 = vmatprep.subr.bf16.mxu0 %v9461_v52 }
 0x288   : > { %2939 = vmatmul.mubr.bf16.gmra.mrb[40].mxu0 %v10827_v24 }
 0x289   : > { %3165 = vmatmul.mubr.bf16.gmra.mrb[40].mxu1 %v10827_v24  ;;  %2948 = vmatprep.mubr.bf16.mxu0 %v10841_v10  ;;  %v9468_v24 = vld [vmem:[#allocation8 + $0x70] ss:$8 sps:$4 sm:$0xff]  }
 0x28a   : > { %3174 = vmatprep.mubr.bf16.mxu1 %v10841_v10  ;;  %3726 = vmatpush1.bf16.msra.mxu0 %v9459_v29  ;;  %v9473_v10 = vld [vmem:[#allocation8 + $0x84] ss:$8 sps:$4 sm:$0xff]  }
 0x28b   : > { %3727 = vmatprep.subr.bf16.mxu0 %v9464_v30  ;;  %v9495_v30 = vld [vmem:[#allocation8 + $0x100] ss:$8 sps:$4 sm:$0xff]  }
 0x28e   : > { %3728 = vmatpush1.bf16.msra.mxu0 %v9462_v50  ;;  %v9551_v50 = vld [vmem:[#allocation10 + $0x44] ss:$16 sps:$4 sm:$0xff]  }
 0x28f   : > { %3729 = vmatprep.subr.bf16.mxu0 %v9467_v26  ;;  %4369 = vmatprep.subr.bf16.mxu1 %v9551_v50  ;;  %v9560_v50 = vld [vmem:[#allocation10 + $0xa4] ss:$16 sps:$4 sm:$0xff]  }
 0x290   : > { %2949 = vmatmul.mubr.bf16.gmra.mrb[44].mxu0 %v10839_v7 }
 0x291   : > { %3175 = vmatmul.mubr.bf16.gmra.mrb[44].mxu1 %v10839_v7  ;;  %2958 = vmatprep.mubr.bf16.mxu0 %v10853_v58  ;;  %v9474_v7 = vld [vmem:[#allocation8 + $0x90] ss:$8 sps:$4 sm:$0xff]  }
 0x292   : > { %3184 = vmatprep.mubr.bf16.mxu1 %v10853_v58  ;;  %3730 = vmatpush1.bf16.msra.mxu0 %v9465_v31  ;;  %v9479_v58 = vld [vmem:[#allocation8 + $0xa4] ss:$8 sps:$4 sm:$0xff]  }
 0x293   : > { %3731 = vmatprep.subr.bf16.mxu0 %v9470_v32 }
 0x296   : > { %3732 = vmatpush1.bf16.msra.mxu0 %v9468_v24 }
 0x297   : > { %3733 = vmatprep.subr.bf16.mxu0 %v9473_v10  ;;  %v9500_v10 = vld [vmem:[#allocation8 + $0x114] ss:$8 sps:$4 sm:$0xff]  }
 0x298   : > { %2959 = vmatmul.mubr.bf16.gmra.mrb[48].mxu0 %v10851_v56 }
 0x299   : > { %3185 = vmatmul.mubr.bf16.gmra.mrb[48].mxu1 %v10851_v56  ;;  %2968 = vmatprep.mubr.bf16.mxu0 %v10865_v38  ;;  %v9480_v56 = vld [vmem:[#allocation8 + $0xb0] ss:$8 sps:$4 sm:$0xff]  }
 0x29a   : > { %3194 = vmatprep.mubr.bf16.mxu1 %v10865_v38  ;;  %3734 = vmatpush1.bf16.msra.mxu0 %v9471_v33  ;;  %v9485_v38 = vld [vmem:[#allocation8 + $0xc4] ss:$8 sps:$4 sm:$0xff]  }
 0x29b   : > { %3735 = vmatprep.subr.bf16.mxu0 %v9476_v35 }
 0x29e   : > { %3736 = vmatpush1.bf16.msra.mxu0 %v9474_v7 }
 0x29f   : > { %3737 = vmatprep.subr.bf16.mxu0 %v9479_v58 }
 0x2a0   : > { %2969 = vmatmul.mubr.bf16.gmra.mrb[52].mxu0 %v10863_v34 }
 0x2a1   : > { %3195 = vmatmul.mubr.bf16.gmra.mrb[52].mxu1 %v10863_v34  ;;  %2978 = vmatprep.mubr.bf16.mxu0 %v10877_v25  ;;  %v9486_v34 = vld [vmem:[#allocation8 + $0xd0] ss:$8 sps:$4 sm:$0xff]  }
 0x2a2   : > { %3204 = vmatprep.mubr.bf16.mxu1 %v10877_v25  ;;  %3738 = vmatpush1.bf16.msra.mxu0 %v9477_v45  ;;  %v9491_v25 = vld [vmem:[#allocation8 + $0xe4] ss:$8 sps:$4 sm:$0xff]  }
 0x2a3   : > { %3739 = vmatprep.subr.bf16.mxu0 %v9482_v46 }
 0x2a6   : > { %3740 = vmatpush1.bf16.msra.mxu0 %v9480_v56 }
 0x2a7   : > { %3741 = vmatprep.subr.bf16.mxu0 %v9485_v38 }
 0x2a8   : > { %2979 = vmatmul.mubr.bf16.gmra.mrb[56].mxu0 %v10875_v22 }
 0x2a9   : > { %3205 = vmatmul.mubr.bf16.gmra.mrb[56].mxu1 %v10875_v22  ;;  %2988 = vmatprep.mubr.bf16.mxu0 %v10889_v12  ;;  %v9497_v22 = vld [vmem:[#allocation8 + $0x104] ss:$8 sps:$4 sm:$0xff]  }
 0x2aa   : > { %3214 = vmatprep.mubr.bf16.mxu1 %v10889_v12  ;;  %3742 = vmatpush1.bf16.msra.mxu0 %v9483_v47  ;;  %v9549_v47 = vld [vmem:[#allocation10 + $0x40] ss:$16 sps:$4 sm:$0xff]  }
 0x2ab   : > { %3743 = vmatprep.subr.bf16.mxu0 %v9488_v48  ;;  %4370 = vmatpush1.bf16.msra.mxu1 %v9549_v47 }
 0x2ae   : > { %3744 = vmatpush1.bf16.msra.mxu0 %v9486_v34 }
 0x2af   : > { %3745 = vmatprep.subr.bf16.mxu0 %v9491_v25 }
 0x2b0   : > { %2989 = vmatmul.mubr.bf16.gmra.mrb[60].mxu0 %v10887_v43 }
 0x2b1   : > { %3215 = vmatmul.mubr.bf16.gmra.mrb[60].mxu1 %v10887_v43 }
 0x2b2   : > { %3746 = vmatpush1.bf16.msra.mxu0 %v9489_v49  ;;  %v9498_v49 = vld [vmem:[#allocation8 + $0x110] ss:$8 sps:$4 sm:$0xff]  }
 0x2b3   : > { %3747 = vmatprep.subr.bf16.mxu0 %v9494_v51  ;;  %v9554_v51 = vld [vmem:[#allocation10 + $0x64] ss:$16 sps:$4 sm:$0xff]  }
 0x2b4   : > { %4371 = vmatprep.subr.bf16.mxu1 %v9554_v51 }
 0x2b6   : > { %3748 = vmatpush1.bf16.msra.mxu0 %v9492_v53 }
 0x2b7   : > { %3830 = vmatprep.subr.bf16.mxu0 %v9497_v22 }
 0x34b   : > { %v2920_v61 = vpop.f32.mrb[32].mxu0 }
 0x34c   : > { %v8436_v62 = vadd.f32 %v2920_v61, %v10927_v55  ;;  %v3146_v63 = vpop.f32.mrb[32].mxu1  ;;  %v2922_v0 = vpop.f32.mrb[33].mxu0  ;;  %v9503_v61 = vld [vmem:[#allocation8 + $0x124] ss:$8 sps:$4 sm:$0xff]  }
 0x34d   : > { %v8468_v1 = vadd.f32 %v3146_v63, %v10930_v57  ;;  %v8437_v2 = vadd.f32 %v2922_v0, %v10933_v59  ;;  %v3148_v3 = vpop.f32.mrb[33].mxu1  ;;  %v2924_v41 = vpop.f32.mrb[34].mxu0 }
 0x34e   : > { %v8469_v42 = vadd.f32 %v3148_v3, %v10936_v60  ;;  %v8438_v4 = vadd.f32 %v2924_v41, %v10927_v55  ;;  %v3150_v5 = vpop.f32.mrb[34].mxu1  ;;  %v2926_v9 = vpop.f32.mrb[35].mxu0  ;;  %v3225_v14 = vmax.f32 %v8436_v62, 0.0 }
 0x34f   : > { %v8470_v43 = vadd.f32 %v3150_v5, %v10930_v57  ;;  %v8439_v44 = vadd.f32 %v2926_v9, %v10933_v59  ;;  %v3152_v12 = vpop.f32.mrb[35].mxu1  ;;  %v3227_v18 = vmax.f32 %v8468_v1, 0.0  ;;  %v3226_v19 = vmax.f32 %v8437_v2, 0.0 }
 0x350   : > { %v3229_v15 = vmax.f32 %v8438_v4, 0.0  ;;  %v8471_v16 = vadd.f32 %v3152_v12, %v10936_v60  ;;  %v3228_v23 = vmax.f32 %v8469_v42, 0.0  ;;  %v9552_v42 = vld [vmem:[#allocation10 + $0x60] ss:$16 sps:$4 sm:$0xff]  }
 0x351   : > { %v3231_v20 = vmax.f32 %v8470_v43, 0.0  ;;  %v3230_v21 = vmax.f32 %v8439_v44, 0.0  ;;  %v9557_v43 = vld [vmem:[#allocation10 + $0x84] ss:$16 sps:$4 sm:$0xff]   ;;  %4372 = vmatpush1.bf16.msra.mxu1 %v9552_v42 }
 0x352   : > { %v3289_v8 = vpack.c.bf16 %v3229_v15, %v3225_v14  ;;  %v3232_v27 = vmax.f32 %v8471_v16, 0.0  ;;  %v9506_v15 = vld [vmem:[#allocation8 + $0x134] ss:$8 sps:$4 sm:$0xff]   ;;  %4373 = vmatprep.subr.bf16.mxu1 %v9557_v43 }
 0x353   : > { %v10946_v6 = vpack.c.bf16 %v3231_v20, %v3227_v18  ;;  %v3290_v52 = vpack.c.bf16 %v3230_v21, %v3226_v19  ;;  %v2930_v29 = vpop.f32.mrb[36].mxu0 }
 0x354   : > { %v10948_v26 = vpack.c.bf16 %v3232_v27, %v3228_v23  ;;  %v8440_v31 = vadd.f32 %v2930_v29, %v10927_v55  ;;  %v3156_v32 = vpop.f32.mrb[36].mxu1  ;;  %v2932_v24 = vpop.f32.mrb[37].mxu0  ;;  %v9555_v27 = vld [vmem:[#allocation10 + $0x80] ss:$16 sps:$4 sm:$0xff]  }
 0x355   : > { %v8472_v33 = vadd.f32 %v3156_v32, %v10930_v57  ;;  %v8441_v35 = vadd.f32 %v2932_v24, %v10933_v59  ;;  %v3158_v7 = vpop.f32.mrb[37].mxu1  ;;  %v2934_v58 = vpop.f32.mrb[38].mxu0  ;;  %3749 = vmatprep.mubr.bf16.mxu0 %v3290_v52  ;;  %4374 = vmatpush1.bf16.msra.mxu1 %v9555_v27 }
 0x356   : > { %v8473_v45 = vadd.f32 %v3158_v7, %v10936_v60  ;;  %v8442_v46 = vadd.f32 %v2934_v58, %v10927_v55  ;;  %v3160_v56 = vpop.f32.mrb[38].mxu1  ;;  %v2936_v38 = vpop.f32.mrb[39].mxu0  ;;  %3750 = vmatmul.mubr.bf16.vlgmr.msra.gmra.mrb[64].mxu0 %v3289_v8  ;;  %v3233_v53 = vmax.f32 %v8440_v31, 0.0  ;;  %4375 = vmatprep.subr.bf16.mxu1 %v9560_v50  ;;  %v9513_v50 = vld [vmem:[#allocation8 + $0x160] ss:$8 sps:$4 sm:$0xff]  }
 0x357   : > { %v8474_v48 = vadd.f32 %v3160_v56, %v10930_v57  ;;  %v8443_v34 = vadd.f32 %v2936_v38, %v10933_v59  ;;  %v3162_v25 = vpop.f32.mrb[39].mxu1  ;;  %3831 = vmatpush1.bf16.msra.mxu0 %v9495_v30  ;;  %v3235_v62 = vmax.f32 %v8472_v33, 0.0  ;;  %v3234_v63 = vmax.f32 %v8441_v35, 0.0  ;;  %v9504_v30 = vld [vmem:[#allocation8 + $0x130] ss:$8 sps:$4 sm:$0xff]  }
 0x358   : > { %v3237_v22 = vmax.f32 %v8442_v46, 0.0  ;;  %v8475_v54 = vadd.f32 %v3162_v25, %v10936_v60  ;;  %3832 = vmatprep.subr.bf16.mxu0 %v9500_v10  ;;  %v3236_v2 = vmax.f32 %v8473_v45, 0.0  ;;  %v9509_v10 = vld [vmem:[#allocation8 + $0x144] ss:$8 sps:$4 sm:$0xff]   ;;  %v9558_v38 = vld [vmem:[#allocation10 + $0xa0] ss:$16 sps:$4 sm:$0xff]  }
 0x359   : > { %v3239_v0 = vmax.f32 %v8474_v48, 0.0  ;;  %v3238_v1 = vmax.f32 %v8443_v34, 0.0  ;;  %v9507_v25 = vld [vmem:[#allocation8 + $0x140] ss:$8 sps:$4 sm:$0xff]   ;;  %4376 = vmatpush1.bf16.msra.mxu1 %v9558_v38 }
 0x35a   : > { %v3293_v3 = vpack.c.bf16 %v3237_v22, %v3233_v53  ;;  %v3240_v41 = vmax.f32 %v8475_v54, 0.0 }
 0x35b   : > { %v10958_v4 = vpack.c.bf16 %v3239_v0, %v3235_v62  ;;  %v3294_v5 = vpack.c.bf16 %v3238_v1, %v3234_v63  ;;  %v2940_v9 = vpop.f32.mrb[40].mxu0  ;;  %3833 = vmatpush1.bf16.msra.mxu0 %v9498_v49  ;;  %v9563_v49 = vld [vmem:[#allocation10 + $0xc4] ss:$16 sps:$4 sm:$0xff]  }
 0x35c   : > { %v10960_v44 = vpack.c.bf16 %v3240_v41, %v3236_v2  ;;  %v8444_v12 = vadd.f32 %v2940_v9, %v10927_v55  ;;  %v3166_v13 = vpop.f32.mrb[40].mxu1  ;;  %v2942_v14 = vpop.f32.mrb[41].mxu0  ;;  %3834 = vmatprep.subr.bf16.mxu0 %v9503_v61  ;;  %v9512_v61 = vld [vmem:[#allocation8 + $0x154] ss:$8 sps:$4 sm:$0xff]   ;;  %4377 = vmatprep.subr.bf16.mxu1 %v9563_v49 }
 0x35d   : > { %v8476_v16 = vadd.f32 %v3166_v13, %v10930_v57  ;;  %v8445_v17 = vadd.f32 %v2942_v14, %v10933_v59  ;;  %v3168_v18 = vpop.f32.mrb[41].mxu1  ;;  %v2944_v19 = vpop.f32.mrb[42].mxu0  ;;  %3759 = vmatprep.mubr.bf16.mxu0 %v3294_v5  ;;  %v9561_v5 = vld [vmem:[#allocation10 + $0xc0] ss:$16 sps:$4 sm:$0xff]   ;;  %v9566_v13 = vld [vmem:[#allocation10 + $0xe4] ss:$16 sps:$4 sm:$0xff]  }
 0x35e   : > { %v8477_v20 = vadd.f32 %v3168_v18, %v10936_v60  ;;  %v8446_v21 = vadd.f32 %v2944_v19, %v10927_v55  ;;  %v3170_v23 = vpop.f32.mrb[42].mxu1  ;;  %v2946_v8 = vpop.f32.mrb[43].mxu0  ;;  %3760 = vmatmul.mubr.bf16.gmra.mrb[68].mxu0 %v3293_v3  ;;  %v3241_v31 = vmax.f32 %v8444_v12, 0.0  ;;  %v9510_v12 = vld [vmem:[#allocation8 + $0x150] ss:$8 sps:$4 sm:$0xff]   ;;  %4378 = vmatpush1.bf16.msra.mxu1 %v9561_v5 }
 0x35f   : > { %v8478_v28 = vadd.f32 %v3170_v23, %v10930_v57  ;;  %v8447_v52 = vadd.f32 %v2946_v8, %v10933_v59  ;;  %v3172_v29 = vpop.f32.mrb[43].mxu1  ;;  %3835 = vmatpush1.bf16.msra.mxu0 %v9501_v11  ;;  %v3243_v33 = vmax.f32 %v8476_v16, 0.0  ;;  %v3242_v35 = vmax.f32 %v8445_v17, 0.0  ;;  %v9515_v17 = vld [vmem:[#allocation8 + $0x164] ss:$8 sps:$4 sm:$0xff]   ;;  %4379 = vmatprep.subr.bf16.mxu1 %v9566_v13 }
 0x360   : > { %v3245_v32 = vmax.f32 %v8446_v21, 0.0  ;;  %v8479_v24 = vadd.f32 %v3172_v29, %v10936_v60  ;;  %3836 = vmatprep.subr.bf16.mxu0 %v9506_v15  ;;  %v3244_v45 = vmax.f32 %v8477_v20, 0.0 }
 0x361   : > { %v3247_v7 = vmax.f32 %v8478_v28, 0.0  ;;  %v3246_v58 = vmax.f32 %v8447_v52, 0.0  ;;  %v9564_v28 = vld [vmem:[#allocation10 + $0xe0] ss:$16 sps:$4 sm:$0xff]  }
 0x362   : > { %v3297_v46 = vpack.c.bf16 %v3245_v32, %v3241_v31  ;;  %v3248_v56 = vmax.f32 %v8479_v24, 0.0  ;;  %v9569_v31 = vld [vmem:[#allocation10 + $0x104] ss:$16 sps:$4 sm:$0xff]   ;;  %4380 = vmatpush1.bf16.msra.mxu1 %v9564_v28 }
 0x363   : > { %v10970_v47 = vpack.c.bf16 %v3247_v7, %v3243_v33  ;;  %v3298_v48 = vpack.c.bf16 %v3246_v58, %v3242_v35  ;;  %v2950_v34 = vpop.f32.mrb[44].mxu0  ;;  %3837 = vmatpush1.bf16.msra.mxu0 %v9504_v30  ;;  %v9518_v35 = vld [vmem:[#allocation8 + $0x174] ss:$8 sps:$4 sm:$0xff]   ;;  %4381 = vmatprep.subr.bf16.mxu1 %v9569_v31 }
 0x364   : > { %v10972_v51 = vpack.c.bf16 %v3248_v56, %v3244_v45  ;;  %v8448_v53 = vadd.f32 %v2950_v34, %v10927_v55  ;;  %v3176_v22 = vpop.f32.mrb[44].mxu1  ;;  %v2952_v54 = vpop.f32.mrb[45].mxu0  ;;  %3838 = vmatprep.subr.bf16.mxu0 %v9509_v10 }
 0x365   : > { %v8480_v62 = vadd.f32 %v3176_v22, %v10930_v57  ;;  %v8449_v63 = vadd.f32 %v2952_v54, %v10933_v59  ;;  %v3178_v0 = vpop.f32.mrb[45].mxu1  ;;  %v2954_v1 = vpop.f32.mrb[46].mxu0  ;;  %3769 = vmatprep.mubr.bf16.mxu0 %v3298_v48  ;;  %v9516_v54 = vld [vmem:[#allocation8 + $0x170] ss:$8 sps:$4 sm:$0xff]  }
 0x366   : > { %v8481_v2 = vadd.f32 %v3178_v0, %v10936_v60  ;;  %v8450_v3 = vadd.f32 %v2954_v1, %v10927_v55  ;;  %v3180_v41 = vpop.f32.mrb[46].mxu1  ;;  %v2956_v42 = vpop.f32.mrb[47].mxu0  ;;  %3770 = vmatmul.mubr.bf16.gmra.mrb[72].mxu0 %v3297_v46  ;;  %v3249_v14 = vmax.f32 %v8448_v53, 0.0  ;;  %v9521_v1 = vld [vmem:[#allocation8 + $0x184] ss:$8 sps:$4 sm:$0xff]  }
 0x367   : > { %v8482_v9 = vadd.f32 %v3180_v41, %v10930_v57  ;;  %v8451_v11 = vadd.f32 %v2956_v42, %v10933_v59  ;;  %v3182_v43 = vpop.f32.mrb[47].mxu1  ;;  %3839 = vmatpush1.bf16.msra.mxu0 %v9507_v25  ;;  %v3251_v18 = vmax.f32 %v8480_v62, 0.0  ;;  %v3250_v19 = vmax.f32 %v8449_v63, 0.0  ;;  %v9567_v25 = vld [vmem:[#allocation10 + $0x100] ss:$16 sps:$4 sm:$0xff]  }
 0x368   : > { %v3253_v15 = vmax.f32 %v8450_v3, 0.0  ;;  %v8483_v16 = vadd.f32 %v3182_v43, %v10936_v60  ;;  %3840 = vmatprep.subr.bf16.mxu0 %v9512_v61  ;;  %v3252_v23 = vmax.f32 %v8481_v2, 0.0  ;;  %v9572_v61 = vld [vmem:[#allocation10 + $0x124] ss:$16 sps:$4 sm:$0xff]   ;;  %4382 = vmatpush1.bf16.msra.mxu1 %v9567_v25  ;;  %v9570_v43 = vld [vmem:[#allocation10 + $0x120] ss:$16 sps:$4 sm:$0xff]  }
 0x369   : > { %v3255_v20 = vmax.f32 %v8482_v9, 0.0  ;;  %v3254_v21 = vmax.f32 %v8451_v11, 0.0  ;;  %4383 = vmatprep.subr.bf16.mxu1 %v9572_v61  ;;  %v9576_v61 = vld [vmem:[#allocation10 + $0x160] ss:$16 sps:$4 sm:$0xff]  }
 0x36a   : > { %v3301_v8 = vpack.c.bf16 %v3253_v15, %v3249_v14  ;;  %v3256_v27 = vmax.f32 %v8483_v16, 0.0  ;;  %v9519_v15 = vld [vmem:[#allocation8 + $0x180] ss:$8 sps:$4 sm:$0xff]   ;;  %v9575_v16 = vld [vmem:[#allocation10 + $0x144] ss:$16 sps:$4 sm:$0xff]  }
 0x36b   : > { %v10982_v52 = vpack.c.bf16 %v3255_v20, %v3251_v18  ;;  %v3302_v29 = vpack.c.bf16 %v3254_v21, %v3250_v19  ;;  %v2960_v30 = vpop.f32.mrb[48].mxu0  ;;  %3841 = vmatpush1.bf16.msra.mxu0 %v9510_v12  ;;  %v9524_v21 = vld [vmem:[#allocation8 + $0x194] ss:$8 sps:$4 sm:$0xff]  }
 0x36c   : > { %v10984_v32 = vpack.c.bf16 %v3256_v27, %v3252_v23  ;;  %v8452_v24 = vadd.f32 %v2960_v30, %v10927_v55  ;;  %v3186_v10 = vpop.f32.mrb[48].mxu1  ;;  %v2962_v33 = vpop.f32.mrb[49].mxu0  ;;  %3842 = vmatprep.subr.bf16.mxu0 %v9515_v17  ;;  %4384 = vmatpush1.bf16.msra.mxu1 %v9570_v43 }
 0x36d   : > { %v8484_v7 = vadd.f32 %v3186_v10, %v10930_v57  ;;  %v8453_v58 = vadd.f32 %v2962_v33, %v10933_v59  ;;  %v3188_v45 = vpop.f32.mrb[49].mxu1  ;;  %v2964_v46 = vpop.f32.mrb[50].mxu0  ;;  %3779 = vmatprep.mubr.bf16.mxu0 %v3302_v29  ;;  %4385 = vmatprep.subr.bf16.mxu1 %v9575_v16 }
 0x36e   : > { %v8485_v56 = vadd.f32 %v3188_v45, %v10936_v60  ;;  %v8454_v38 = vadd.f32 %v2964_v46, %v10927_v55  ;;  %v3190_v48 = vpop.f32.mrb[50].mxu1  ;;  %v2966_v34 = vpop.f32.mrb[51].mxu0  ;;  %3780 = vmatmul.mubr.bf16.gmra.mrb[76].mxu0 %v3301_v8  ;;  %v3257_v62 = vmax.f32 %v8452_v24, 0.0  ;;  %v9573_v24 = vld [vmem:[#allocation10 + $0x140] ss:$16 sps:$4 sm:$0xff]  }
 0x36f   : > { %v8486_v49 = vadd.f32 %v3190_v48, %v10930_v57  ;;  %v8455_v53 = vadd.f32 %v2966_v34, %v10933_v59  ;;  %v3192_v22 = vpop.f32.mrb[51].mxu1  ;;  %3843 = vmatpush1.bf16.msra.mxu0 %v9513_v50  ;;  %v3259_v2 = vmax.f32 %v8484_v7, 0.0  ;;  %v3258_v3 = vmax.f32 %v8453_v58, 0.0  ;;  %v9522_v7 = vld [vmem:[#allocation8 + $0x190] ss:$8 sps:$4 sm:$0xff]  }
 0x370   : > { %v3261_v63 = vmax.f32 %v8454_v38, 0.0  ;;  %v8487_v0 = vadd.f32 %v3192_v22, %v10936_v60  ;;  %3844 = vmatprep.subr.bf16.mxu0 %v9518_v35  ;;  %v3260_v5 = vmax.f32 %v8485_v56, 0.0  ;;  %v9578_v58 = vld [vmem:[#allocation10 + $0x164] ss:$16 sps:$4 sm:$0xff]   ;;  %4386 = vmatpush1.bf16.msra.mxu1 %v9573_v24 }
 0x371   : > { %v3263_v41 = vmax.f32 %v8486_v49, 0.0  ;;  %v3262_v42 = vmax.f32 %v8455_v53, 0.0  ;;  %v9527_v38 = vld [vmem:[#allocation8 + $0x1a4] ss:$8 sps:$4 sm:$0xff]   ;;  %4387 = vmatprep.subr.bf16.mxu1 %v9578_v58 }
 0x372   : > { %v3305_v9 = vpack.c.bf16 %v3261_v63, %v3257_v62  ;;  %v3264_v11 = vmax.f32 %v8487_v0, 0.0 }
 0x373   : > { %v10994_v12 = vpack.c.bf16 %v3263_v41, %v3259_v2  ;;  %v3306_v13 = vpack.c.bf16 %v3262_v42, %v3258_v3  ;;  %v2970_v14 = vpop.f32.mrb[52].mxu0  ;;  %3845 = vmatpush1.bf16.msra.mxu0 %v9516_v54  ;;  %v9581_v2 = vld [vmem:[#allocation10 + $0x184] ss:$16 sps:$4 sm:$0xff]  }
 0x374   : > { %v10996_v17 = vpack.c.bf16 %v3264_v11, %v3260_v5  ;;  %v8456_v18 = vadd.f32 %v2970_v14, %v10927_v55  ;;  %v3196_v19 = vpop.f32.mrb[52].mxu1  ;;  %v2972_v20 = vpop.f32.mrb[53].mxu0  ;;  %3846 = vmatprep.subr.bf16.mxu0 %v9521_v1  ;;  %v9525_v1 = vld [vmem:[#allocation8 + $0x1a0] ss:$8 sps:$4 sm:$0xff]   ;;  %4388 = vmatpush1.bf16.msra.mxu1 %v9576_v61 }
 0x375   : > { %v8488_v23 = vadd.f32 %v3196_v19, %v10930_v57  ;;  %v8457_v8 = vadd.f32 %v2972_v20, %v10933_v59  ;;  %v3198_v27 = vpop.f32.mrb[53].mxu1  ;;  %v2974_v28 = vpop.f32.mrb[54].mxu0  ;;  %3789 = vmatprep.mubr.bf16.mxu0 %v3306_v13  ;;  %v9579_v20 = vld [vmem:[#allocation10 + $0x180] ss:$16 sps:$4 sm:$0xff]   ;;  %4389 = vmatprep.subr.bf16.mxu1 %v9581_v2 }
 0x376   : > { %v8489_v29 = vadd.f32 %v3198_v27, %v10936_v60  ;;  %v8458_v30 = vadd.f32 %v2974_v28, %v10927_v55  ;;  %v3200_v50 = vpop.f32.mrb[54].mxu1  ;;  %v2976_v31 = vpop.f32.mrb[55].mxu0  ;;  %3790 = vmatmul.mubr.bf16.gmra.mrb[80].mxu0 %v3305_v9  ;;  %v3265_v45 = vmax.f32 %v8456_v18, 0.0  ;;  %v9530_v9 = vld [vmem:[#allocation8 + $0x1b4] ss:$8 sps:$4 sm:$0xff]  }
 0x377   : > { %v8490_v10 = vadd.f32 %v3200_v50, %v10930_v57  ;;  %v8459_v33 = vadd.f32 %v2976_v31, %v10933_v59  ;;  %v3202_v35 = vpop.f32.mrb[55].mxu1  ;;  %3847 = vmatpush1.bf16.msra.mxu0 %v9519_v15  ;;  %v3267_v48 = vmax.f32 %v8488_v23, 0.0  ;;  %v3266_v34 = vmax.f32 %v8457_v8, 0.0  ;;  %v9528_v27 = vld [vmem:[#allocation8 + $0x1b0] ss:$8 sps:$4 sm:$0xff]  }
 0x378   : > { %v3269_v46 = vmax.f32 %v8458_v30, 0.0  ;;  %v8491_v56 = vadd.f32 %v3202_v35, %v10936_v60  ;;  %3848 = vmatprep.subr.bf16.mxu0 %v9524_v21  ;;  %v3268_v53 = vmax.f32 %v8489_v29, 0.0  ;;  %v9584_v28 = vld [vmem:[#allocation10 + $0x1a4] ss:$16 sps:$4 sm:$0xff]   ;;  %4390 = vmatpush1.bf16.msra.mxu1 %v9579_v20 }
 0x379   : > { %v3271_v25 = vmax.f32 %v8490_v10, 0.0  ;;  %v3270_v49 = vmax.f32 %v8459_v33, 0.0  ;;  %v9533_v31 = vld [vmem:[#allocation8 + $0x1c4] ss:$8 sps:$4 sm:$0xff]   ;;  %4391 = vmatprep.subr.bf16.mxu1 %v9584_v28 }
 0x37a   : > { %v3309_v22 = vpack.c.bf16 %v3269_v46, %v3265_v45  ;;  %v3272_v54 = vmax.f32 %v8491_v56, 0.0  ;;  %v9582_v46 = vld [vmem:[#allocation10 + $0x1a0] ss:$16 sps:$4 sm:$0xff]  }
 0x37b   : > { %v11006_v62 = vpack.c.bf16 %v3271_v25, %v3267_v48  ;;  %v3310_v63 = vpack.c.bf16 %v3270_v49, %v3266_v34  ;;  %v2980_v0 = vpop.f32.mrb[56].mxu0  ;;  %3849 = vmatpush1.bf16.msra.mxu0 %v9522_v7  ;;  %v9531_v34 = vld [vmem:[#allocation8 + $0x1c0] ss:$8 sps:$4 sm:$0xff]  }
 0x37c   : > { %v11008_v3 = vpack.c.bf16 %v3272_v54, %v3268_v53  ;;  %v8460_v41 = vadd.f32 %v2980_v0, %v10927_v55  ;;  %v3206_v42 = vpop.f32.mrb[56].mxu1  ;;  %v2982_v5 = vpop.f32.mrb[57].mxu0  ;;  %3850 = vmatprep.subr.bf16.mxu0 %v9527_v38  ;;  %v9536_v54 = vld [vmem:[#allocation8 + $0x1d4] ss:$8 sps:$4 sm:$0xff]   ;;  %4392 = vmatpush1.bf16.msra.mxu1 %v9582_v46 }
 0x37d   : > { %v8492_v11 = vadd.f32 %v3206_v42, %v10930_v57  ;;  %v8461_v43 = vadd.f32 %v2982_v5, %v10933_v59  ;;  %v3208_v13 = vpop.f32.mrb[57].mxu1  ;;  %v2984_v14 = vpop.f32.mrb[58].mxu0  ;;  %3799 = vmatprep.mubr.bf16.mxu0 %v3310_v63  ;;  %v9653_v46 = vld [vmem:[#allocation11 + $0x44] ss:$16 sps:$4 sm:$0xff]  }
 0x37e   : > { %v8493_v15 = vadd.f32 %v3208_v13, %v10936_v60  ;;  %v8462_v16 = vadd.f32 %v2984_v14, %v10927_v55  ;;  %v3210_v18 = vpop.f32.mrb[58].mxu1  ;;  %v2986_v19 = vpop.f32.mrb[59].mxu0  ;;  %3800 = vmatmul.mubr.bf16.gmra.mrb[84].mxu0 %v3309_v22  ;;  %v3273_v29 = vmax.f32 %v8460_v41, 0.0  ;;  %v9534_v13 = vld [vmem:[#allocation8 + $0x1d0] ss:$8 sps:$4 sm:$0xff]  }
 0x37f   : > { %v8494_v21 = vadd.f32 %v3210_v18, %v10930_v57  ;;  %v8463_v23 = vadd.f32 %v2986_v19, %v10933_v59  ;;  %v3212_v8 = vpop.f32.mrb[59].mxu1  ;;  %3851 = vmatpush1.bf16.msra.mxu0 %v9525_v1  ;;  %v3275_v24 = vmax.f32 %v8492_v11, 0.0  ;;  %v3274_v10 = vmax.f32 %v8461_v43, 0.0  ;;  %v9539_v18 = vld [vmem:[#allocation8 + $0x1e4] ss:$8 sps:$4 sm:$0xff]  }
 0x380   : > { %v3277_v30 = vmax.f32 %v8462_v16, 0.0  ;;  %v8495_v50 = vadd.f32 %v3212_v8, %v10936_v60  ;;  %3852 = vmatprep.subr.bf16.mxu0 %v9530_v9  ;;  %v3276_v7 = vmax.f32 %v8493_v15, 0.0 }
 0x381   : > { %v3279_v33 = vmax.f32 %v8494_v21, 0.0  ;;  %v3278_v35 = vmax.f32 %v8463_v23, 0.0 }
 0x382   : > { %v3313_v58 = vpack.c.bf16 %v3277_v30, %v3273_v29  ;;  %v3280_v45 = vmax.f32 %v8495_v50, 0.0  ;;  %v9542_v30 = vld [vmem:[#allocation8 + $0x1f4] ss:$8 sps:$4 sm:$0xff]  }
 0x383   : > { %v11018_v56 = vpack.c.bf16 %v3279_v33, %v3275_v24  ;;  %v3314_v38 = vpack.c.bf16 %v3278_v35, %v3274_v10  ;;  %v2990_v48 = vpop.f32.mrb[60].mxu0  ;;  %3853 = vmatpush1.bf16.msra.mxu0 %v9528_v27  ;;  %v9647_v33 = vld [vmem:[#allocation11 + $0x24] ss:$16 sps:$4 sm:$0xff]  }
 0x384   : > { %v3316_v25 = vpack.c.bf16 %v3280_v45, %v3276_v7  ;;  %v8464_v49 = vadd.f32 %v2990_v48, %v10927_v55  ;;  %v3216_v53 = vpop.f32.mrb[60].mxu1  ;;  %v2992_v22 = vpop.f32.mrb[61].mxu0  ;;  %3854 = vmatprep.subr.bf16.mxu0 %v9533_v31  ;;  %v9596_v48 = vld [vmem:[#allocation10 + $0x2c] ss:$16 sps:$4 sm:$0xff]  }
 0x385   : > { %v8496_v61 = vadd.f32 %v3216_v53, %v10930_v57  ;;  %v8465_v63 = vadd.f32 %v2992_v22, %v10933_v59  ;;  %v3218_v0 = vpop.f32.mrb[61].mxu1  ;;  %v2994_v1 = vpop.f32.mrb[62].mxu0  ;;  %3809 = vmatprep.mubr.bf16.mxu0 %v3314_v38  ;;  %v9591_v38 = vld [vmem:[#allocation10 + $0x8] ss:$16 sps:$4 sm:$0xff]   ;;  %v9659_v53 = vld [vmem:[#allocation11 + $0x64] ss:$16 sps:$4 sm:$0xff]  }
 0x386   : > { %v8497_v2 = vadd.f32 %v3218_v0, %v10936_v60  ;;  %v8466_v41 = vadd.f32 %v2994_v1, %v10927_v55  ;;  %v3220_v42 = vpop.f32.mrb[62].mxu1  ;;  %v2996_v5 = vpop.f32.mrb[63].mxu0  ;;  %3810 = vmatmul.mubr.bf16.gmra.mrb[88].mxu0 %v3313_v58  ;;  %v3281_v14 = vmax.f32 %v8464_v49, 0.0  ;;  %v9645_v58 = vld [vmem:[#allocation11 + $0x20] ss:$16 sps:$4 sm:$0xff]  }
 0x387   : > { %v8498_v9 = vadd.f32 %v3220_v42, %v10930_v57  ;;  %v8467_v11 = vadd.f32 %v2996_v5, %v10933_v59  ;;  %v3222_v43 = vpop.f32.mrb[63].mxu1  ;;  %3855 = vmatpush1.bf16.msra.mxu0 %v9531_v34  ;;  %v3283_v19 = vmax.f32 %v8496_v61, 0.0  ;;  %v3282_v20 = vmax.f32 %v8465_v63, 0.0  ;;  %v9537_v59 = vld [vmem:[#allocation8 + $0x1e0] ss:$8 sps:$4 sm:$0xff]  }
 0x388   : > { %v3285_v15 = vmax.f32 %v8466_v41, 0.0  ;;  %v8499_v16 = vadd.f32 %v3222_v43, %v10936_v60  ;;  %3856 = vmatprep.subr.bf16.mxu0 %v9536_v54  ;;  %v3284_v23 = vmax.f32 %v8497_v2, 0.0  ;;  %v9540_v60 = vld [vmem:[#allocation8 + $0x1f0] ss:$8 sps:$4 sm:$0xff]   ;;  %v9599_v1 = vld [vmem:[#allocation10 + $0x4c] ss:$16 sps:$4 sm:$0xff]  }
 0x389   : > { %v3287_v55 = vmax.f32 %v8498_v9, 0.0  ;;  %v3286_v21 = vmax.f32 %v8467_v11, 0.0  ;;  %v9594_v54 = vld [vmem:[#allocation10 + $0x28] ss:$16 sps:$4 sm:$0xff]   ;;  %v9657_v42 = vld [vmem:[#allocation11 + $0x60] ss:$16 sps:$4 sm:$0xff]  }
 0x38a   : > { %v3317_v8 = vpack.c.bf16 %v3285_v15, %v3281_v14  ;;  %v3288_v27 = vmax.f32 %v8499_v16, 0.0  ;;  %v9665_v9 = vld [vmem:[#allocation11 + $0x84] ss:$16 sps:$4 sm:$0xff]   ;;  %v9597_v43 = vld [vmem:[#allocation10 + $0x48] ss:$16 sps:$4 sm:$0xff]  }
 0x38b   : > { %v3319_v28 = vpack.c.bf16 %v3287_v55, %v3283_v19  ;;  %v3318_v57 = vpack.c.bf16 %v3286_v21, %v3282_v20  ;;  %3857 = vmatpush1.bf16.msra.mxu0 %v9534_v13  ;;  %v9602_v13 = vld [vmem:[#allocation10 + $0x6c] ss:$16 sps:$4 sm:$0xff]   ;;  %v9663_v15 = vld [vmem:[#allocation11 + $0x80] ss:$16 sps:$4 sm:$0xff]   ;;  %v9600_v20 = vld [vmem:[#allocation10 + $0x68] ss:$16 sps:$4 sm:$0xff]  }
 0x38c   : > { %v3320_v29 = vpack.c.bf16 %v3288_v27, %v3284_v23  ;;  %3858 = vmatprep.subr.bf16.mxu0 %v9539_v18  ;;  %v9671_v18 = vld [vmem:[#allocation11 + $0xa4] ss:$16 sps:$4 sm:$0xff]  }
 0x38d   : > { %3819 = vmatprep.mubr.bf16.mxu0 %v3318_v57  ;;  %v9669_v57 = vld [vmem:[#allocation11 + $0xa0] ss:$16 sps:$4 sm:$0xff]  }
 0x38e   : > { %3820 = vmatmul.mubr.bf16.gmra.mrb[92].mxu0 %v3317_v8  ;;  %v9605_v8 = vld [vmem:[#allocation10 + $0x8c] ss:$16 sps:$4 sm:$0xff]  }
 0x38f   : > { %3859 = vmatpush1.bf16.msra.mxu0 %v9537_v59  ;;  %3862 = vmatprep.mubr.bf16.mxu0 %v10948_v26  ;;  %v9585_v26 = vld [vmem:[#allocation10 + $0x1c0] ss:$16 sps:$4 sm:$0xff]  }
 0x390   : > { %3860 = vmatprep.subr.bf16.mxu0 %v9542_v30 }
 0x393   : > { %3861 = vmatpush1.bf16.msra.mxu0 %v9540_v60  ;;  %v9603_v60 = vld [vmem:[#allocation10 + $0x88] ss:$16 sps:$4 sm:$0xff]  }
 0x396   : > { %3863 = vmatmul.mubr.bf16.vlgmr.msra.gmra.mrb[64].mxu0 %v10946_v6  ;;  %v9587_v6 = vld [vmem:[#allocation10 + $0x1c4] ss:$16 sps:$4 sm:$0xff]  }
 0x397   : > { %3872 = vmatprep.mubr.bf16.mxu0 %v10960_v44  ;;  %4393 = vmatprep.subr.bf16.mxu1 %v9587_v6  ;;  %v9588_v44 = vld [vmem:[#allocation10 + $0x1e0] ss:$16 sps:$4 sm:$0xff]   ;;  %v9608_v6 = vld [vmem:[#allocation10 + $0xac] ss:$16 sps:$4 sm:$0xff]  }
 0x398   : > { %4394 = vmatpush1.bf16.msra.mxu1 %v9585_v26 }
 0x39e   : > { %3873 = vmatmul.mubr.bf16.gmra.mrb[68].mxu0 %v10958_v4  ;;  %v9590_v4 = vld [vmem:[#allocation10 + $0x1e4] ss:$16 sps:$4 sm:$0xff]  }
 0x39f   : > { %3882 = vmatprep.mubr.bf16.mxu0 %v10972_v51  ;;  %4395 = vmatprep.subr.bf16.mxu1 %v9590_v4  ;;  %v3385_v51 = vld [vmem:[%s11944_s19] sm:$0x3] }
 0x3a0   : > { %4396 = vmatpush1.bf16.msra.mxu1 %v9588_v44  ;;  %v9675_v4 = vld [vmem:[#allocation11 + $0xc0] ss:$16 sps:$4 sm:$0xff]  }
 0x3a6   : > { %3883 = vmatmul.mubr.bf16.gmra.mrb[72].mxu0 %v10970_v47  ;;  %v9593_v47 = vld [vmem:[#allocation10 + $0xc] ss:$16 sps:$4 sm:$0xff]  }
 0x3a7   : > { %3892 = vmatprep.mubr.bf16.mxu0 %v10984_v32  ;;  %4478 = vmatprep.subr.bf16.mxu1 %v9593_v47  ;;  %v9683_v47 = vld [vmem:[#allocation11 + $0xe4] ss:$16 sps:$4 sm:$0xff]  }
 0x3ae   : > { %3893 = vmatmul.mubr.bf16.gmra.mrb[76].mxu0 %v10982_v52  ;;  %v11045_v52 = vrot.slane %v3385_v51, %v10772_v36 }
 0x3af   : > { %3902 = vmatprep.mubr.bf16.mxu0 %v10996_v17 }
 0x3b6   : > { %3903 = vmatmul.mubr.bf16.gmra.mrb[80].mxu0 %v10994_v12  ;;  %v11048_v12 = vrot.slane %v3385_v51, %v10779_v39 }
 0x3b7   : > { %3912 = vmatprep.mubr.bf16.mxu0 %v11008_v3  ;;  %v9641_v3 = vld [vmem:[#allocation11 + $0x4] ss:$16 sps:$4 sm:$0xff]  }
 0x3b8   : > { %5477 = vmatprep.subr.bf16.mxu0 %v9641_v3 }
 0x3be   : > { %3913 = vmatmul.mubr.bf16.gmra.mrb[84].mxu0 %v11006_v62  ;;  %v9639_v62 = vld [vmem:[#allocation11] ss:$16 sps:$4 sm:$0xff]  }
 0x3bf   : > { %3922 = vmatprep.mubr.bf16.mxu0 %v3316_v25  ;;  %5478 = vmatpush1.bf16.msra.mxu0 %v9639_v62  ;;  %v9651_v25 = vld [vmem:[#allocation11 + $0x40] ss:$16 sps:$4 sm:$0xff]  }
 0x3c0   : > { %5479 = vmatprep.subr.bf16.mxu0 %v9647_v33 }
 0x3c3   : > { %5480 = vmatpush1.bf16.msra.mxu0 %v9645_v58  ;;  %v9609_v58 = vld [vmem:[#allocation10 + $0xc8] ss:$16 sps:$4 sm:$0xff]  }
 0x3c4   : > { %5481 = vmatprep.subr.bf16.mxu0 %v9653_v46  ;;  %v9614_v46 = vld [vmem:[#allocation10 + $0xec] ss:$16 sps:$4 sm:$0xff]  }
 0x3c6   : > { %3923 = vmatmul.mubr.bf16.gmra.mrb[88].mxu0 %v11018_v56 }
 0x3c7   : > { %3932 = vmatprep.mubr.bf16.mxu0 %v3320_v29  ;;  %5482 = vmatpush1.bf16.msra.mxu0 %v9651_v25  ;;  %v9677_v29 = vld [vmem:[#allocation11 + $0xc4] ss:$16 sps:$4 sm:$0xff]  }
 0x3c8   : > { %5483 = vmatprep.subr.bf16.mxu0 %v9659_v53  ;;  %v9695_v25 = vld [vmem:[#allocation11 + $0x124] ss:$16 sps:$4 sm:$0xff]   ;;  %v9612_v53 = vld [vmem:[#allocation10 + $0xe8] ss:$16 sps:$4 sm:$0xff]  }
 0x3cb   : > { %5484 = vmatpush1.bf16.msra.mxu0 %v9657_v42  ;;  %v9701_v42 = vld [vmem:[#allocation11 + $0x144] ss:$16 sps:$4 sm:$0xff]  }
 0x3cc   : > { %5485 = vmatprep.subr.bf16.mxu0 %v9665_v9 }
 0x3ce   : > { %3933 = vmatmul.mubr.bf16.gmra.mrb[92].mxu0 %v3319_v28 }
 0x3cf   : > { %5486 = vmatpush1.bf16.msra.mxu0 %v9663_v15  ;;  %v9699_v15 = vld [vmem:[#allocation11 + $0x140] ss:$16 sps:$4 sm:$0xff]  }
 0x3d0   : > { %5487 = vmatprep.subr.bf16.mxu0 %v9671_v18  ;;  %v9707_v18 = vld [vmem:[#allocation11 + $0x164] ss:$16 sps:$4 sm:$0xff]  }
 0x3d3   : > { %5488 = vmatpush1.bf16.msra.mxu0 %v9669_v57  ;;  %v9705_v57 = vld [vmem:[#allocation11 + $0x160] ss:$16 sps:$4 sm:$0xff]  }
 0x3d4   : > { %5489 = vmatprep.subr.bf16.mxu0 %v9677_v29 }
 0x3d7   : > { %5490 = vmatpush1.bf16.msra.mxu0 %v9675_v4  ;;  %v9626_v4 = vld [vmem:[#allocation10 + $0x16c] ss:$16 sps:$4 sm:$0xff]  }
 0x3d8   : > { %5491 = vmatprep.subr.bf16.mxu0 %v9683_v47  ;;  %v9711_v47 = vld [vmem:[#allocation11 + $0x180] ss:$16 sps:$4 sm:$0xff]  }
 0x469   : > { %v3864_v32 = vpop.f32.mrb[64].mxu0 }
 0x46a   : > { %v3866_v17 = vpop.f32.mrb[65].mxu0  ;;  %v8500_v31 = vadd.f32 %v3864_v32, %v11045_v52  ;;  %v9606_v32 = vld [vmem:[#allocation10 + $0xa8] ss:$16 sps:$4 sm:$0xff]  }
 0x46b   : > { %v3868_v50 = vpop.f32.mrb[66].mxu0  ;;  %v8501_v35 = vadd.f32 %v3866_v17, %v11048_v12 }
 0x46c   : > { %v8502_v24 = vadd.f32 %v3868_v50, %v11045_v52  ;;  %v3870_v10 = vpop.f32.mrb[67].mxu0  ;;  %v9611_v50 = vld [vmem:[#allocation10 + $0xcc] ss:$16 sps:$4 sm:$0xff]  }
 0x46d   : > { %v8503_v7 = vadd.f32 %v3870_v10, %v11048_v12  ;;  %v9681_v10 = vld [vmem:[#allocation11 + $0xe0] ss:$16 sps:$4 sm:$0xff]  }
 0x46e   : > { %v11054_v45 = vpack.c.bf16 %v8502_v24, %v8500_v31  ;;  %5492 = vmatpush1.bf16.msra.mxu0 %v9681_v10 }
 0x46f   : > { %v11056_v56 = vpack.c.bf16 %v8503_v7, %v8501_v35  ;;  %v9689_v35 = vld [vmem:[#allocation11 + $0x104] ss:$16 sps:$4 sm:$0xff]  }
 0x470   : > { %5493 = vmatprep.subr.bf16.mxu0 %v9689_v35 }
 0x471   : > { %v3874_v34 = vpop.f32.mrb[68].mxu0  ;;  %4397 = vmatprep.mubr.bf16.mxu1 %v11056_v56 }
 0x472   : > { %v3876_v49 = vpop.f32.mrb[69].mxu0  ;;  %4398 = vmatmul.mubr.bf16.vlgmr.msra.gmra.mrb[64].mxu1 %v11054_v45  ;;  %v8504_v61 = vadd.f32 %v3874_v34, %v11045_v52 }
 0x473   : > { %v3878_v22 = vpop.f32.mrb[70].mxu0  ;;  %4479 = vmatpush1.bf16.msra.mxu1 %v9591_v38  ;;  %v8505_v2 = vadd.f32 %v3876_v49, %v11048_v12 }
 0x474   : > { %v8506_v63 = vadd.f32 %v3878_v22, %v11045_v52  ;;  %v3880_v0 = vpop.f32.mrb[71].mxu0  ;;  %4480 = vmatprep.subr.bf16.mxu1 %v9596_v48  ;;  %v9687_v48 = vld [vmem:[#allocation11 + $0x100] ss:$16 sps:$4 sm:$0xff]  }
 0x475   : > { %v8507_v41 = vadd.f32 %v3880_v0, %v11048_v12  ;;  %5494 = vmatpush1.bf16.msra.mxu0 %v9687_v48  ;;  %v9627_v48 = vld [vmem:[#allocation10 + $0x188] ss:$16 sps:$4 sm:$0xff]  }
 0x476   : > { %v11064_v5 = vpack.c.bf16 %v8506_v63, %v8504_v61  ;;  %v9617_v63 = vld [vmem:[#allocation10 + $0x10c] ss:$16 sps:$4 sm:$0xff]   ;;  %5495 = vmatprep.subr.bf16.mxu0 %v9695_v25 }
 0x477   : > { %v11066_v11 = vpack.c.bf16 %v8507_v41, %v8505_v2  ;;  %4481 = vmatpush1.bf16.msra.mxu1 %v9594_v54  ;;  %v9693_v2 = vld [vmem:[#allocation11 + $0x120] ss:$16 sps:$4 sm:$0xff]  }
 0x478   : > { %4482 = vmatprep.subr.bf16.mxu1 %v9599_v1 }
 0x479   : > { %v3884_v14 = vpop.f32.mrb[72].mxu0  ;;  %4407 = vmatprep.mubr.bf16.mxu1 %v11066_v11  ;;  %5496 = vmatpush1.bf16.msra.mxu0 %v9693_v2 }
 0x47a   : > { %v3886_v16 = vpop.f32.mrb[73].mxu0  ;;  %4408 = vmatmul.mubr.bf16.gmra.mrb[68].mxu1 %v11064_v5  ;;  %v8508_v55 = vadd.f32 %v3884_v14, %v11045_v52  ;;  %5497 = vmatprep.subr.bf16.mxu0 %v9701_v42 }
 0x47b   : > { %v3888_v19 = vpop.f32.mrb[74].mxu0  ;;  %4483 = vmatpush1.bf16.msra.mxu1 %v9597_v43  ;;  %v8509_v27 = vadd.f32 %v3886_v16, %v11048_v12  ;;  %v9615_v43 = vld [vmem:[#allocation10 + $0x108] ss:$16 sps:$4 sm:$0xff]  }
 0x47c   : > { %v8510_v21 = vadd.f32 %v3888_v19, %v11045_v52  ;;  %v3890_v23 = vpop.f32.mrb[75].mxu0  ;;  %4484 = vmatprep.subr.bf16.mxu1 %v9602_v13  ;;  %v9620_v13 = vld [vmem:[#allocation10 + $0x12c] ss:$16 sps:$4 sm:$0xff]  }
 0x47d   : > { %v8511_v28 = vadd.f32 %v3890_v23, %v11048_v12  ;;  %5498 = vmatpush1.bf16.msra.mxu0 %v9699_v15  ;;  %v9644_v15 = vld [vmem:[#allocation11 + $0xc] ss:$16 sps:$4 sm:$0xff]  }
 0x47e   : > { %v11074_v59 = vpack.c.bf16 %v8510_v21, %v8508_v55  ;;  %5499 = vmatprep.subr.bf16.mxu0 %v9707_v18  ;;  %v9648_v18 = vld [vmem:[#allocation11 + $0x28] ss:$16 sps:$4 sm:$0xff]  }
 0x47f   : > { %v11076_v30 = vpack.c.bf16 %v8511_v28, %v8509_v27  ;;  %4485 = vmatpush1.bf16.msra.mxu1 %v9600_v20  ;;  %v9618_v20 = vld [vmem:[#allocation10 + $0x128] ss:$16 sps:$4 sm:$0xff]  }
 0x480   : > { %4486 = vmatprep.subr.bf16.mxu1 %v9605_v8  ;;  %v9623_v8 = vld [vmem:[#allocation10 + $0x14c] ss:$16 sps:$4 sm:$0xff]  }
 0x481   : > { %v3894_v26 = vpop.f32.mrb[76].mxu0  ;;  %4417 = vmatprep.mubr.bf16.mxu1 %v11076_v30  ;;  %5500 = vmatpush1.bf16.msra.mxu0 %v9705_v57  ;;  %v9731_v57 = vld [vmem:[#allocation11 + $0x1e4] ss:$16 sps:$4 sm:$0xff]  }
 0x482   : > { %v3896_v44 = vpop.f32.mrb[77].mxu0  ;;  %4418 = vmatmul.mubr.bf16.gmra.mrb[72].mxu1 %v11074_v59  ;;  %v8512_v17 = vadd.f32 %v3894_v26, %v11045_v52  ;;  %v9621_v26 = vld [vmem:[#allocation10 + $0x148] ss:$16 sps:$4 sm:$0xff]  }
 0x483   : > { %v3898_v51 = vpop.f32.mrb[78].mxu0  ;;  %4487 = vmatpush1.bf16.msra.mxu1 %v9603_v60  ;;  %v8513_v31 = vadd.f32 %v3896_v44, %v11048_v12  ;;  %v9713_v60 = vld [vmem:[#allocation11 + $0x184] ss:$16 sps:$4 sm:$0xff]  }
 0x484   : > { %v8514_v62 = vadd.f32 %v3898_v51, %v11045_v52  ;;  %v3900_v3 = vpop.f32.mrb[79].mxu0  ;;  %4488 = vmatprep.subr.bf16.mxu1 %v9608_v6  ;;  %5501 = vmatprep.subr.bf16.mxu0 %v9713_v60  ;;  %v9729_v60 = vld [vmem:[#allocation11 + $0x1e0] ss:$16 sps:$4 sm:$0xff]  }
 0x485   : > { %v8515_v24 = vadd.f32 %v3900_v3, %v11048_v12  ;;  %5502 = vmatpush1.bf16.msra.mxu0 %v9711_v47  ;;  %v9702_v47 = vld [vmem:[#allocation11 + $0x148] ss:$16 sps:$4 sm:$0xff]  }
 0x486   : > { %v11084_v33 = vpack.c.bf16 %v8514_v62, %v8512_v17  ;;  %v9624_v62 = vld [vmem:[#allocation10 + $0x168] ss:$16 sps:$4 sm:$0xff]  }
 0x487   : > { %v11086_v7 = vpack.c.bf16 %v8515_v24, %v8513_v31  ;;  %4489 = vmatpush1.bf16.msra.mxu1 %v9606_v32  ;;  %v9719_v32 = vld [vmem:[#allocation11 + $0x1a4] ss:$16 sps:$4 sm:$0xff]   ;;  %v9629_v24 = vld [vmem:[#allocation10 + $0x18c] ss:$16 sps:$4 sm:$0xff]  }
 0x488   : > { %4490 = vmatprep.subr.bf16.mxu1 %v9611_v50  ;;  %5503 = vmatprep.subr.bf16.mxu0 %v9719_v32  ;;  %v9708_v32 = vld [vmem:[#allocation11 + $0x168] ss:$16 sps:$4 sm:$0xff]  }
 0x489   : > { %v3904_v38 = vpop.f32.mrb[80].mxu0  ;;  %4427 = vmatprep.mubr.bf16.mxu1 %v11086_v7 }
 0x48a   : > { %v3906_v34 = vpop.f32.mrb[81].mxu0  ;;  %4428 = vmatmul.mubr.bf16.gmra.mrb[76].mxu1 %v11084_v33  ;;  %v8516_v22 = vadd.f32 %v3904_v38, %v11045_v52 }
 0x48b   : > { %v3908_v49 = vpop.f32.mrb[82].mxu0  ;;  %4491 = vmatpush1.bf16.msra.mxu1 %v9609_v58  ;;  %v8517_v0 = vadd.f32 %v3906_v34, %v11048_v12  ;;  %v9717_v58 = vld [vmem:[#allocation11 + $0x1a0] ss:$16 sps:$4 sm:$0xff]   ;;  %v9632_v34 = vld [vmem:[#allocation10 + $0x1ac] ss:$16 sps:$4 sm:$0xff]  }
 0x48c   : > { %v8518_v54 = vadd.f32 %v3908_v49, %v11045_v52  ;;  %v3910_v61 = vpop.f32.mrb[83].mxu0  ;;  %4492 = vmatprep.subr.bf16.mxu1 %v9614_v46  ;;  %5504 = vmatpush1.bf16.msra.mxu0 %v9717_v58 }
 0x48d   : > { %v8519_v1 = vadd.f32 %v3910_v61, %v11048_v12 }
 0x48e   : > { %v11094_v41 = vpack.c.bf16 %v8518_v54, %v8516_v22  ;;  %v9630_v22 = vld [vmem:[#allocation10 + $0x1a8] ss:$16 sps:$4 sm:$0xff]  }
 0x48f   : > { %v11096_v9 = vpack.c.bf16 %v8519_v1, %v8517_v0  ;;  %4493 = vmatpush1.bf16.msra.mxu1 %v9612_v53  ;;  %v9635_v0 = vld [vmem:[#allocation10 + $0x1cc] ss:$16 sps:$4 sm:$0xff]  }
 0x490   : > { %4494 = vmatprep.subr.bf16.mxu1 %v9617_v63 }
 0x491   : > { %v3914_v14 = vpop.f32.mrb[84].mxu0  ;;  %4437 = vmatprep.mubr.bf16.mxu1 %v11096_v9 }
 0x492   : > { %v3916_v16 = vpop.f32.mrb[85].mxu0  ;;  %4438 = vmatmul.mubr.bf16.gmra.mrb[80].mxu1 %v11094_v41  ;;  %v8520_v55 = vadd.f32 %v3914_v14, %v11045_v52  ;;  %v9638_v14 = vld [vmem:[#allocation10 + $0x1ec] ss:$16 sps:$4 sm:$0xff]  }
 0x493   : > { %v3918_v19 = vpop.f32.mrb[86].mxu0  ;;  %4495 = vmatpush1.bf16.msra.mxu1 %v9615_v43  ;;  %v8521_v27 = vadd.f32 %v3916_v16, %v11048_v12  ;;  %v9650_v16 = vld [vmem:[#allocation11 + $0x2c] ss:$16 sps:$4 sm:$0xff]  }
 0x494   : > { %v8522_v21 = vadd.f32 %v3918_v19, %v11045_v52  ;;  %v3920_v23 = vpop.f32.mrb[87].mxu0  ;;  %4496 = vmatprep.subr.bf16.mxu1 %v9620_v13  ;;  %v9633_v13 = vld [vmem:[#allocation10 + $0x1c8] ss:$16 sps:$4 sm:$0xff]   ;;  %v9656_v19 = vld [vmem:[#allocation11 + $0x4c] ss:$16 sps:$4 sm:$0xff]  }
 0x495   : > { %v8523_v28 = vadd.f32 %v3920_v23, %v11048_v12  ;;  %v9672_v23 = vld [vmem:[#allocation11 + $0xa8] ss:$16 sps:$4 sm:$0xff]  }
 0x496   : > { %v11104_v29 = vpack.c.bf16 %v8522_v21, %v8520_v55  ;;  %v9662_v55 = vld [vmem:[#allocation11 + $0x6c] ss:$16 sps:$4 sm:$0xff]  }
 0x497   : > { %v11106_v6 = vpack.c.bf16 %v8523_v28, %v8521_v27  ;;  %4497 = vmatpush1.bf16.msra.mxu1 %v9618_v20  ;;  %v9654_v20 = vld [vmem:[#allocation11 + $0x48] ss:$16 sps:$4 sm:$0xff]   ;;  %v9668_v21 = vld [vmem:[#allocation11 + $0x8c] ss:$16 sps:$4 sm:$0xff]   ;;  %v9725_v27 = vld [vmem:[#allocation11 + $0x1c4] ss:$16 sps:$4 sm:$0xff]  }
 0x498   : > { %4498 = vmatprep.subr.bf16.mxu1 %v9623_v8  ;;  %v9680_v8 = vld [vmem:[#allocation11 + $0xcc] ss:$16 sps:$4 sm:$0xff]   ;;  %v9723_v28 = vld [vmem:[#allocation11 + $0x1c0] ss:$16 sps:$4 sm:$0xff]   ;;  %5505 = vmatprep.subr.bf16.mxu0 %v9725_v27 }
 0x499   : > { %v3924_v44 = vpop.f32.mrb[88].mxu0  ;;  %4447 = vmatprep.mubr.bf16.mxu1 %v11106_v6  ;;  %5506 = vmatpush1.bf16.msra.mxu0 %v9723_v28 }
 0x49a   : > { %v3926_v51 = vpop.f32.mrb[89].mxu0  ;;  %4448 = vmatmul.mubr.bf16.gmra.mrb[84].mxu1 %v11104_v29  ;;  %v8524_v3 = vadd.f32 %v3924_v44, %v11045_v52  ;;  %5507 = vmatprep.subr.bf16.mxu0 %v9731_v57  ;;  %v9698_v44 = vld [vmem:[#allocation11 + $0x12c] ss:$16 sps:$4 sm:$0xff]   ;;  %v9747_v57 = vld [vmem:[#allocation11 + $0x240] ss:$16 sps:$4 sm:$0xff]  }
 0x49b   : > { %v3928_v17 = vpop.f32.mrb[90].mxu0  ;;  %4499 = vmatpush1.bf16.msra.mxu1 %v9621_v26  ;;  %v8525_v10 = vadd.f32 %v3926_v51, %v11048_v12  ;;  %v9690_v26 = vld [vmem:[#allocation11 + $0x108] ss:$16 sps:$4 sm:$0xff]   ;;  %v9710_v51 = vld [vmem:[#allocation11 + $0x16c] ss:$16 sps:$4 sm:$0xff]  }
 0x49c   : > { %v8526_v50 = vadd.f32 %v3928_v17, %v11045_v52  ;;  %v3930_v31 = vpop.f32.mrb[91].mxu0  ;;  %4500 = vmatprep.subr.bf16.mxu1 %v9626_v4  ;;  %v9737_v4 = vld [vmem:[#allocation11 + $0x204] ss:$16 sps:$4 sm:$0xff]   ;;  %v9716_v17 = vld [vmem:[#allocation11 + $0x18c] ss:$16 sps:$4 sm:$0xff]  }
 0x49d   : > { %v8527_v35 = vadd.f32 %v3930_v31, %v11048_v12  ;;  %5508 = vmatpush1.bf16.msra.mxu0 %v9729_v60  ;;  %v9732_v31 = vld [vmem:[#allocation11 + $0x1e8] ss:$16 sps:$4 sm:$0xff]  }
 0x49e   : > { %v11114_v46 = vpack.c.bf16 %v8526_v50, %v8524_v3  ;;  %5590 = vmatprep.subr.bf16.mxu0 %v9737_v4  ;;  %v9728_v3 = vld [vmem:[#allocation11 + $0x1cc] ss:$16 sps:$4 sm:$0xff]   ;;  %v9755_v4 = vld [vmem:[#allocation11 + $0x264] ss:$16 sps:$4 sm:$0xff]  }
 0x49f   : > { %v11116_v38 = vpack.c.bf16 %v8527_v35, %v8525_v10  ;;  %4501 = vmatpush1.bf16.msra.mxu1 %v9624_v62  ;;  %v9720_v62 = vld [vmem:[#allocation11 + $0x1a8] ss:$16 sps:$4 sm:$0xff]   ;;  %v9734_v50 = vld [vmem:[#allocation11 + $0x1ec] ss:$16 sps:$4 sm:$0xff]   ;;  %v11149_v10 = vld [vmem:[%s11945_s23] sm:$0xf] }
 0x4a0   : > { %4502 = vmatprep.subr.bf16.mxu1 %v9629_v24  ;;  %v9740_v24 = vld [vmem:[#allocation11 + $0x20c] ss:$16 sps:$4 sm:$0xff]   ;;  %v11153_v35 = vrot.slane %v11149_v10, %v10772_v36  ;;  %v11157_v58 = vrot.slane %v11149_v10, %v10779_v39  ;;  %s7556_s23 = scalar_lea.sflag [#allocation4], %s10684_s30 }
 0x4a1   : > { %v3934_v25 = vpop.f32.mrb[92].mxu0  ;;  %4457 = vmatprep.mubr.bf16.mxu1 %v11116_v38 }
 0x4a2   : > { %v3936_v49 = vpop.f32.mrb[93].mxu0  ;;  %4458 = vmatmul.mubr.bf16.gmra.mrb[88].mxu1 %v11114_v46  ;;  %v8528_v54 = vadd.f32 %v3934_v25, %v11045_v52 }
 0x4a3   : > { %v3938_v53 = vpop.f32.mrb[94].mxu0  ;;  %4503 = vmatpush1.bf16.msra.mxu1 %v9627_v48  ;;  %v8529_v1 = vadd.f32 %v3936_v49, %v11048_v12 }
 0x4a4   : > { %v8530_v61 = vadd.f32 %v3938_v53, %v11045_v52  ;;  %v3940_v63 = vpop.f32.mrb[95].mxu0  ;;  %4504 = vmatprep.subr.bf16.mxu1 %v9632_v34  ;;  %v9636_v52 = vld [vmem:[#allocation10 + $0x1e8] ss:$16 sps:$4 sm:$0xff]  }
 0x4a5   : > { %v8531_v2 = vadd.f32 %v3940_v63, %v11048_v12  ;;  %v9642_v12 = vld [vmem:[#allocation11 + $0x8] ss:$16 sps:$4 sm:$0xff]  }
 0x4a6   : > { %v11124_v42 = vpack.c.bf16 %v8530_v61, %v8528_v54 }
 0x4a7   : > { %v11126_v43 = vpack.c.bf16 %v8531_v2, %v8529_v1  ;;  %4505 = vmatpush1.bf16.msra.mxu1 %v9630_v22 }
 0x4a8   : > { %4506 = vmatprep.subr.bf16.mxu1 %v9635_v0 }
 0x4a9   : > { %4467 = vmatprep.mubr.bf16.mxu1 %v11126_v43 }
 0x4aa   : > { %4468 = vmatmul.mubr.bf16.gmra.mrb[92].mxu1 %v11124_v42 }
 0x4ab   : > { %4507 = vmatpush1.bf16.msra.mxu1 %v9633_v13  ;;  %4510 = vmatprep.mubr.bf16.mxu1 %v11056_v56  ;;  %v9660_v56 = vld [vmem:[#allocation11 + $0x68] ss:$16 sps:$4 sm:$0xff]  }
 0x4ac   : > { %4508 = vmatprep.subr.bf16.mxu1 %v9638_v14  ;;  %v9738_v13 = vld [vmem:[#allocation11 + $0x208] ss:$16 sps:$4 sm:$0xff]  }
 0x4af   : > { %4509 = vmatpush1.bf16.msra.mxu1 %v9636_v52 }
 0x4b0   : > { %5703 = vmatprep.subr.bf16.mxu1 %v9644_v15  ;;  %v9743_v15 = vld [vmem:[#allocation11 + $0x224] ss:$16 sps:$4 sm:$0xff]  }
 0x4b2   : > { %4511 = vmatmul.mubr.bf16.vlgmr.msra.gmra.mrb[96].mxu1 %v11054_v45  ;;  %v9666_v45 = vld [vmem:[#allocation11 + $0x88] ss:$16 sps:$4 sm:$0xff]  }
 0x4b3   : > { %4520 = vmatprep.mubr.bf16.mxu1 %v11066_v11  ;;  %5704 = vmatpush1.bf16.msra.mxu1 %v9642_v12  ;;  %v9674_v11 = vld [vmem:[#allocation11 + $0xac] ss:$16 sps:$4 sm:$0xff]  }
 0x4b4   : > { %5705 = vmatprep.subr.bf16.mxu1 %v9650_v16  ;;  %v9746_v12 = vld [vmem:[#allocation11 + $0x22c] ss:$16 sps:$4 sm:$0xff]  }
 0x4b7   : > { %5706 = vmatpush1.bf16.msra.mxu1 %v9648_v18 }
 0x4b8   : > { %5707 = vmatprep.subr.bf16.mxu1 %v9656_v19 }
 0x4ba   : > { %4521 = vmatmul.mubr.bf16.gmra.mrb[100].mxu1 %v11064_v5  ;;  %v9678_v5 = vld [vmem:[#allocation11 + $0xc8] ss:$16 sps:$4 sm:$0xff]  }
 0x4bb   : > { %4530 = vmatprep.mubr.bf16.mxu1 %v11076_v30  ;;  %5708 = vmatpush1.bf16.msra.mxu1 %v9654_v20  ;;  %v9686_v30 = vld [vmem:[#allocation11 + $0xec] ss:$16 sps:$4 sm:$0xff]  }
 0x4bc   : > { %5709 = vmatprep.subr.bf16.mxu1 %v9662_v55 }
 0x4bf   : > { %5710 = vmatpush1.bf16.msra.mxu1 %v9660_v56  ;;  %v9741_v56 = vld [vmem:[#allocation11 + $0x220] ss:$16 sps:$4 sm:$0xff]  }
 0x4c0   : > { %5711 = vmatprep.subr.bf16.mxu1 %v9668_v21  ;;  %v9744_v21 = vld [vmem:[#allocation11 + $0x228] ss:$16 sps:$4 sm:$0xff]  }
 0x4c2   : > { %4531 = vmatmul.mubr.bf16.gmra.mrb[104].mxu1 %v11074_v59  ;;  %v9684_v59 = vld [vmem:[#allocation11 + $0xe8] ss:$16 sps:$4 sm:$0xff]  }
 0x4c3   : > { %4540 = vmatprep.mubr.bf16.mxu1 %v11086_v7  ;;  %5712 = vmatpush1.bf16.msra.mxu1 %v9666_v45  ;;  %v9692_v7 = vld [vmem:[#allocation11 + $0x10c] ss:$16 sps:$4 sm:$0xff]  }
 0x4c4   : > { %5713 = vmatprep.subr.bf16.mxu1 %v9674_v11 }
 0x4c7   : > { %5714 = vmatpush1.bf16.msra.mxu1 %v9672_v23  ;;  %v9749_v23 = vld [vmem:[#allocation11 + $0x244] ss:$16 sps:$4 sm:$0xff]  }
 0x4c8   : > { %5715 = vmatprep.subr.bf16.mxu1 %v9680_v8  ;;  %v9752_v8 = vld [vmem:[#allocation11 + $0x24c] ss:$16 sps:$4 sm:$0xff]  }
 0x4ca   : > { %4541 = vmatmul.mubr.bf16.gmra.mrb[108].mxu1 %v11084_v33  ;;  %v9696_v33 = vld [vmem:[#allocation11 + $0x128] ss:$16 sps:$4 sm:$0xff]  }
 0x4cb   : > { %4550 = vmatprep.mubr.bf16.mxu1 %v11096_v9  ;;  %5716 = vmatpush1.bf16.msra.mxu1 %v9678_v5  ;;  %v9704_v9 = vld [vmem:[#allocation11 + $0x14c] ss:$16 sps:$4 sm:$0xff]  }
 0x4cc   : > { %5717 = vmatprep.subr.bf16.mxu1 %v9686_v30 }
 0x4cf   : > { %5718 = vmatpush1.bf16.msra.mxu1 %v9684_v59 }
 0x4d0   : > { %5719 = vmatprep.subr.bf16.mxu1 %v9692_v7  ;;  %v9750_v7 = vld [vmem:[#allocation11 + $0x248] ss:$16 sps:$4 sm:$0xff]  }
 0x4d2   : > { %4551 = vmatmul.mubr.bf16.gmra.mrb[112].mxu1 %v11094_v41  ;;  %v9714_v41 = vld [vmem:[#allocation11 + $0x188] ss:$16 sps:$4 sm:$0xff]  }
 0x4d3   : > { %4560 = vmatprep.mubr.bf16.mxu1 %v11106_v6  ;;  %5720 = vmatpush1.bf16.msra.mxu1 %v9690_v26  ;;  %v9722_v6 = vld [vmem:[#allocation11 + $0x1ac] ss:$16 sps:$4 sm:$0xff]  }
 0x4d4   : > { %5721 = vmatprep.subr.bf16.mxu1 %v9698_v44  ;;  %v9758_v44 = vld [vmem:[#allocation11 + $0x26c] ss:$16 sps:$4 sm:$0xff]  }
 0x4d7   : > { %5722 = vmatpush1.bf16.msra.mxu1 %v9696_v33 }
 0x4d8   : > { %5723 = vmatprep.subr.bf16.mxu1 %v9704_v9 }
 0x4da   : > { %4561 = vmatmul.mubr.bf16.gmra.mrb[116].mxu1 %v11104_v29  ;;  %v9726_v29 = vld [vmem:[#allocation11 + $0x1c8] ss:$16 sps:$4 sm:$0xff]  }
 0x4db   : > { %4570 = vmatprep.mubr.bf16.mxu1 %v11116_v38  ;;  %5724 = vmatpush1.bf16.msra.mxu1 %v9702_v47 }
 0x4dc   : > { %5725 = vmatprep.subr.bf16.mxu1 %v9710_v51 }
 0x4df   : > { %5726 = vmatpush1.bf16.msra.mxu1 %v9708_v32 }
 0x4e0   : > { %5727 = vmatprep.subr.bf16.mxu1 %v9716_v17  ;;  %v9753_v17 = vld [vmem:[#allocation11 + $0x260] ss:$16 sps:$4 sm:$0xff]  }
 0x4e2   : > { %4571 = vmatmul.mubr.bf16.gmra.mrb[120].mxu1 %v11114_v46 }
 0x4e3   : > { %4580 = vmatprep.mubr.bf16.mxu1 %v11126_v43  ;;  %5728 = vmatpush1.bf16.msra.mxu1 %v9714_v41  ;;  %v9735_v43 = vld [vmem:[#allocation11 + $0x200] ss:$16 sps:$4 sm:$0xff]   ;;  %v9756_v41 = vld [vmem:[#allocation11 + $0x268] ss:$16 sps:$4 sm:$0xff]  }
 0x4e4   : > { %5729 = vmatprep.subr.bf16.mxu1 %v9722_v6 }
 0x4e7   : > { %5730 = vmatpush1.bf16.msra.mxu1 %v9720_v62 }
 0x4e8   : > { %5731 = vmatprep.subr.bf16.mxu1 %v9728_v3  ;;  %v9761_v3 = vld [vmem:[#allocation11 + $0x284] ss:$16 sps:$4 sm:$0xff]  }
 0x4ea   : > { %4581 = vmatmul.mubr.bf16.gmra.mrb[124].mxu1 %v11124_v42 }
 0x4eb   : > { %5732 = vmatpush1.bf16.msra.mxu1 %v9726_v29  ;;  %v9764_v29 = vld [vmem:[#allocation11 + $0x28c] ss:$16 sps:$4 sm:$0xff]  }
 0x4ec   : > { %5733 = vmatprep.subr.bf16.mxu1 %v9734_v50 }
 0x4ef   : > { %5734 = vmatpush1.bf16.msra.mxu1 %v9732_v31 }
 0x4f0   : > { %5816 = vmatprep.subr.bf16.mxu1 %v9740_v24 }
 0x545   : > { %v4399_v46 = vpop.f32.mrb[64].mxu1 }
 0x546   : > { %v4400_v38 = vadd.f32 %v4399_v46, %v11153_v35  ;;  %v4401_v48 = vpop.f32.mrb[65].mxu1 }
 0x547   : > { %v4402_v34 = vadd.f32 %v4401_v48, %v11157_v58  ;;  %v4403_v25 = vpop.f32.mrb[66].mxu1  ;;  %v9759_v48 = vld [vmem:[#allocation11 + $0x280] ss:$16 sps:$4 sm:$0xff]  }
 0x548   : > { %v4404_v49 = vadd.f32 %v4403_v25, %v11153_v35  ;;  %v4405_v53 = vpop.f32.mrb[67].mxu1  ;;  %v4591_v54 = vmax.f32 %v4400_v38, 0.0 }
 0x549   : > { %v4406_v22 = vadd.f32 %v4405_v53, %v11157_v58  ;;  %v4592_v63 = vmax.f32 %v4402_v34, 0.0  ;;  %v9762_v34 = vld [vmem:[#allocation11 + $0x288] ss:$16 sps:$4 sm:$0xff]   ;;  %v9767_v53 = vld [vmem:[#allocation11 + $0x2a4] ss:$16 sps:$4 sm:$0xff]  }
 0x54a   : > { %v4595_v61 = vmax.f32 %v4404_v49, 0.0 }
 0x54b   : > { %v4596_v0 = vmax.f32 %v4406_v22, 0.0  ;;  %v9770_v22 = vld [vmem:[#allocation11 + $0x2ac] ss:$16 sps:$4 sm:$0xff]  }
 0x54c   : > { %v4655_v1 = vpack.c.bf16 %v4595_v61, %v4591_v54 }
 0x54d   : > { %v4656_v2 = vpack.c.bf16 %v4596_v0, %v4592_v63  ;;  %v4409_v42 = vpop.f32.mrb[68].mxu1 }
 0x54e   : > { %v4410_v14 = vadd.f32 %v4409_v42, %v11153_v35  ;;  %v4411_v52 = vpop.f32.mrb[69].mxu1  ;;  %v9768_v42 = vld [vmem:[#allocation11 + $0x2a8] ss:$16 sps:$4 sm:$0xff]  }
 0x54f   : > { %v4412_v16 = vadd.f32 %v4411_v52, %v11157_v58  ;;  %v4413_v18 = vpop.f32.mrb[70].mxu1  ;;  %5509 = vmatprep.mubr.bf16.mxu0 %v4656_v2  ;;  %5735 = vmatprep.mubr.bf16.mxu1 %v4656_v2  ;;  %v9765_v2 = vld [vmem:[#allocation11 + $0x2a0] ss:$16 sps:$4 sm:$0xff]   ;;  %v9776_v52 = vld [vmem:[#allocation11 + $0x2cc] ss:$16 sps:$4 sm:$0xff]  }
 0x550   : > { %v4414_v19 = vadd.f32 %v4413_v18, %v11153_v35  ;;  %v4415_v20 = vpop.f32.mrb[71].mxu1  ;;  %5510 = vmatmul.mubr.bf16.vlgmr.msra.gmra.mrb[96].mxu0 %v4655_v1  ;;  %5736 = vmatmul.mubr.bf16.vlgmr.msra.gmra.mrb[128].mxu1 %v4655_v1  ;;  %v4599_v45 = vmax.f32 %v4410_v14, 0.0  ;;  %v9773_v14 = vld [vmem:[#allocation11 + $0x2c4] ss:$16 sps:$4 sm:$0xff]  }
 0x551   : > { %v4416_v55 = vadd.f32 %v4415_v20, %v11157_v58  ;;  %5591 = vmatpush1.bf16.msra.mxu0 %v9735_v43  ;;  %5817 = vmatpush1.bf16.msra.mxu1 %v9738_v13  ;;  %v4600_v5 = vmax.f32 %v4412_v16, 0.0  ;;  %v9771_v20 = vld [vmem:[#allocation11 + $0x2c0] ss:$16 sps:$4 sm:$0xff]  }
 0x552   : > { %v4603_v11 = vmax.f32 %v4414_v19, 0.0  ;;  %5592 = vmatprep.subr.bf16.mxu0 %v9743_v15  ;;  %5818 = vmatprep.subr.bf16.mxu1 %v9746_v12 }
 0x553   : > { %v4604_v27 = vmax.f32 %v4416_v55, 0.0  ;;  %v9774_v55 = vld [vmem:[#allocation11 + $0x2c8] ss:$16 sps:$4 sm:$0xff]  }
 0x554   : > { %v4659_v30 = vpack.c.bf16 %v4603_v11, %v4599_v45  ;;  %v9779_v45 = vld [vmem:[#allocation11 + $0x2e4] ss:$16 sps:$4 sm:$0xff]   ;;  %v9782_v11 = vld [vmem:[#allocation11 + $0x2ec] ss:$16 sps:$4 sm:$0xff]  }
 0x555   : > { %v4660_v28 = vpack.c.bf16 %v4604_v27, %v4600_v5  ;;  %v4419_v59 = vpop.f32.mrb[72].mxu1  ;;  %5593 = vmatpush1.bf16.msra.mxu0 %v9741_v56  ;;  %5819 = vmatpush1.bf16.msra.mxu1 %v9744_v21 }
 0x556   : > { %v4420_v60 = vadd.f32 %v4419_v59, %v11153_v35  ;;  %v4421_v26 = vpop.f32.mrb[73].mxu1  ;;  %5594 = vmatprep.subr.bf16.mxu0 %v9749_v23  ;;  %5820 = vmatprep.subr.bf16.mxu1 %v9752_v8  ;;  %v9780_v59 = vld [vmem:[#allocation11 + $0x2e8] ss:$16 sps:$4 sm:$0xff]  }
 0x557   : > { %v4422_v33 = vadd.f32 %v4421_v26, %v11157_v58  ;;  %v4423_v9 = vpop.f32.mrb[74].mxu1  ;;  %5519 = vmatprep.mubr.bf16.mxu0 %v4660_v28  ;;  %5745 = vmatprep.mubr.bf16.mxu1 %v4660_v28  ;;  %v9777_v28 = vld [vmem:[#allocation11 + $0x2e0] ss:$16 sps:$4 sm:$0xff]   ;;  %v9788_v26 = vld [vmem:[#allocation11 + $0x30c] ss:$16 sps:$4 sm:$0xff]  }
 0x558   : > { %v4424_v47 = vadd.f32 %v4423_v9, %v11153_v35  ;;  %v4425_v51 = vpop.f32.mrb[75].mxu1  ;;  %5520 = vmatmul.mubr.bf16.gmra.mrb[100].mxu0 %v4659_v30  ;;  %5746 = vmatmul.mubr.bf16.gmra.mrb[132].mxu1 %v4659_v30  ;;  %v4607_v6 = vmax.f32 %v4420_v60, 0.0  ;;  %v9785_v60 = vld [vmem:[#allocation11 + $0x304] ss:$16 sps:$4 sm:$0xff]  }
 0x559   : > { %v4426_v32 = vadd.f32 %v4425_v51, %v11157_v58  ;;  %5595 = vmatpush1.bf16.msra.mxu0 %v9747_v57  ;;  %5821 = vmatpush1.bf16.msra.mxu1 %v9750_v7  ;;  %v4608_v50 = vmax.f32 %v4422_v33, 0.0  ;;  %v9783_v51 = vld [vmem:[#allocation11 + $0x300] ss:$16 sps:$4 sm:$0xff]  }
 0x55a   : > { %v4611_v62 = vmax.f32 %v4424_v47, 0.0  ;;  %5596 = vmatprep.subr.bf16.mxu0 %v9755_v4  ;;  %5822 = vmatprep.subr.bf16.mxu1 %v9758_v44 }
 0x55b   : > { %v4612_v31 = vmax.f32 %v4426_v32, 0.0  ;;  %v9786_v32 = vld [vmem:[#allocation11 + $0x308] ss:$16 sps:$4 sm:$0xff]  }
 0x55c   : > { %v4663_v24 = vpack.c.bf16 %v4611_v62, %v4607_v6  ;;  %v9791_v6 = vld [vmem:[#allocation11 + $0x324] ss:$16 sps:$4 sm:$0xff]   ;;  %v9794_v62 = vld [vmem:[#allocation11 + $0x32c] ss:$16 sps:$4 sm:$0xff]  }
 0x55d   : > { %v4664_v46 = vpack.c.bf16 %v4612_v31, %v4608_v50  ;;  %v4429_v38 = vpop.f32.mrb[76].mxu1  ;;  %5597 = vmatpush1.bf16.msra.mxu0 %v9753_v17  ;;  %5823 = vmatpush1.bf16.msra.mxu1 %v9756_v41 }
 0x55e   : > { %v4430_v25 = vadd.f32 %v4429_v38, %v11153_v35  ;;  %v4431_v49 = vpop.f32.mrb[77].mxu1  ;;  %5598 = vmatprep.subr.bf16.mxu0 %v9761_v3  ;;  %5824 = vmatprep.subr.bf16.mxu1 %v9764_v29  ;;  %v9792_v38 = vld [vmem:[#allocation11 + $0x328] ss:$16 sps:$4 sm:$0xff]  }
 0x55f   : > { %v4432_v54 = vadd.f32 %v4431_v49, %v11157_v58  ;;  %v4433_v61 = vpop.f32.mrb[78].mxu1  ;;  %5529 = vmatprep.mubr.bf16.mxu0 %v4664_v46  ;;  %5755 = vmatprep.mubr.bf16.mxu1 %v4664_v46  ;;  %v9789_v46 = vld [vmem:[#allocation11 + $0x320] ss:$16 sps:$4 sm:$0xff]   ;;  %v9800_v49 = vld [vmem:[#allocation11 + $0x34c] ss:$16 sps:$4 sm:$0xff]  }
 0x560   : > { %v4434_v63 = vadd.f32 %v4433_v61, %v11153_v35  ;;  %v4435_v0 = vpop.f32.mrb[79].mxu1  ;;  %5530 = vmatmul.mubr.bf16.gmra.mrb[104].mxu0 %v4663_v24  ;;  %5756 = vmatmul.mubr.bf16.gmra.mrb[136].mxu1 %v4663_v24  ;;  %v4615_v43 = vmax.f32 %v4430_v25, 0.0  ;;  %v9797_v25 = vld [vmem:[#allocation11 + $0x344] ss:$16 sps:$4 sm:$0xff]  }
 0x561   : > { %v4436_v1 = vadd.f32 %v4435_v0, %v11157_v58  ;;  %5599 = vmatpush1.bf16.msra.mxu0 %v9759_v48  ;;  %5825 = vmatpush1.bf16.msra.mxu1 %v9762_v34  ;;  %v4616_v15 = vmax.f32 %v4432_v54, 0.0  ;;  %v9795_v0 = vld [vmem:[#allocation11 + $0x340] ss:$16 sps:$4 sm:$0xff]  }
 0x562   : > { %v4619_v13 = vmax.f32 %v4434_v63, 0.0  ;;  %5600 = vmatprep.subr.bf16.mxu0 %v9767_v53  ;;  %5826 = vmatprep.subr.bf16.mxu1 %v9770_v22 }
 0x563   : > { %v4620_v12 = vmax.f32 %v4436_v1, 0.0  ;;  %v9798_v1 = vld [vmem:[#allocation11 + $0x348] ss:$16 sps:$4 sm:$0xff]  }
 0x564   : > { %v4667_v16 = vpack.c.bf16 %v4619_v13, %v4615_v43  ;;  %v9803_v43 = vld [vmem:[#allocation11 + $0x364] ss:$16 sps:$4 sm:$0xff]   ;;  %v9806_v13 = vld [vmem:[#allocation11 + $0x36c] ss:$16 sps:$4 sm:$0xff]  }
 0x565   : > { %v4668_v18 = vpack.c.bf16 %v4620_v12, %v4616_v15  ;;  %v4439_v19 = vpop.f32.mrb[80].mxu1  ;;  %5601 = vmatpush1.bf16.msra.mxu0 %v9765_v2  ;;  %5827 = vmatpush1.bf16.msra.mxu1 %v9768_v42 }
 0x566   : > { %v4440_v56 = vadd.f32 %v4439_v19, %v11153_v35  ;;  %v4441_v21 = vpop.f32.mrb[81].mxu1  ;;  %5602 = vmatprep.subr.bf16.mxu0 %v9773_v14  ;;  %5828 = vmatprep.subr.bf16.mxu1 %v9776_v52  ;;  %v9804_v19 = vld [vmem:[#allocation11 + $0x368] ss:$16 sps:$4 sm:$0xff]  }
 0x567   : > { %v4442_v23 = vadd.f32 %v4441_v21, %v11157_v58  ;;  %v4443_v8 = vpop.f32.mrb[82].mxu1  ;;  %5539 = vmatprep.mubr.bf16.mxu0 %v4668_v18  ;;  %5765 = vmatprep.mubr.bf16.mxu1 %v4668_v18  ;;  %v9801_v18 = vld [vmem:[#allocation11 + $0x360] ss:$16 sps:$4 sm:$0xff]   ;;  %v9812_v21 = vld [vmem:[#allocation11 + $0x38c] ss:$16 sps:$4 sm:$0xff]  }
 0x568   : > { %v4444_v5 = vadd.f32 %v4443_v8, %v11153_v35  ;;  %v4445_v27 = vpop.f32.mrb[83].mxu1  ;;  %5540 = vmatmul.mubr.bf16.gmra.mrb[108].mxu0 %v4667_v16  ;;  %5766 = vmatmul.mubr.bf16.gmra.mrb[140].mxu1 %v4667_v16  ;;  %v4623_v57 = vmax.f32 %v4440_v56, 0.0  ;;  %v9809_v56 = vld [vmem:[#allocation11 + $0x384] ss:$16 sps:$4 sm:$0xff]  }
 0x569   : > { %v4446_v30 = vadd.f32 %v4445_v27, %v11157_v58  ;;  %5603 = vmatpush1.bf16.msra.mxu0 %v9771_v20  ;;  %5829 = vmatpush1.bf16.msra.mxu1 %v9774_v55  ;;  %v4624_v4 = vmax.f32 %v4442_v23, 0.0  ;;  %v9807_v27 = vld [vmem:[#allocation11 + $0x380] ss:$16 sps:$4 sm:$0xff]  }
 0x56a   : > { %v4627_v7 = vmax.f32 %v4444_v5, 0.0  ;;  %5604 = vmatprep.subr.bf16.mxu0 %v9779_v45  ;;  %5830 = vmatprep.subr.bf16.mxu1 %v9782_v11 }
 0x56b   : > { %v4628_v44 = vmax.f32 %v4446_v30, 0.0  ;;  %v9810_v30 = vld [vmem:[#allocation11 + $0x388] ss:$16 sps:$4 sm:$0xff]  }
 0x56c   : > { %v4671_v33 = vpack.c.bf16 %v4627_v7, %v4623_v57  ;;  %v9815_v57 = vld [vmem:[#allocation11 + $0x3a4] ss:$16 sps:$4 sm:$0xff]   ;;  %v9818_v7 = vld [vmem:[#allocation11 + $0x3ac] ss:$16 sps:$4 sm:$0xff]  }
 0x56d   : > { %v4672_v9 = vpack.c.bf16 %v4628_v44, %v4624_v4  ;;  %v4449_v47 = vpop.f32.mrb[84].mxu1  ;;  %5605 = vmatpush1.bf16.msra.mxu0 %v9777_v28  ;;  %5831 = vmatpush1.bf16.msra.mxu1 %v9780_v59 }
 0x56e   : > { %v4450_v17 = vadd.f32 %v4449_v47, %v11153_v35  ;;  %v4451_v41 = vpop.f32.mrb[85].mxu1  ;;  %5606 = vmatprep.subr.bf16.mxu0 %v9785_v60  ;;  %5832 = vmatprep.subr.bf16.mxu1 %v9788_v26  ;;  %v9816_v47 = vld [vmem:[#allocation11 + $0x3a8] ss:$16 sps:$4 sm:$0xff]  }
 0x56f   : > { %v4452_v3 = vadd.f32 %v4451_v41, %v11157_v58  ;;  %v4453_v29 = vpop.f32.mrb[86].mxu1  ;;  %5549 = vmatprep.mubr.bf16.mxu0 %v4672_v9  ;;  %5775 = vmatprep.mubr.bf16.mxu1 %v4672_v9  ;;  %v9813_v9 = vld [vmem:[#allocation11 + $0x3a0] ss:$16 sps:$4 sm:$0xff]   ;;  %v9821_v41 = vld [vmem:[#allocation11 + $0x3c4] ss:$16 sps:$4 sm:$0xff]  }
 0x570   : > { %v4454_v50 = vadd.f32 %v4453_v29, %v11153_v35  ;;  %v4455_v31 = vpop.f32.mrb[87].mxu1  ;;  %5550 = vmatmul.mubr.bf16.gmra.mrb[112].mxu0 %v4671_v33  ;;  %5776 = vmatmul.mubr.bf16.gmra.mrb[144].mxu1 %v4671_v33  ;;  %v4631_v48 = vmax.f32 %v4450_v17, 0.0  ;;  %v11193_v17 = vrot.slane %v11149_v10, %v10774_v37 }
 0x571   : > { %v4456_v24 = vadd.f32 %v4455_v31, %v11157_v58  ;;  %5607 = vmatpush1.bf16.msra.mxu0 %v9783_v51  ;;  %5833 = vmatpush1.bf16.msra.mxu1 %v9786_v32  ;;  %v4632_v53 = vmax.f32 %v4452_v3, 0.0  ;;  %v11197_v3 = vrot.slane %v11149_v10, %v10781_v40  ;;  %v9819_v31 = vld [vmem:[#allocation11 + $0x3c0] ss:$16 sps:$4 sm:$0xff]  }
 0x572   : > { %v4635_v34 = vmax.f32 %v4454_v50, 0.0  ;;  %5608 = vmatprep.subr.bf16.mxu0 %v9791_v6  ;;  %5834 = vmatprep.subr.bf16.mxu1 %v9794_v62  ;;  %v9824_v6 = vld [vmem:[#allocation11 + $0x3cc] ss:$16 sps:$4 sm:$0xff]  }
 0x573   : > { %v4636_v22 = vmax.f32 %v4456_v24, 0.0  ;;  %v9822_v24 = vld [vmem:[#allocation11 + $0x3c8] ss:$16 sps:$4 sm:$0xff]  }
 0x574   : > { %v4675_v54 = vpack.c.bf16 %v4635_v34, %v4631_v48  ;;  %v9827_v48 = vld [vmem:[#allocation11 + $0x3e4] ss:$16 sps:$4 sm:$0xff]   ;;  %v9830_v34 = vld [vmem:[#allocation11 + $0x3ec] ss:$16 sps:$4 sm:$0xff]  }
 0x575   : > { %v4676_v61 = vpack.c.bf16 %v4636_v22, %v4632_v53  ;;  %v4459_v63 = vpop.f32.mrb[88].mxu1  ;;  %5609 = vmatpush1.bf16.msra.mxu0 %v9789_v46  ;;  %5835 = vmatpush1.bf16.msra.mxu1 %v9792_v38 }
 0x576   : > { %v4460_v2 = vadd.f32 %v4459_v63, %v11153_v35  ;;  %v4461_v42 = vpop.f32.mrb[89].mxu1  ;;  %5610 = vmatprep.subr.bf16.mxu0 %v9797_v25  ;;  %5836 = vmatprep.subr.bf16.mxu1 %v9800_v49 }
 0x577   : > { %v4462_v14 = vadd.f32 %v4461_v42, %v11157_v58  ;;  %v4463_v52 = vpop.f32.mrb[90].mxu1  ;;  %5559 = vmatprep.mubr.bf16.mxu0 %v4676_v61  ;;  %5785 = vmatprep.mubr.bf16.mxu1 %v4676_v61  ;;  %v9828_v61 = vld [vmem:[#allocation11 + $0x3e8] ss:$16 sps:$4 sm:$0xff]  }
 0x578   : > { %v4464_v15 = vadd.f32 %v4463_v52, %v11153_v35  ;;  %v4465_v12 = vpop.f32.mrb[91].mxu1  ;;  %5560 = vmatmul.mubr.bf16.gmra.mrb[116].mxu0 %v4675_v54  ;;  %5786 = vmatmul.mubr.bf16.gmra.mrb[148].mxu1 %v4675_v54  ;;  %v4639_v20 = vmax.f32 %v4460_v2, 0.0  ;;  %v9825_v54 = vld [vmem:[#allocation11 + $0x3e0] ss:$16 sps:$4 sm:$0xff]   ;;  %v9836_v2 = vld [vmem:[#allocation13 + $0xc] ss:$16 sps:$4 sm:$0xff]  }
 0x579   : > { %v4466_v16 = vadd.f32 %v4465_v12, %v11157_v58  ;;  %5611 = vmatpush1.bf16.msra.mxu0 %v9795_v0  ;;  %5837 = vmatpush1.bf16.msra.mxu1 %v9798_v1  ;;  %v4640_v45 = vmax.f32 %v4462_v14, 0.0  ;;  %v9833_v1 = vld [vmem:[#allocation13 + $0x4] ss:$16 sps:$4 sm:$0xff]   ;;  %v9834_v12 = vld [vmem:[#allocation13 + $0x8] ss:$16 sps:$4 sm:$0xff]  }
 0x57a   : > { %v4643_v55 = vmax.f32 %v4464_v15, 0.0  ;;  %5612 = vmatprep.subr.bf16.mxu0 %v9803_v43  ;;  %5838 = vmatprep.subr.bf16.mxu1 %v9806_v13  ;;  %v9831_v15 = vld [vmem:[#allocation13] ss:$16 sps:$4 sm:$0xff]  }
 0x57b   : > { %v4644_v11 = vmax.f32 %v4466_v16, 0.0 }
 0x57c   : > { %v4679_v23 = vpack.c.bf16 %v4643_v55, %v4639_v20  ;;  %v9842_v20 = vld [vmem:[#allocation13 + $0x2c] ss:$16 sps:$4 sm:$0xff]  }
 0x57d   : > { %v4680_v8 = vpack.c.bf16 %v4644_v11, %v4640_v45  ;;  %v4469_v5 = vpop.f32.mrb[92].mxu1  ;;  %5613 = vmatpush1.bf16.msra.mxu0 %v9801_v18  ;;  %5839 = vmatpush1.bf16.msra.mxu1 %v9804_v19  ;;  %v9839_v19 = vld [vmem:[#allocation13 + $0x24] ss:$16 sps:$4 sm:$0xff]  }
 0x57e   : > { %v4470_v28 = vadd.f32 %v4469_v5, %v11153_v35  ;;  %v4471_v59 = vpop.f32.mrb[93].mxu1  ;;  %5614 = vmatprep.subr.bf16.mxu0 %v9809_v56  ;;  %5840 = vmatprep.subr.bf16.mxu1 %v9812_v21 }
 0x57f   : > { %v4472_v60 = vadd.f32 %v4471_v59, %v11157_v58  ;;  %v4473_v26 = vpop.f32.mrb[94].mxu1  ;;  %5569 = vmatprep.mubr.bf16.mxu0 %v4680_v8  ;;  %5795 = vmatprep.mubr.bf16.mxu1 %v4680_v8  ;;  %v9840_v8 = vld [vmem:[#allocation13 + $0x28] ss:$16 sps:$4 sm:$0xff]  }
 0x580   : > { %v4474_v4 = vadd.f32 %v4473_v26, %v11153_v35  ;;  %v4475_v44 = vpop.f32.mrb[95].mxu1  ;;  %5570 = vmatmul.mubr.bf16.gmra.mrb[120].mxu0 %v4679_v23  ;;  %5796 = vmatmul.mubr.bf16.gmra.mrb[152].mxu1 %v4679_v23  ;;  %v4647_v51 = vmax.f32 %v4470_v28, 0.0  ;;  %v9837_v23 = vld [vmem:[#allocation13 + $0x20] ss:$16 sps:$4 sm:$0xff]   ;;  %v9848_v28 = vld [vmem:[#allocation13 + $0x4c] ss:$16 sps:$4 sm:$0xff]  }
 0x581   : > { %v4476_v33 = vadd.f32 %v4475_v44, %v11157_v58  ;;  %5615 = vmatpush1.bf16.msra.mxu0 %v9807_v27  ;;  %5841 = vmatpush1.bf16.msra.mxu1 %v9810_v30  ;;  %v4648_v35 = vmax.f32 %v4472_v60, 0.0  ;;  %v9845_v30 = vld [vmem:[#allocation13 + $0x44] ss:$16 sps:$4 sm:$0xff]   ;;  %v9846_v44 = vld [vmem:[#allocation13 + $0x48] ss:$16 sps:$4 sm:$0xff]  }
 0x582   : > { %v4651_v32 = vmax.f32 %v4474_v4, 0.0  ;;  %5616 = vmatprep.subr.bf16.mxu0 %v9815_v57  ;;  %5842 = vmatprep.subr.bf16.mxu1 %v9818_v7  ;;  %v9843_v4 = vld [vmem:[#allocation13 + $0x40] ss:$16 sps:$4 sm:$0xff]  }
 0x583   : > { %v4652_v62 = vmax.f32 %v4476_v33, 0.0 }
 0x584   : > { %v4683_v58 = vpack.c.bf16 %v4651_v32, %v4647_v51  ;;  %v9854_v51 = vld [vmem:[#allocation13 + $0x6c] ss:$16 sps:$4 sm:$0xff]  }
 0x585   : > { %v4684_v29 = vpack.c.bf16 %v4652_v62, %v4648_v35  ;;  %v4512_v50 = vpop.f32.mrb[96].mxu1  ;;  %5617 = vmatpush1.bf16.msra.mxu0 %v9813_v9  ;;  %5843 = vmatpush1.bf16.msra.mxu1 %v9816_v47  ;;  %v9851_v47 = vld [vmem:[#allocation13 + $0x64] ss:$16 sps:$4 sm:$0xff]  }
 0x586   : > { %v4513_v46 = vadd.f32 %v4512_v50, %v11193_v17  ;;  %v4514_v38 = vpop.f32.mrb[97].mxu1  ;;  %5618 = vmatprep.subr.bf16.mxu0 %v9821_v41  ;;  %5844 = vmatprep.subr.bf16.mxu1 %v9824_v6 }
 0x587   : > { %v4515_v25 = vadd.f32 %v4514_v38, %v11197_v3  ;;  %v4516_v49 = vpop.f32.mrb[98].mxu1  ;;  %5579 = vmatprep.mubr.bf16.mxu0 %v4684_v29  ;;  %5805 = vmatprep.mubr.bf16.mxu1 %v4684_v29  ;;  %v9852_v29 = vld [vmem:[#allocation13 + $0x68] ss:$16 sps:$4 sm:$0xff]  }
 0x588   : > { %v4517_v10 = vadd.f32 %v4516_v49, %v11193_v17  ;;  %v4518_v53 = vpop.f32.mrb[99].mxu1  ;;  %5580 = vmatmul.mubr.bf16.gmra.mrb[124].mxu0 %v4683_v58  ;;  %5806 = vmatmul.mubr.bf16.gmra.mrb[156].mxu1 %v4683_v58  ;;  %v4593_v63 = vmax.f32 %v4513_v46, 0.0  ;;  %v9849_v58 = vld [vmem:[#allocation13 + $0x60] ss:$16 sps:$4 sm:$0xff]   ;;  %v9860_v46 = vld [vmem:[#allocation13 + $0x8c] ss:$16 sps:$4 sm:$0xff]  }
 0x589   : > { %v4519_v22 = vadd.f32 %v4518_v53, %v11197_v3  ;;  %5619 = vmatpush1.bf16.msra.mxu0 %v9819_v31  ;;  %5845 = vmatpush1.bf16.msra.mxu1 %v9822_v24  ;;  %v4594_v42 = vmax.f32 %v4515_v25, 0.0  ;;  %v9857_v24 = vld [vmem:[#allocation13 + $0x84] ss:$16 sps:$4 sm:$0xff]   ;;  %v9858_v53 = vld [vmem:[#allocation13 + $0x88] ss:$16 sps:$4 sm:$0xff]  }
 0x58a   : > { %v4597_v0 = vmax.f32 %v4517_v10, 0.0  ;;  %5620 = vmatprep.subr.bf16.mxu0 %v9827_v48  ;;  %5846 = vmatprep.subr.bf16.mxu1 %v9830_v34  ;;  %v9855_v10 = vld [vmem:[#allocation13 + $0x80] ss:$16 sps:$4 sm:$0xff]  }
 0x58b   : > { %v4598_v43 = vmax.f32 %v4519_v22, 0.0 }
 0x58c   : > { %v4657_v13 = vpack.c.bf16 %v4597_v0, %v4593_v63  ;;  %v9866_v63 = vld [vmem:[#allocation13 + $0xac] ss:$16 sps:$4 sm:$0xff]  }
 0x58d   : > { %v4658_v14 = vpack.c.bf16 %v4598_v43, %v4594_v42  ;;  %v4522_v52 = vpop.f32.mrb[100].mxu1  ;;  %5621 = vmatpush1.bf16.msra.mxu0 %v9825_v54  ;;  %5847 = vmatpush1.bf16.msra.mxu1 %v9828_v61  ;;  %v9863_v61 = vld [vmem:[#allocation13 + $0xa4] ss:$16 sps:$4 sm:$0xff]  }
 0x58e   : > { %v4523_v16 = vadd.f32 %v4522_v52, %v11193_v17  ;;  %v4524_v18 = vpop.f32.mrb[101].mxu1  ;;  %6815 = vmatprep.subr.bf16.mxu0 %v9833_v1  ;;  %7041 = vmatprep.subr.bf16.mxu1 %v9836_v2 }
 0x58f   : > { %v4525_v55 = vadd.f32 %v4524_v18, %v11197_v3  ;;  %v4526_v56 = vpop.f32.mrb[102].mxu1  ;;  %5622 = vmatprep.mubr.bf16.mxu0 %v4658_v14  ;;  %5848 = vmatprep.mubr.bf16.mxu1 %v4658_v14  ;;  %v9864_v14 = vld [vmem:[#allocation13 + $0xa8] ss:$16 sps:$4 sm:$0xff]  }
 0x590   : > { %v4527_v21 = vadd.f32 %v4526_v56, %v11193_v17  ;;  %v4528_v45 = vpop.f32.mrb[103].mxu1  ;;  %5623 = vmatmul.mubr.bf16.vlgmr.msra.gmra.mrb[96].mxu0 %v4657_v13  ;;  %5849 = vmatmul.mubr.bf16.vlgmr.msra.gmra.mrb[128].mxu1 %v4657_v13  ;;  %v4601_v5 = vmax.f32 %v4523_v16, 0.0  ;;  %v9861_v13 = vld [vmem:[#allocation13 + $0xa0] ss:$16 sps:$4 sm:$0xff]   ;;  %v9872_v16 = vld [vmem:[#allocation13 + $0xcc] ss:$16 sps:$4 sm:$0xff]  }
 0x591   : > { %v4529_v11 = vadd.f32 %v4528_v45, %v11197_v3  ;;  %6816 = vmatpush1.bf16.msra.mxu0 %v9831_v15  ;;  %7042 = vmatpush1.bf16.msra.mxu1 %v9834_v12  ;;  %v4602_v59 = vmax.f32 %v4525_v55, 0.0  ;;  %v9869_v12 = vld [vmem:[#allocation13 + $0xc4] ss:$16 sps:$4 sm:$0xff]   ;;  %v9870_v45 = vld [vmem:[#allocation13 + $0xc8] ss:$16 sps:$4 sm:$0xff]  }
 0x592   : > { %v4605_v27 = vmax.f32 %v4527_v21, 0.0  ;;  %6817 = vmatprep.subr.bf16.mxu0 %v9839_v19  ;;  %7043 = vmatprep.subr.bf16.mxu1 %v9842_v20  ;;  %v9867_v21 = vld [vmem:[#allocation13 + $0xc0] ss:$16 sps:$4 sm:$0xff]  }
 0x593   : > { %v4606_v57 = vmax.f32 %v4529_v11, 0.0 }
 0x594   : > { %v4661_v7 = vpack.c.bf16 %v4605_v27, %v4601_v5  ;;  %v9878_v5 = vld [vmem:[#allocation13 + $0xec] ss:$16 sps:$4 sm:$0xff]  }
 0x595   : > { %v4662_v60 = vpack.c.bf16 %v4606_v57, %v4602_v59  ;;  %v4532_v26 = vpop.f32.mrb[104].mxu1  ;;  %6818 = vmatpush1.bf16.msra.mxu0 %v9837_v23  ;;  %7044 = vmatpush1.bf16.msra.mxu1 %v9840_v8  ;;  %v9875_v8 = vld [vmem:[#allocation13 + $0xe4] ss:$16 sps:$4 sm:$0xff]  }
 0x596   : > { %v4533_v33 = vadd.f32 %v4532_v26, %v11193_v17  ;;  %v4534_v9 = vpop.f32.mrb[105].mxu1  ;;  %6819 = vmatprep.subr.bf16.mxu0 %v9845_v30  ;;  %7045 = vmatprep.subr.bf16.mxu1 %v9848_v28 }
 0x597   : > { %v4535_v32 = vadd.f32 %v4534_v9, %v11197_v3  ;;  %v4536_v41 = vpop.f32.mrb[106].mxu1  ;;  %5632 = vmatprep.mubr.bf16.mxu0 %v4662_v60  ;;  %5858 = vmatprep.mubr.bf16.mxu1 %v4662_v60  ;;  %v9876_v60 = vld [vmem:[#allocation13 + $0xe8] ss:$16 sps:$4 sm:$0xff]  }
 0x598   : > { %v4537_v6 = vadd.f32 %v4536_v41, %v11193_v17  ;;  %v4538_v35 = vpop.f32.mrb[107].mxu1  ;;  %5633 = vmatmul.mubr.bf16.gmra.mrb[100].mxu0 %v4661_v7  ;;  %5859 = vmatmul.mubr.bf16.gmra.mrb[132].mxu1 %v4661_v7  ;;  %v4609_v50 = vmax.f32 %v4533_v33, 0.0  ;;  %v9873_v7 = vld [vmem:[#allocation13 + $0xe0] ss:$16 sps:$4 sm:$0xff]   ;;  %v9884_v33 = vld [vmem:[#allocation13 + $0x10c] ss:$16 sps:$4 sm:$0xff]  }
 0x599   : > { %v4539_v62 = vadd.f32 %v4538_v35, %v11197_v3  ;;  %6820 = vmatpush1.bf16.msra.mxu0 %v9843_v4  ;;  %7046 = vmatpush1.bf16.msra.mxu1 %v9846_v44  ;;  %v4610_v38 = vmax.f32 %v4535_v32, 0.0  ;;  %v9881_v44 = vld [vmem:[#allocation13 + $0x104] ss:$16 sps:$4 sm:$0xff]   ;;  %v9882_v35 = vld [vmem:[#allocation13 + $0x108] ss:$16 sps:$4 sm:$0xff]  }
 0x59a   : > { %v4613_v31 = vmax.f32 %v4537_v6, 0.0  ;;  %6821 = vmatprep.subr.bf16.mxu0 %v9851_v47  ;;  %7047 = vmatprep.subr.bf16.mxu1 %v9854_v51  ;;  %v9879_v6 = vld [vmem:[#allocation13 + $0x100] ss:$16 sps:$4 sm:$0xff]  }
 0x59b   : > { %v4614_v48 = vmax.f32 %v4539_v62, 0.0 }
 0x59c   : > { %v4665_v34 = vpack.c.bf16 %v4613_v31, %v4609_v50  ;;  %v9890_v50 = vld [vmem:[#allocation13 + $0x12c] ss:$16 sps:$4 sm:$0xff]  }
 0x59d   : > { %v4666_v25 = vpack.c.bf16 %v4614_v48, %v4610_v38  ;;  %v4542_v49 = vpop.f32.mrb[108].mxu1  ;;  %6822 = vmatpush1.bf16.msra.mxu0 %v9849_v58  ;;  %7048 = vmatpush1.bf16.msra.mxu1 %v9852_v29  ;;  %v9887_v29 = vld [vmem:[#allocation13 + $0x124] ss:$16 sps:$4 sm:$0xff]  }
 0x59e   : > { %v4543_v22 = vadd.f32 %v4542_v49, %v11193_v17  ;;  %v4544_v54 = vpop.f32.mrb[109].mxu1  ;;  %6823 = vmatprep.subr.bf16.mxu0 %v9857_v24  ;;  %7049 = vmatprep.subr.bf16.mxu1 %v9860_v46 }
 0x59f   : > { %v4545_v0 = vadd.f32 %v4544_v54, %v11197_v3  ;;  %v4546_v1 = vpop.f32.mrb[110].mxu1  ;;  %5642 = vmatprep.mubr.bf16.mxu0 %v4666_v25  ;;  %5868 = vmatprep.mubr.bf16.mxu1 %v4666_v25  ;;  %v9888_v25 = vld [vmem:[#allocation13 + $0x128] ss:$16 sps:$4 sm:$0xff]  }
 0x5a0   : > { %v4547_v2 = vadd.f32 %v4546_v1, %v11193_v17  ;;  %v4548_v42 = vpop.f32.mrb[111].mxu1  ;;  %5643 = vmatmul.mubr.bf16.gmra.mrb[104].mxu0 %v4665_v34  ;;  %5869 = vmatmul.mubr.bf16.gmra.mrb[136].mxu1 %v4665_v34  ;;  %v4617_v52 = vmax.f32 %v4543_v22, 0.0  ;;  %v9885_v34 = vld [vmem:[#allocation13 + $0x120] ss:$16 sps:$4 sm:$0xff]   ;;  %v9896_v22 = vld [vmem:[#allocation13 + $0x14c] ss:$16 sps:$4 sm:$0xff]  }
 0x5a1   : > { %v4549_v43 = vadd.f32 %v4548_v42, %v11197_v3  ;;  %6824 = vmatpush1.bf16.msra.mxu0 %v9855_v10  ;;  %7050 = vmatpush1.bf16.msra.mxu1 %v9858_v53  ;;  %v4618_v18 = vmax.f32 %v4545_v0, 0.0  ;;  %v9893_v53 = vld [vmem:[#allocation13 + $0x144] ss:$16 sps:$4 sm:$0xff]   ;;  %v9894_v42 = vld [vmem:[#allocation13 + $0x148] ss:$16 sps:$4 sm:$0xff]  }
 0x5a2   : > { %v4621_v15 = vmax.f32 %v4547_v2, 0.0  ;;  %6825 = vmatprep.subr.bf16.mxu0 %v9863_v61  ;;  %7051 = vmatprep.subr.bf16.mxu1 %v9866_v63  ;;  %v9891_v2 = vld [vmem:[#allocation13 + $0x140] ss:$16 sps:$4 sm:$0xff]  }
 0x5a3   : > { %v4622_v19 = vmax.f32 %v4549_v43, 0.0 }
 0x5a4   : > { %v4669_v20 = vpack.c.bf16 %v4621_v15, %v4617_v52  ;;  %v9902_v52 = vld [vmem:[#allocation13 + $0x16c] ss:$16 sps:$4 sm:$0xff]  }
 0x5a5   : > { %v4670_v55 = vpack.c.bf16 %v4622_v19, %v4618_v18  ;;  %v4552_v56 = vpop.f32.mrb[112].mxu1  ;;  %6826 = vmatpush1.bf16.msra.mxu0 %v9861_v13  ;;  %7052 = vmatpush1.bf16.msra.mxu1 %v9864_v14  ;;  %v9899_v14 = vld [vmem:[#allocation13 + $0x164] ss:$16 sps:$4 sm:$0xff]  }
 0x5a6   : > { %v4553_v11 = vadd.f32 %v4552_v56, %v11193_v17  ;;  %v4554_v23 = vpop.f32.mrb[113].mxu1  ;;  %6827 = vmatprep.subr.bf16.mxu0 %v9869_v12  ;;  %7053 = vmatprep.subr.bf16.mxu1 %v9872_v16 }
 0x5a7   : > { %v4555_v27 = vadd.f32 %v4554_v23, %v11197_v3  ;;  %v4556_v30 = vpop.f32.mrb[114].mxu1  ;;  %5652 = vmatprep.mubr.bf16.mxu0 %v4670_v55  ;;  %5878 = vmatprep.mubr.bf16.mxu1 %v4670_v55  ;;  %v9900_v55 = vld [vmem:[#allocation13 + $0x168] ss:$16 sps:$4 sm:$0xff]  }
 0x5a8   : > { %v4557_v28 = vadd.f32 %v4556_v30, %v11193_v17  ;;  %v4558_v59 = vpop.f32.mrb[115].mxu1  ;;  %5653 = vmatmul.mubr.bf16.gmra.mrb[108].mxu0 %v4669_v20  ;;  %5879 = vmatmul.mubr.bf16.gmra.mrb[140].mxu1 %v4669_v20  ;;  %v4625_v26 = vmax.f32 %v4553_v11, 0.0  ;;  %v9897_v20 = vld [vmem:[#allocation13 + $0x160] ss:$16 sps:$4 sm:$0xff]   ;;  %v9908_v11 = vld [vmem:[#allocation13 + $0x18c] ss:$16 sps:$4 sm:$0xff]  }
 0x5a9   : > { %v4559_v57 = vadd.f32 %v4558_v59, %v11197_v3  ;;  %6828 = vmatpush1.bf16.msra.mxu0 %v9867_v21  ;;  %7054 = vmatpush1.bf16.msra.mxu1 %v9870_v45  ;;  %v4626_v9 = vmax.f32 %v4555_v27, 0.0  ;;  %v9905_v45 = vld [vmem:[#allocation13 + $0x184] ss:$16 sps:$4 sm:$0xff]   ;;  %v9906_v59 = vld [vmem:[#allocation13 + $0x188] ss:$16 sps:$4 sm:$0xff]  }
 0x5aa   : > { %v4629_v4 = vmax.f32 %v4557_v28, 0.0  ;;  %6829 = vmatprep.subr.bf16.mxu0 %v9875_v8  ;;  %7055 = vmatprep.subr.bf16.mxu1 %v9878_v5  ;;  %v9903_v28 = vld [vmem:[#allocation13 + $0x180] ss:$16 sps:$4 sm:$0xff]  }
 0x5ab   : > { %v4630_v47 = vmax.f32 %v4559_v57, 0.0 }
 0x5ac   : > { %v4673_v51 = vpack.c.bf16 %v4629_v4, %v4625_v26  ;;  %v9914_v26 = vld [vmem:[#allocation13 + $0x1ac] ss:$16 sps:$4 sm:$0xff]  }
 0x5ad   : > { %v4674_v32 = vpack.c.bf16 %v4630_v47, %v4626_v9  ;;  %v4562_v41 = vpop.f32.mrb[116].mxu1  ;;  %6830 = vmatpush1.bf16.msra.mxu0 %v9873_v7  ;;  %7056 = vmatpush1.bf16.msra.mxu1 %v9876_v60  ;;  %v9911_v60 = vld [vmem:[#allocation13 + $0x1a4] ss:$16 sps:$4 sm:$0xff]  }
 0x5ae   : > { %v4563_v62 = vadd.f32 %v4562_v41, %v11193_v17  ;;  %v4564_v58 = vpop.f32.mrb[117].mxu1  ;;  %6831 = vmatprep.subr.bf16.mxu0 %v9881_v44  ;;  %7057 = vmatprep.subr.bf16.mxu1 %v9884_v33 }
 0x5af   : > { %v4565_v31 = vadd.f32 %v4564_v58, %v11197_v3  ;;  %v4566_v24 = vpop.f32.mrb[118].mxu1  ;;  %5662 = vmatprep.mubr.bf16.mxu0 %v4674_v32  ;;  %5888 = vmatprep.mubr.bf16.mxu1 %v4674_v32  ;;  %v9912_v32 = vld [vmem:[#allocation13 + $0x1a8] ss:$16 sps:$4 sm:$0xff]  }
 0x5b0   : > { %v4567_v46 = vadd.f32 %v4566_v24, %v11193_v17  ;;  %v4568_v38 = vpop.f32.mrb[119].mxu1  ;;  %5663 = vmatmul.mubr.bf16.gmra.mrb[112].mxu0 %v4673_v51  ;;  %5889 = vmatmul.mubr.bf16.gmra.mrb[144].mxu1 %v4673_v51  ;;  %v4633_v49 = vmax.f32 %v4563_v62, 0.0  ;;  %v9909_v51 = vld [vmem:[#allocation13 + $0x1a0] ss:$16 sps:$4 sm:$0xff]   ;;  %v9923_v24 = vld [vmem:[#allocation13 + $0x1e4] ss:$16 sps:$4 sm:$0xff]  }
 0x5b1   : > { %v4569_v48 = vadd.f32 %v4568_v38, %v11197_v3  ;;  %6832 = vmatpush1.bf16.msra.mxu0 %v9879_v6  ;;  %7058 = vmatpush1.bf16.msra.mxu1 %v9882_v35  ;;  %v4634_v54 = vmax.f32 %v4565_v31, 0.0  ;;  %v9918_v31 = vld [vmem:[#allocation13 + $0x1c8] ss:$16 sps:$4 sm:$0xff]   ;;  %v9921_v38 = vld [vmem:[#allocation13 + $0x1e0] ss:$16 sps:$4 sm:$0xff]  }
 0x5b2   : > { %v4637_v10 = vmax.f32 %v4567_v46, 0.0  ;;  %6833 = vmatprep.subr.bf16.mxu0 %v9887_v29  ;;  %7059 = vmatprep.subr.bf16.mxu1 %v9890_v50  ;;  %v9915_v50 = vld [vmem:[#allocation13 + $0x1c0] ss:$16 sps:$4 sm:$0xff]   ;;  %v9926_v46 = vld [vmem:[#allocation13 + $0x1ec] ss:$16 sps:$4 sm:$0xff]  }
 0x5b3   : > { %v4638_v61 = vmax.f32 %v4569_v48, 0.0  ;;  %v9924_v48 = vld [vmem:[#allocation13 + $0x1e8] ss:$16 sps:$4 sm:$0xff]  }
 0x5b4   : > { %v4677_v63 = vpack.c.bf16 %v4637_v10, %v4633_v49  ;;  %v4815_v49 = vld [vmem:[%s11946_s15] sm:$0xf]  ;;  %s10257_s15 = sshll.u32 %s10346_s22, 4  ;;  %s10258_s15 = int_to_ptr.vmem [resolvable:$false] %s10257_s15 }
 0x5b5   : > { %v4678_v0 = vpack.c.bf16 %v4638_v61, %v4634_v54  ;;  %v4572_v1 = vpop.f32.mrb[120].mxu1  ;;  %6834 = vmatpush1.bf16.msra.mxu0 %v9885_v34  ;;  %7060 = vmatpush1.bf16.msra.mxu1 %v9888_v25  ;;  %v9929_v34 = vld [vmem:[#allocation13 + $0x204] ss:$16 sps:$4 sm:$0xff]   ;;  %v9932_v25 = vld [vmem:[#allocation13 + $0x20c] ss:$16 sps:$4 sm:$0xff]   ;;  %v11235_v10 = vrot.slane %v4815_v49, %v10772_v36  ;;  %v11244_v54 = vrot.slane %v4815_v49, %v10781_v40  ;;  %s10259_s13 = scalar_lea.vmem %s10258_s15, 16384  ;;  %p10260_p11 = scmp.lt.s32.totalorder %s11828_s20, %s10258_s15 }
 0x5b6   : > { %v4573_v43 = vadd.f32 %v4572_v1, %v11193_v17  ;;  %v4574_v13 = vpop.f32.mrb[121].mxu1  ;;  %6835 = vmatprep.subr.bf16.mxu0 %v9893_v53  ;;  %7061 = vmatprep.subr.bf16.mxu1 %v9896_v22  ;;  %v11238_v53 = vrot.slane %v4815_v49, %v10774_v37  ;;  %v11241_v22 = vrot.slane %v4815_v49, %v10779_v39  ;;  %v9944_v49 = vld [vmem:[#allocation13 + $0x24c] ss:$16 sps:$4 sm:$0xff]   ;;  %p10261_p12 = scmp.lt.s32.totalorder %s10259_s13, %s10253_s17 }
 0x5b7   : > { %v4575_v15 = vadd.f32 %v4574_v13, %v11197_v3  ;;  %v4576_v12 = vpop.f32.mrb[122].mxu1  ;;  %5672 = vmatprep.mubr.bf16.mxu0 %v4678_v0  ;;  %5898 = vmatprep.mubr.bf16.mxu1 %v4678_v0 }
 0x5b8   : > { %v4577_v16 = vadd.f32 %v4576_v12, %v11193_v17  ;;  %v4578_v18 = vpop.f32.mrb[123].mxu1  ;;  %5673 = vmatmul.mubr.bf16.gmra.mrb[116].mxu0 %v4677_v63  ;;  %5899 = vmatmul.mubr.bf16.gmra.mrb[148].mxu1 %v4677_v63  ;;  %v4641_v56 = vmax.f32 %v4573_v43, 0.0  ;;  %p10262_p13 = por %p10261_p12, %p10260_p11 }
 0x5b9   : > { %v4579_v19 = vadd.f32 %v4578_v18, %v11197_v3  ;;  %6836 = vmatpush1.bf16.msra.mxu0 %v9891_v2  ;;  %7062 = vmatpush1.bf16.msra.mxu1 %v9894_v42  ;;  %v4642_v23 = vmax.f32 %v4575_v15, 0.0 }
 0x5ba   : > { %v4645_v21 = vmax.f32 %v4577_v16, 0.0  ;;  %6837 = vmatprep.subr.bf16.mxu0 %v9899_v14  ;;  %7063 = vmatprep.subr.bf16.mxu1 %v9902_v52  ;;  %p10263_p7 = pnand %p10262_p13, %p10256_p1 }
 0x5bb   : > { %v4646_v8 = vmax.f32 %v4579_v19, 0.0 }
 0x5bc   : > { %v4681_v5 = vpack.c.bf16 %v4645_v21, %v4641_v56 }
 0x5bd   : > { %v4682_v27 = vpack.c.bf16 %v4646_v8, %v4642_v23  ;;  %v4582_v30 = vpop.f32.mrb[124].mxu1  ;;  %6838 = vmatpush1.bf16.msra.mxu0 %v9897_v20  ;;  %7064 = vmatpush1.bf16.msra.mxu1 %v9900_v55 }
 0x5be   : > { %v4583_v57 = vadd.f32 %v4582_v30, %v11193_v17  ;;  %v4584_v7 = vpop.f32.mrb[125].mxu1  ;;  %6839 = vmatprep.subr.bf16.mxu0 %v9905_v45  ;;  %7065 = vmatprep.subr.bf16.mxu1 %v9908_v11 }
 0x5bf   : > { %v4585_v4 = vadd.f32 %v4584_v7, %v11197_v3  ;;  %v4586_v44 = vpop.f32.mrb[126].mxu1  ;;  %5682 = vmatprep.mubr.bf16.mxu0 %v4682_v27  ;;  %5908 = vmatprep.mubr.bf16.mxu1 %v4682_v27 }
 0x5c0   : > { %v4587_v33 = vadd.f32 %v4586_v44, %v11193_v17  ;;  %v4588_v9 = vpop.f32.mrb[127].mxu1  ;;  %5683 = vmatmul.mubr.bf16.gmra.mrb[120].mxu0 %v4681_v5  ;;  %5909 = vmatmul.mubr.bf16.gmra.mrb[152].mxu1 %v4681_v5  ;;  %v4649_v41 = vmax.f32 %v4583_v57, 0.0  ;;  %v9917_v17 = vld [vmem:[#allocation13 + $0x1c4] ss:$16 sps:$4 sm:$0xff]  }
 0x5c1   : > { %v4589_v47 = vadd.f32 %v4588_v9, %v11197_v3  ;;  %6840 = vmatpush1.bf16.msra.mxu0 %v9903_v28  ;;  %7066 = vmatpush1.bf16.msra.mxu1 %v9906_v59  ;;  %v4650_v35 = vmax.f32 %v4585_v4, 0.0  ;;  %v9920_v3 = vld [vmem:[#allocation13 + $0x1cc] ss:$16 sps:$4 sm:$0xff]  }
 0x5c2   : > { %v4653_v6 = vmax.f32 %v4587_v33, 0.0  ;;  %6841 = vmatprep.subr.bf16.mxu0 %v9911_v60  ;;  %7067 = vmatprep.subr.bf16.mxu1 %v9914_v26  ;;  %v9927_v60 = vld [vmem:[#allocation13 + $0x200] ss:$16 sps:$4 sm:$0xff]   ;;  %v9930_v26 = vld [vmem:[#allocation13 + $0x208] ss:$16 sps:$4 sm:$0xff]  }
 0x5c3   : > { %v4654_v62 = vmax.f32 %v4589_v47, 0.0  ;;  %v9935_v47 = vld [vmem:[#allocation13 + $0x224] ss:$16 sps:$4 sm:$0xff]  }
 0x5c4   : > { %v4685_v58 = vpack.c.bf16 %v4653_v6, %v4649_v41 }
 0x5c5   : > { %v4686_v29 = vpack.c.bf16 %v4654_v62, %v4650_v35  ;;  %6842 = vmatpush1.bf16.msra.mxu0 %v9909_v51  ;;  %7068 = vmatpush1.bf16.msra.mxu1 %v9912_v32  ;;  %v9938_v51 = vld [vmem:[#allocation13 + $0x22c] ss:$16 sps:$4 sm:$0xff]  }
 0x5c6   : > { %6843 = vmatprep.subr.bf16.mxu0 %v9917_v17  ;;  %7069 = vmatprep.subr.bf16.mxu1 %v9920_v3 }
 0x5c7   : > { %5692 = vmatprep.mubr.bf16.mxu0 %v4686_v29  ;;  %5918 = vmatprep.mubr.bf16.mxu1 %v4686_v29 }
 0x5c8   : > { %5693 = vmatmul.mubr.bf16.gmra.mrb[124].mxu0 %v4685_v58  ;;  %5919 = vmatmul.mubr.bf16.gmra.mrb[156].mxu1 %v4685_v58 }
 0x5c9   : > { %6844 = vmatpush1.bf16.msra.mxu0 %v9915_v50  ;;  %7070 = vmatpush1.bf16.msra.mxu1 %v9918_v31  ;;  %v9933_v31 = vld [vmem:[#allocation13 + $0x220] ss:$16 sps:$4 sm:$0xff]  }
 0x5ca   : > { %6845 = vmatprep.subr.bf16.mxu0 %v9923_v24  ;;  %7071 = vmatprep.subr.bf16.mxu1 %v9926_v46  ;;  %v9936_v24 = vld [vmem:[#allocation13 + $0x228] ss:$16 sps:$4 sm:$0xff]   ;;  %v9941_v46 = vld [vmem:[#allocation13 + $0x244] ss:$16 sps:$4 sm:$0xff]  }
 0x5cd   : > { %6846 = vmatpush1.bf16.msra.mxu0 %v9921_v38  ;;  %7072 = vmatpush1.bf16.msra.mxu1 %v9924_v48 }
 0x5ce   : > { %6928 = vmatprep.subr.bf16.mxu0 %v9929_v34  ;;  %7154 = vmatprep.subr.bf16.mxu1 %v9932_v25 }
 0x663   : > { %v5624_v61 = vpop.f32.mrb[96].mxu0  ;;  %v5850_v63 = vpop.f32.mrb[128].mxu1 }
 0x664   : > { %v8532_v0 = vadd.f32 %v5624_v61, %v11235_v10  ;;  %v8564_v1 = vadd.f32 %v5850_v63, %v11238_v53  ;;  %v5626_v2 = vpop.f32.mrb[97].mxu0  ;;  %v5852_v42 = vpop.f32.mrb[129].mxu1 }
 0x665   : > { %v8533_v43 = vadd.f32 %v5626_v2, %v11241_v22  ;;  %v8565_v13 = vadd.f32 %v5852_v42, %v11244_v54  ;;  %v5628_v14 = vpop.f32.mrb[98].mxu0  ;;  %v5854_v52 = vpop.f32.mrb[130].mxu1 }
 0x666   : > { %v8534_v15 = vadd.f32 %v5628_v14, %v11235_v10  ;;  %v8566_v12 = vadd.f32 %v5854_v52, %v11238_v53  ;;  %v5630_v16 = vpop.f32.mrb[99].mxu0  ;;  %v5856_v18 = vpop.f32.mrb[131].mxu1  ;;  %v5929_v55 = vmax.f32 %v8532_v0, 0.0  ;;  %v5931_v56 = vmax.f32 %v8564_v1, 0.0 }
 0x667   : > { %v8535_v19 = vadd.f32 %v5630_v16, %v11241_v22  ;;  %v8567_v20 = vadd.f32 %v5856_v18, %v11244_v54  ;;  %v5930_v11 = vmax.f32 %v8533_v43, 0.0  ;;  %v5932_v23 = vmax.f32 %v8565_v13, 0.0 }
 0x668   : > { %v5933_v21 = vmax.f32 %v8534_v15, 0.0  ;;  %v5935_v45 = vmax.f32 %v8566_v12, 0.0  ;;  %v9939_v15 = vld [vmem:[#allocation13 + $0x240] ss:$16 sps:$4 sm:$0xff]   ;;  %v9942_v12 = vld [vmem:[#allocation13 + $0x248] ss:$16 sps:$4 sm:$0xff]  }
 0x669   : > { %v5934_v8 = vmax.f32 %v8535_v19, 0.0  ;;  %v5936_v5 = vmax.f32 %v8567_v20, 0.0 }
 0x66a   : > { %v5993_v27 = vpack.c.bf16 %v5933_v21, %v5929_v55  ;;  %v11254_v30 = vpack.c.bf16 %v5935_v45, %v5931_v56  ;;  %v9947_v55 = vld [vmem:[#allocation13 + $0x264] ss:$16 sps:$4 sm:$0xff]   ;;  %v9950_v56 = vld [vmem:[#allocation13 + $0x26c] ss:$16 sps:$4 sm:$0xff]  }
 0x66b   : > { %v5994_v28 = vpack.c.bf16 %v5934_v8, %v5930_v11  ;;  %v11256_v59 = vpack.c.bf16 %v5936_v5, %v5932_v23  ;;  %v5634_v57 = vpop.f32.mrb[100].mxu0  ;;  %v5860_v7 = vpop.f32.mrb[132].mxu1 }
 0x66c   : > { %v8536_v4 = vadd.f32 %v5634_v57, %v11235_v10  ;;  %v8568_v44 = vadd.f32 %v5860_v7, %v11238_v53  ;;  %v5636_v33 = vpop.f32.mrb[101].mxu0  ;;  %v5862_v9 = vpop.f32.mrb[133].mxu1 }
 0x66d   : > { %v8537_v32 = vadd.f32 %v5636_v33, %v11241_v22  ;;  %v8569_v41 = vadd.f32 %v5862_v9, %v11244_v54  ;;  %v5638_v6 = vpop.f32.mrb[102].mxu0  ;;  %v5864_v35 = vpop.f32.mrb[134].mxu1  ;;  %6847 = vmatprep.mubr.bf16.mxu0 %v5994_v28  ;;  %7073 = vmatprep.mubr.bf16.mxu1 %v5994_v28 }
 0x66e   : > { %v8538_v62 = vadd.f32 %v5638_v6, %v11235_v10  ;;  %v8570_v58 = vadd.f32 %v5864_v35, %v11238_v53  ;;  %v5640_v29 = vpop.f32.mrb[103].mxu0  ;;  %v5866_v17 = vpop.f32.mrb[135].mxu1  ;;  %6848 = vmatmul.mubr.bf16.vlgmr.msra.gmra.mrb[128].mxu0 %v5993_v27  ;;  %7074 = vmatmul.mubr.bf16.vlgmr.msra.gmra.mrb[160].mxu1 %v5993_v27  ;;  %v5937_v38 = vmax.f32 %v8536_v4, 0.0  ;;  %v5939_v48 = vmax.f32 %v8568_v44, 0.0  ;;  %v9953_v4 = vld [vmem:[#allocation13 + $0x284] ss:$16 sps:$4 sm:$0xff]  }
 0x66f   : > { %v8539_v3 = vadd.f32 %v5640_v29, %v11241_v22  ;;  %v8571_v50 = vadd.f32 %v5866_v17, %v11244_v54  ;;  %6929 = vmatpush1.bf16.msra.mxu0 %v9927_v60  ;;  %7155 = vmatpush1.bf16.msra.mxu1 %v9930_v26  ;;  %v5938_v61 = vmax.f32 %v8537_v32, 0.0  ;;  %v5940_v63 = vmax.f32 %v8569_v41, 0.0  ;;  %v9945_v60 = vld [vmem:[#allocation13 + $0x260] ss:$16 sps:$4 sm:$0xff]   ;;  %v9948_v26 = vld [vmem:[#allocation13 + $0x268] ss:$16 sps:$4 sm:$0xff]  }
 0x670   : > { %v5941_v34 = vmax.f32 %v8538_v62, 0.0  ;;  %v5943_v25 = vmax.f32 %v8570_v58, 0.0  ;;  %6930 = vmatprep.subr.bf16.mxu0 %v9935_v47  ;;  %7156 = vmatprep.subr.bf16.mxu1 %v9938_v51  ;;  %v9956_v51 = vld [vmem:[#allocation13 + $0x28c] ss:$16 sps:$4 sm:$0xff]  }
 0x671   : > { %v5942_v0 = vmax.f32 %v8539_v3, 0.0  ;;  %v5944_v1 = vmax.f32 %v8571_v50, 0.0 }
 0x672   : > { %v5997_v2 = vpack.c.bf16 %v5941_v34, %v5937_v38  ;;  %v11266_v42 = vpack.c.bf16 %v5943_v25, %v5939_v48  ;;  %v9959_v25 = vld [vmem:[#allocation13 + $0x2a4] ss:$16 sps:$4 sm:$0xff]  }
 0x673   : > { %v5998_v43 = vpack.c.bf16 %v5942_v0, %v5938_v61  ;;  %v11268_v13 = vpack.c.bf16 %v5944_v1, %v5940_v63  ;;  %v5644_v14 = vpop.f32.mrb[104].mxu0  ;;  %v5870_v52 = vpop.f32.mrb[136].mxu1  ;;  %6931 = vmatpush1.bf16.msra.mxu0 %v9933_v31  ;;  %7157 = vmatpush1.bf16.msra.mxu1 %v9936_v24  ;;  %v9951_v31 = vld [vmem:[#allocation13 + $0x280] ss:$16 sps:$4 sm:$0xff]   ;;  %v9954_v24 = vld [vmem:[#allocation13 + $0x288] ss:$16 sps:$4 sm:$0xff]  }
 0x674   : > { %v8540_v16 = vadd.f32 %v5644_v14, %v11235_v10  ;;  %v8572_v18 = vadd.f32 %v5870_v52, %v11238_v53  ;;  %v5646_v19 = vpop.f32.mrb[105].mxu0  ;;  %v5872_v20 = vpop.f32.mrb[137].mxu1  ;;  %6932 = vmatprep.subr.bf16.mxu0 %v9941_v46  ;;  %7158 = vmatprep.subr.bf16.mxu1 %v9944_v49  ;;  %v9962_v49 = vld [vmem:[#allocation13 + $0x2ac] ss:$16 sps:$4 sm:$0xff]  }
 0x675   : > { %v8541_v21 = vadd.f32 %v5646_v19, %v11241_v22  ;;  %v8573_v45 = vadd.f32 %v5872_v20, %v11244_v54  ;;  %v5648_v11 = vpop.f32.mrb[106].mxu0  ;;  %v5874_v23 = vpop.f32.mrb[138].mxu1  ;;  %6857 = vmatprep.mubr.bf16.mxu0 %v5998_v43  ;;  %7083 = vmatprep.mubr.bf16.mxu1 %v5998_v43  ;;  %v9965_v19 = vld [vmem:[#allocation13 + $0x2c4] ss:$16 sps:$4 sm:$0xff]  }
 0x676   : > { %v8542_v8 = vadd.f32 %v5648_v11, %v11235_v10  ;;  %v8574_v5 = vadd.f32 %v5874_v23, %v11238_v53  ;;  %v5650_v27 = vpop.f32.mrb[107].mxu0  ;;  %v5876_v28 = vpop.f32.mrb[139].mxu1  ;;  %6858 = vmatmul.mubr.bf16.gmra.mrb[132].mxu0 %v5997_v2  ;;  %7084 = vmatmul.mubr.bf16.gmra.mrb[164].mxu1 %v5997_v2  ;;  %v5945_v44 = vmax.f32 %v8540_v16, 0.0  ;;  %v5947_v33 = vmax.f32 %v8572_v18, 0.0  ;;  %v9957_v16 = vld [vmem:[#allocation13 + $0x2a0] ss:$16 sps:$4 sm:$0xff]  }
 0x677   : > { %v8543_v57 = vadd.f32 %v5650_v27, %v11241_v22  ;;  %v8575_v7 = vadd.f32 %v5876_v28, %v11244_v54  ;;  %6933 = vmatpush1.bf16.msra.mxu0 %v9939_v15  ;;  %7159 = vmatpush1.bf16.msra.mxu1 %v9942_v12  ;;  %v5946_v32 = vmax.f32 %v8541_v21, 0.0  ;;  %v5948_v41 = vmax.f32 %v8573_v45, 0.0  ;;  %v9960_v18 = vld [vmem:[#allocation13 + $0x2a8] ss:$16 sps:$4 sm:$0xff]   ;;  %v9968_v45 = vld [vmem:[#allocation13 + $0x2cc] ss:$16 sps:$4 sm:$0xff]  }
 0x678   : > { %v5949_v9 = vmax.f32 %v8542_v8, 0.0  ;;  %v5951_v47 = vmax.f32 %v8574_v5, 0.0  ;;  %6934 = vmatprep.subr.bf16.mxu0 %v9947_v55  ;;  %7160 = vmatprep.subr.bf16.mxu1 %v9950_v56 }
 0x679   : > { %v5950_v6 = vmax.f32 %v8543_v57, 0.0  ;;  %v5952_v35 = vmax.f32 %v8575_v7, 0.0 }
 0x67a   : > { %v6001_v62 = vpack.c.bf16 %v5949_v9, %v5945_v44  ;;  %v11278_v58 = vpack.c.bf16 %v5951_v47, %v5947_v33  ;;  %v9966_v44 = vld [vmem:[#allocation13 + $0x2c8] ss:$16 sps:$4 sm:$0xff]  }
 0x67b   : > { %v6002_v29 = vpack.c.bf16 %v5950_v6, %v5946_v32  ;;  %v11280_v17 = vpack.c.bf16 %v5952_v35, %v5948_v41  ;;  %v5654_v3 = vpop.f32.mrb[108].mxu0  ;;  %v5880_v50 = vpop.f32.mrb[140].mxu1  ;;  %6935 = vmatpush1.bf16.msra.mxu0 %v9945_v60  ;;  %7161 = vmatpush1.bf16.msra.mxu1 %v9948_v26  ;;  %v9971_v32 = vld [vmem:[#allocation13 + $0x2e4] ss:$16 sps:$4 sm:$0xff]   ;;  %v9974_v41 = vld [vmem:[#allocation13 + $0x2ec] ss:$16 sps:$4 sm:$0xff]  }
 0x67c   : > { %v8544_v46 = vadd.f32 %v5654_v3, %v11235_v10  ;;  %v8576_v38 = vadd.f32 %v5880_v50, %v11238_v53  ;;  %v5656_v48 = vpop.f32.mrb[109].mxu0  ;;  %v5882_v34 = vpop.f32.mrb[141].mxu1  ;;  %6936 = vmatprep.subr.bf16.mxu0 %v9953_v4  ;;  %7162 = vmatprep.subr.bf16.mxu1 %v9956_v51  ;;  %v9963_v4 = vld [vmem:[#allocation13 + $0x2c0] ss:$16 sps:$4 sm:$0xff]  }
 0x67d   : > { %v8545_v61 = vadd.f32 %v5656_v48, %v11241_v22  ;;  %v8577_v63 = vadd.f32 %v5882_v34, %v11244_v54  ;;  %v5658_v0 = vpop.f32.mrb[110].mxu0  ;;  %v5884_v1 = vpop.f32.mrb[142].mxu1  ;;  %6867 = vmatprep.mubr.bf16.mxu0 %v6002_v29  ;;  %7093 = vmatprep.mubr.bf16.mxu1 %v6002_v29  ;;  %v9969_v48 = vld [vmem:[#allocation13 + $0x2e0] ss:$16 sps:$4 sm:$0xff]   ;;  %v9972_v34 = vld [vmem:[#allocation13 + $0x2e8] ss:$16 sps:$4 sm:$0xff]  }
 0x67e   : > { %v8546_v2 = vadd.f32 %v5658_v0, %v11235_v10  ;;  %v8578_v43 = vadd.f32 %v5884_v1, %v11238_v53  ;;  %v5660_v14 = vpop.f32.mrb[111].mxu0  ;;  %v5886_v52 = vpop.f32.mrb[143].mxu1  ;;  %6868 = vmatmul.mubr.bf16.gmra.mrb[136].mxu0 %v6001_v62  ;;  %7094 = vmatmul.mubr.bf16.gmra.mrb[168].mxu1 %v6001_v62  ;;  %v5953_v20 = vmax.f32 %v8544_v46, 0.0  ;;  %v5955_v55 = vmax.f32 %v8576_v38, 0.0  ;;  %v9980_v1 = vld [vmem:[#allocation13 + $0x30c] ss:$16 sps:$4 sm:$0xff]  }
 0x67f   : > { %v8547_v15 = vadd.f32 %v5660_v14, %v11241_v22  ;;  %v8579_v12 = vadd.f32 %v5886_v52, %v11244_v54  ;;  %6937 = vmatpush1.bf16.msra.mxu0 %v9951_v31  ;;  %7163 = vmatpush1.bf16.msra.mxu1 %v9954_v24  ;;  %v5954_v11 = vmax.f32 %v8545_v61, 0.0  ;;  %v5956_v23 = vmax.f32 %v8577_v63, 0.0 }
 0x680   : > { %v5957_v56 = vmax.f32 %v8546_v2, 0.0  ;;  %v5959_v21 = vmax.f32 %v8578_v43, 0.0  ;;  %6938 = vmatprep.subr.bf16.mxu0 %v9959_v25  ;;  %7164 = vmatprep.subr.bf16.mxu1 %v9962_v49  ;;  %v9977_v25 = vld [vmem:[#allocation13 + $0x304] ss:$16 sps:$4 sm:$0xff]  }
 0x681   : > { %v5958_v8 = vmax.f32 %v8547_v15, 0.0  ;;  %v5960_v5 = vmax.f32 %v8579_v12, 0.0 }
 0x682   : > { %v6005_v27 = vpack.c.bf16 %v5957_v56, %v5953_v20  ;;  %v11290_v28 = vpack.c.bf16 %v5959_v21, %v5955_v55  ;;  %v9975_v55 = vld [vmem:[#allocation13 + $0x300] ss:$16 sps:$4 sm:$0xff]   ;;  %v9978_v56 = vld [vmem:[#allocation13 + $0x308] ss:$16 sps:$4 sm:$0xff]  }
 0x683   : > { %v6006_v57 = vpack.c.bf16 %v5958_v8, %v5954_v11  ;;  %v11292_v7 = vpack.c.bf16 %v5960_v5, %v5956_v23  ;;  %v5664_v60 = vpop.f32.mrb[112].mxu0  ;;  %v5890_v26 = vpop.f32.mrb[144].mxu1  ;;  %6939 = vmatpush1.bf16.msra.mxu0 %v9957_v16  ;;  %7165 = vmatpush1.bf16.msra.mxu1 %v9960_v18  ;;  %v9983_v8 = vld [vmem:[#allocation13 + $0x324] ss:$16 sps:$4 sm:$0xff]   ;;  %v9986_v5 = vld [vmem:[#allocation13 + $0x32c] ss:$16 sps:$4 sm:$0xff]  }
 0x684   : > { %v8548_v33 = vadd.f32 %v5664_v60, %v11235_v10  ;;  %v8580_v9 = vadd.f32 %v5890_v26, %v11238_v53  ;;  %v5666_v47 = vpop.f32.mrb[113].mxu0  ;;  %v5892_v51 = vpop.f32.mrb[145].mxu1  ;;  %6940 = vmatprep.subr.bf16.mxu0 %v9965_v19  ;;  %7166 = vmatprep.subr.bf16.mxu1 %v9968_v45 }
 0x685   : > { %v8549_v6 = vadd.f32 %v5666_v47, %v11241_v22  ;;  %v8581_v35 = vadd.f32 %v5892_v51, %v11244_v54  ;;  %v5668_v62 = vpop.f32.mrb[114].mxu0  ;;  %v5894_v29 = vpop.f32.mrb[146].mxu1  ;;  %6877 = vmatprep.mubr.bf16.mxu0 %v6006_v57  ;;  %7103 = vmatprep.mubr.bf16.mxu1 %v6006_v57 }
 0x686   : > { %v8550_v3 = vadd.f32 %v5668_v62, %v11235_v10  ;;  %v8582_v50 = vadd.f32 %v5894_v29, %v11238_v53  ;;  %v5670_v31 = vpop.f32.mrb[115].mxu0  ;;  %v5896_v24 = vpop.f32.mrb[147].mxu1  ;;  %6878 = vmatmul.mubr.bf16.gmra.mrb[140].mxu0 %v6005_v27  ;;  %7104 = vmatmul.mubr.bf16.gmra.mrb[172].mxu1 %v6005_v27  ;;  %v5961_v49 = vmax.f32 %v8548_v33, 0.0  ;;  %v5963_v61 = vmax.f32 %v8580_v9, 0.0 }
 0x687   : > { %v8551_v46 = vadd.f32 %v5670_v31, %v11241_v22  ;;  %v8583_v38 = vadd.f32 %v5896_v24, %v11244_v54  ;;  %6941 = vmatpush1.bf16.msra.mxu0 %v9963_v4  ;;  %7167 = vmatpush1.bf16.msra.mxu1 %v9966_v44  ;;  %v5962_v2 = vmax.f32 %v8549_v6, 0.0  ;;  %v5964_v43 = vmax.f32 %v8581_v35, 0.0  ;;  %v9989_v6 = vld [vmem:[#allocation13 + $0x344] ss:$16 sps:$4 sm:$0xff]  }
 0x688   : > { %v5965_v63 = vmax.f32 %v8550_v3, 0.0  ;;  %v5967_v0 = vmax.f32 %v8582_v50, 0.0  ;;  %6942 = vmatprep.subr.bf16.mxu0 %v9971_v32  ;;  %7168 = vmatprep.subr.bf16.mxu1 %v9974_v41  ;;  %v9981_v32 = vld [vmem:[#allocation13 + $0x320] ss:$16 sps:$4 sm:$0xff]   ;;  %v9984_v41 = vld [vmem:[#allocation13 + $0x328] ss:$16 sps:$4 sm:$0xff]  }
 0x689   : > { %v5966_v14 = vmax.f32 %v8551_v46, 0.0  ;;  %v5968_v52 = vmax.f32 %v8583_v38, 0.0  ;;  %v9992_v50 = vld [vmem:[#allocation13 + $0x34c] ss:$16 sps:$4 sm:$0xff]  }
 0x68a   : > { %v6009_v15 = vpack.c.bf16 %v5965_v63, %v5961_v49  ;;  %v11302_v12 = vpack.c.bf16 %v5967_v0, %v5963_v61  ;;  %v9987_v0 = vld [vmem:[#allocation13 + $0x340] ss:$16 sps:$4 sm:$0xff]  }
 0x68b   : > { %v6010_v16 = vpack.c.bf16 %v5966_v14, %v5962_v2  ;;  %v11304_v18 = vpack.c.bf16 %v5968_v52, %v5964_v43  ;;  %v5674_v19 = vpop.f32.mrb[116].mxu0  ;;  %v5900_v20 = vpop.f32.mrb[148].mxu1  ;;  %6943 = vmatpush1.bf16.msra.mxu0 %v9969_v48  ;;  %7169 = vmatpush1.bf16.msra.mxu1 %v9972_v34 }
 0x68c   : > { %v8552_v21 = vadd.f32 %v5674_v19, %v11235_v10  ;;  %v8584_v45 = vadd.f32 %v5900_v20, %v11238_v53  ;;  %v5676_v11 = vpop.f32.mrb[117].mxu0  ;;  %v5902_v23 = vpop.f32.mrb[149].mxu1  ;;  %6944 = vmatprep.subr.bf16.mxu0 %v9977_v25  ;;  %7170 = vmatprep.subr.bf16.mxu1 %v9980_v1  ;;  %v9990_v1 = vld [vmem:[#allocation13 + $0x348] ss:$16 sps:$4 sm:$0xff]  }
 0x68d   : > { %v8553_v27 = vadd.f32 %v5676_v11, %v11241_v22  ;;  %v8585_v57 = vadd.f32 %v5902_v23, %v11244_v54  ;;  %v5678_v60 = vpop.f32.mrb[118].mxu0  ;;  %v5904_v26 = vpop.f32.mrb[150].mxu1  ;;  %6887 = vmatprep.mubr.bf16.mxu0 %v6010_v16  ;;  %7113 = vmatprep.mubr.bf16.mxu1 %v6010_v16  ;;  %v9998_v16 = vld [vmem:[#allocation13 + $0x36c] ss:$16 sps:$4 sm:$0xff]  }
 0x68e   : > { %v8554_v4 = vadd.f32 %v5678_v60, %v11235_v10  ;;  %v8586_v44 = vadd.f32 %v5904_v26, %v11238_v53  ;;  %v5680_v33 = vpop.f32.mrb[119].mxu0  ;;  %v5906_v9 = vpop.f32.mrb[151].mxu1  ;;  %6888 = vmatmul.mubr.bf16.gmra.mrb[144].mxu0 %v6009_v15  ;;  %7114 = vmatmul.mubr.bf16.gmra.mrb[176].mxu1 %v6009_v15  ;;  %v5969_v35 = vmax.f32 %v8552_v21, 0.0  ;;  %v5971_v62 = vmax.f32 %v8584_v45, 0.0  ;;  %v9995_v15 = vld [vmem:[#allocation13 + $0x364] ss:$16 sps:$4 sm:$0xff]  }
 0x68f   : > { %v8555_v47 = vadd.f32 %v5680_v33, %v11241_v22  ;;  %v8587_v51 = vadd.f32 %v5906_v9, %v11244_v54  ;;  %6945 = vmatpush1.bf16.msra.mxu0 %v9975_v55  ;;  %7171 = vmatpush1.bf16.msra.mxu1 %v9978_v56  ;;  %v5970_v31 = vmax.f32 %v8553_v27, 0.0  ;;  %v5972_v24 = vmax.f32 %v8585_v57, 0.0  ;;  %v9993_v27 = vld [vmem:[#allocation13 + $0x360] ss:$16 sps:$4 sm:$0xff]   ;;  %v9996_v57 = vld [vmem:[#allocation13 + $0x368] ss:$16 sps:$4 sm:$0xff]  }
 0x690   : > { %v5973_v29 = vmax.f32 %v8554_v4, 0.0  ;;  %v5975_v3 = vmax.f32 %v8586_v44, 0.0  ;;  %6946 = vmatprep.subr.bf16.mxu0 %v9983_v8  ;;  %7172 = vmatprep.subr.bf16.mxu1 %v9986_v5  ;;  %v10001_v60 = vld [vmem:[#allocation13 + $0x384] ss:$16 sps:$4 sm:$0xff]   ;;  %v10004_v9 = vld [vmem:[#allocation13 + $0x38c] ss:$16 sps:$4 sm:$0xff]  }
 0x691   : > { %v5974_v46 = vmax.f32 %v8555_v47, 0.0  ;;  %v5976_v38 = vmax.f32 %v8587_v51, 0.0 }
 0x692   : > { %v6013_v48 = vpack.c.bf16 %v5973_v29, %v5969_v35  ;;  %v11314_v34 = vpack.c.bf16 %v5975_v3, %v5971_v62 }
 0x693   : > { %v6014_v25 = vpack.c.bf16 %v5974_v46, %v5970_v31  ;;  %v11316_v49 = vpack.c.bf16 %v5976_v38, %v5972_v24  ;;  %v5684_v61 = vpop.f32.mrb[120].mxu0  ;;  %v5910_v63 = vpop.f32.mrb[152].mxu1  ;;  %6947 = vmatpush1.bf16.msra.mxu0 %v9981_v32  ;;  %7173 = vmatpush1.bf16.msra.mxu1 %v9984_v41  ;;  %v9999_v31 = vld [vmem:[#allocation13 + $0x380] ss:$16 sps:$4 sm:$0xff]   ;;  %v10002_v24 = vld [vmem:[#allocation13 + $0x388] ss:$16 sps:$4 sm:$0xff]  }
 0x694   : > { %v8556_v2 = vadd.f32 %v5684_v61, %v11235_v10  ;;  %v8588_v43 = vadd.f32 %v5910_v63, %v11238_v53  ;;  %v5686_v14 = vpop.f32.mrb[121].mxu0  ;;  %v5912_v52 = vpop.f32.mrb[153].mxu1  ;;  %6948 = vmatprep.subr.bf16.mxu0 %v9989_v6  ;;  %7174 = vmatprep.subr.bf16.mxu1 %v9992_v50  ;;  %v10007_v61 = vld [vmem:[#allocation13 + $0x3a4] ss:$16 sps:$4 sm:$0xff]   ;;  %v10010_v63 = vld [vmem:[#allocation13 + $0x3ac] ss:$16 sps:$4 sm:$0xff]  }
 0x695   : > { %v8557_v19 = vadd.f32 %v5686_v14, %v11241_v22  ;;  %v8589_v20 = vadd.f32 %v5912_v52, %v11244_v54  ;;  %v5688_v55 = vpop.f32.mrb[122].mxu0  ;;  %v5914_v56 = vpop.f32.mrb[154].mxu1  ;;  %6897 = vmatprep.mubr.bf16.mxu0 %v6014_v25  ;;  %7123 = vmatprep.mubr.bf16.mxu1 %v6014_v25 }
 0x696   : > { %v8558_v21 = vadd.f32 %v5688_v55, %v11235_v10  ;;  %v8590_v45 = vadd.f32 %v5914_v56, %v11238_v53  ;;  %v5690_v11 = vpop.f32.mrb[123].mxu0  ;;  %v5916_v23 = vpop.f32.mrb[155].mxu1  ;;  %6898 = vmatmul.mubr.bf16.gmra.mrb[148].mxu0 %v6013_v48  ;;  %7124 = vmatmul.mubr.bf16.gmra.mrb[180].mxu1 %v6013_v48  ;;  %v5977_v26 = vmax.f32 %v8556_v2, 0.0  ;;  %v5979_v4 = vmax.f32 %v8588_v43, 0.0  ;;  %v10005_v55 = vld [vmem:[#allocation13 + $0x3a0] ss:$16 sps:$4 sm:$0xff]  }
 0x697   : > { %v8559_v8 = vadd.f32 %v5690_v11, %v11241_v22  ;;  %v8591_v5 = vadd.f32 %v5916_v23, %v11244_v54  ;;  %6949 = vmatpush1.bf16.msra.mxu0 %v9987_v0  ;;  %7175 = vmatpush1.bf16.msra.mxu1 %v9990_v1  ;;  %v5978_v47 = vmax.f32 %v8557_v19, 0.0  ;;  %v5980_v51 = vmax.f32 %v8589_v20, 0.0  ;;  %v10008_v56 = vld [vmem:[#allocation13 + $0x3a8] ss:$16 sps:$4 sm:$0xff]  }
 0x698   : > { %v5981_v44 = vmax.f32 %v8558_v21, 0.0  ;;  %v5983_v33 = vmax.f32 %v8590_v45, 0.0  ;;  %6950 = vmatprep.subr.bf16.mxu0 %v9995_v15  ;;  %7176 = vmatprep.subr.bf16.mxu1 %v9998_v16  ;;  %v10013_v21 = vld [vmem:[#allocation13 + $0x3c4] ss:$16 sps:$4 sm:$0xff]  }
 0x699   : > { %v5982_v32 = vmax.f32 %v8559_v8, 0.0  ;;  %v5984_v41 = vmax.f32 %v8591_v5, 0.0 }
 0x69a   : > { %v6017_v6 = vpack.c.bf16 %v5981_v44, %v5977_v26  ;;  %v11326_v35 = vpack.c.bf16 %v5983_v33, %v5979_v4  ;;  %v10011_v4 = vld [vmem:[#allocation13 + $0x3c0] ss:$16 sps:$4 sm:$0xff]   ;;  %v10014_v44 = vld [vmem:[#allocation13 + $0x3c8] ss:$16 sps:$4 sm:$0xff]   ;;  %v10019_v33 = vld [vmem:[#allocation13 + $0x3e4] ss:$16 sps:$4 sm:$0xff]  }
 0x69b   : > { %v6018_v62 = vpack.c.bf16 %v5982_v32, %v5978_v47  ;;  %v11328_v29 = vpack.c.bf16 %v5984_v41, %v5980_v51  ;;  %v5694_v3 = vpop.f32.mrb[124].mxu0  ;;  %v5920_v50 = vpop.f32.mrb[156].mxu1  ;;  %6951 = vmatpush1.bf16.msra.mxu0 %v9993_v27  ;;  %7177 = vmatpush1.bf16.msra.mxu1 %v9996_v57  ;;  %v10017_v47 = vld [vmem:[#allocation13 + $0x3e0] ss:$16 sps:$4 sm:$0xff]   ;;  %v10020_v51 = vld [vmem:[#allocation13 + $0x3e8] ss:$16 sps:$4 sm:$0xff]  }
 0x69c   : > { %v8560_v46 = vadd.f32 %v5694_v3, %v11235_v10  ;;  %v8592_v38 = vadd.f32 %v5920_v50, %v11238_v53  ;;  %v5696_v48 = vpop.f32.mrb[125].mxu0  ;;  %v5922_v25 = vpop.f32.mrb[157].mxu1  ;;  %6952 = vmatprep.subr.bf16.mxu0 %v10001_v60  ;;  %7178 = vmatprep.subr.bf16.mxu1 %v10004_v9  ;;  %v10022_v9 = vld [vmem:[#allocation13 + $0x3ec] ss:$16 sps:$4 sm:$0xff]  }
 0x69d   : > { %v8561_v0 = vadd.f32 %v5696_v48, %v11241_v22  ;;  %v8593_v1 = vadd.f32 %v5922_v25, %v11244_v54  ;;  %v5698_v2 = vpop.f32.mrb[126].mxu0  ;;  %v5924_v43 = vpop.f32.mrb[158].mxu1  ;;  %6907 = vmatprep.mubr.bf16.mxu0 %v6018_v62  ;;  %7133 = vmatprep.mubr.bf16.mxu1 %v6018_v62 }
 0x69e   : > { %v8562_v14 = vadd.f32 %v5698_v2, %v11235_v10  ;;  %v8594_v52 = vadd.f32 %v5924_v43, %v11238_v53  ;;  %v5700_v15 = vpop.f32.mrb[127].mxu0  ;;  %v5926_v16 = vpop.f32.mrb[159].mxu1  ;;  %6908 = vmatmul.mubr.bf16.gmra.mrb[152].mxu0 %v6017_v6  ;;  %7134 = vmatmul.mubr.bf16.gmra.mrb[184].mxu1 %v6017_v6  ;;  %v5985_v45 = vmax.f32 %v8560_v46, 0.0  ;;  %v5987_v11 = vmax.f32 %v8592_v38, 0.0  ;;  %v10016_v10 = vld [vmem:[#allocation13 + $0x3cc] ss:$16 sps:$4 sm:$0xff]  }
 0x69f   : > { %v8563_v19 = vadd.f32 %v5700_v15, %v11241_v22  ;;  %v8595_v20 = vadd.f32 %v5926_v16, %v11244_v54  ;;  %6953 = vmatpush1.bf16.msra.mxu0 %v9999_v31  ;;  %7179 = vmatpush1.bf16.msra.mxu1 %v10002_v24  ;;  %v5986_v53 = vmax.f32 %v8561_v0, 0.0  ;;  %v5988_v5 = vmax.f32 %v8593_v1, 0.0 }
 0x6a0   : > { %v5989_v23 = vmax.f32 %v8562_v14, 0.0  ;;  %v5991_v8 = vmax.f32 %v8594_v52, 0.0  ;;  %6954 = vmatprep.subr.bf16.mxu0 %v10007_v61  ;;  %7180 = vmatprep.subr.bf16.mxu1 %v10010_v63 }
 0x6a1   : > { %v5990_v27 = vmax.f32 %v8563_v19, 0.0  ;;  %v5992_v57 = vmax.f32 %v8595_v20, 0.0 }
 0x6a2   : > { %v6021_v60 = vpack.c.bf16 %v5989_v23, %v5985_v45  ;;  %v6023_v22 = vpack.c.bf16 %v5991_v8, %v5987_v11 }
 0x6a3   : > { %v6022_v26 = vpack.c.bf16 %v5990_v27, %v5986_v53  ;;  %v6024_v54 = vpack.c.bf16 %v5992_v57, %v5988_v5  ;;  %6955 = vmatpush1.bf16.msra.mxu0 %v10005_v55  ;;  %7181 = vmatpush1.bf16.msra.mxu1 %v10008_v56 }
 0x6a4   : > { %6956 = vmatprep.subr.bf16.mxu0 %v10013_v21  ;;  %7182 = vmatprep.subr.bf16.mxu1 %v10016_v10 }
 0x6a5   : > { %6917 = vmatprep.mubr.bf16.mxu0 %v6022_v26  ;;  %7143 = vmatprep.mubr.bf16.mxu1 %v6022_v26 }
 0x6a6   : > { %6918 = vmatmul.mubr.bf16.gmra.mrb[156].mxu0 %v6021_v60  ;;  %7144 = vmatmul.mubr.bf16.gmra.mrb[188].mxu1 %v6021_v60 }
 0x6a7   : > { %6957 = vmatpush1.bf16.msra.mxu0 %v10011_v4  ;;  %6960 = vmatprep.mubr.bf16.mxu0 %v11256_v59 }
 0x6a8   : > { %7183 = vmatpush1.bf16.msra.mxu1 %v10014_v44  ;;  %7186 = vmatprep.mubr.bf16.mxu1 %v11256_v59 }
 0x6a9   : > { %6958 = vmatprep.subr.bf16.mxu0 %v10019_v33  ;;  %7184 = vmatprep.subr.bf16.mxu1 %v10022_v9 }
 0x6ab   : > { %6959 = vmatpush1.bf16.msra.mxu0 %v10017_v47 }
 0x6ac   : > { %7185 = vmatpush1.bf16.msra.mxu1 %v10020_v51 }
 0x6ae   : > { %6961 = vmatmul.mubr.bf16.vlgmr.msra.gmra.mrb[128].mxu0 %v11254_v30 }
 0x6af   : > { %7187 = vmatmul.mubr.bf16.vlgmr.msra.gmra.mrb[160].mxu1 %v11254_v30  ;;  %6970 = vmatprep.mubr.bf16.mxu0 %v11268_v13  ;;  %v6153_v30 = vld [vmem:[%s11947_s12] sm:$0xf] }
 0x6b0   : > { %7196 = vmatprep.mubr.bf16.mxu1 %v11268_v13  ;;  %v11370_v59 = vrot.slane %v6153_v30, %v10772_v36  ;;  %v11376_v13 = vrot.slane %v6153_v30, %v10779_v39 }
 0x6b6   : > { %6971 = vmatmul.mubr.bf16.gmra.mrb[132].mxu0 %v11266_v42 }
 0x6b7   : > { %7197 = vmatmul.mubr.bf16.gmra.mrb[164].mxu1 %v11266_v42  ;;  %6980 = vmatprep.mubr.bf16.mxu0 %v11280_v17  ;;  %v11373_v42 = vrot.slane %v6153_v30, %v10774_v37 }
 0x6b8   : > { %7206 = vmatprep.mubr.bf16.mxu1 %v11280_v17  ;;  %v11379_v17 = vrot.slane %v6153_v30, %v10781_v40 }
 0x6be   : > { %6981 = vmatmul.mubr.bf16.gmra.mrb[136].mxu0 %v11278_v58 }
 0x6bf   : > { %7207 = vmatmul.mubr.bf16.gmra.mrb[168].mxu1 %v11278_v58  ;;  %6990 = vmatprep.mubr.bf16.mxu0 %v11292_v7 }
 0x6c0   : > { %7216 = vmatprep.mubr.bf16.mxu1 %v11292_v7 }
 0x6c6   : > { %6991 = vmatmul.mubr.bf16.gmra.mrb[140].mxu0 %v11290_v28 }
 0x6c7   : > { %7217 = vmatmul.mubr.bf16.gmra.mrb[172].mxu1 %v11290_v28  ;;  %7000 = vmatprep.mubr.bf16.mxu0 %v11304_v18 }
 0x6c8   : > { %7226 = vmatprep.mubr.bf16.mxu1 %v11304_v18 }
 0x6ce   : > { %7001 = vmatmul.mubr.bf16.gmra.mrb[144].mxu0 %v11302_v12 }
 0x6cf   : > { %7227 = vmatmul.mubr.bf16.gmra.mrb[176].mxu1 %v11302_v12  ;;  %7010 = vmatprep.mubr.bf16.mxu0 %v11316_v49 }
 0x6d0   : > { %7236 = vmatprep.mubr.bf16.mxu1 %v11316_v49 }
 0x6d6   : > { %7011 = vmatmul.mubr.bf16.gmra.mrb[148].mxu0 %v11314_v34 }
 0x6d7   : > { %7237 = vmatmul.mubr.bf16.gmra.mrb[180].mxu1 %v11314_v34  ;;  %7020 = vmatprep.mubr.bf16.mxu0 %v11328_v29 }
 0x6d8   : > { %7246 = vmatprep.mubr.bf16.mxu1 %v11328_v29 }
 0x6de   : > { %7021 = vmatmul.mubr.bf16.gmra.mrb[152].mxu0 %v11326_v35 }
 0x6df   : > { %7247 = vmatmul.mubr.bf16.gmra.mrb[184].mxu1 %v11326_v35  ;;  %7030 = vmatprep.mubr.bf16.mxu0 %v6024_v54 }
 0x6e0   : > { %7256 = vmatprep.mubr.bf16.mxu1 %v6024_v54 }
 0x6e6   : > { %7031 = vmatmul.mubr.bf16.gmra.mrb[156].mxu0 %v6023_v22 }
 0x6e7   : > { %7257 = vmatmul.mubr.bf16.gmra.mrb[188].mxu1 %v6023_v22 }
 0x781   : > { %v6962_v58 = vpop.f32.mrb[128].mxu0 }
 0x782   : > { %v11382_v28 = vadd.f32 %v6962_v58, %v11370_v59  ;;  %v7188_v7 = vpop.f32.mrb[160].mxu1  ;;  %v6964_v12 = vpop.f32.mrb[129].mxu0 }
 0x783   : > { %v11385_v18 = vadd.f32 %v7188_v7, %v11373_v42  ;;  %v11388_v36 = vadd.f32 %v6964_v12, %v11376_v13  ;;  %v7190_v37 = vpop.f32.mrb[161].mxu1  ;;  %v6966_v34 = vpop.f32.mrb[130].mxu0 }
 0x784   : > { %v7267_v39 = vmul.f32 %v11382_v28, %v11382_v28  ;;  %v11393_v49 = vadd.f32 %v6966_v34, %v11370_v59  ;;  %v7192_v40 = vpop.f32.mrb[162].mxu1  ;;  %v6968_v32 = vpop.f32.mrb[131].mxu0  ;;  %v11398_v6 = vadd.f32 %v7190_v37, %v11379_v17 }
 0x785   : > { %v7268_v41 = vmul.f32 %v11388_v36, %v11388_v36  ;;  %v11401_v35 = vadd.f32 %v7192_v40, %v11373_v42  ;;  %v11404_v62 = vadd.f32 %v6968_v32, %v11376_v13  ;;  %v7194_v29 = vpop.f32.mrb[163].mxu1  ;;  %v7269_v50 = vmul.f32 %v11385_v18, %v11385_v18 }
 0x786   : > { %v7271_v3 = vmul.f32 %v11393_v49, %v11393_v49  ;;  %v11413_v46 = vadd.f32 %v7194_v29, %v11379_v17  ;;  %v7270_v61 = vmul.f32 %v11398_v6, %v11398_v6 }
 0x787   : > { %v7272_v31 = vmul.f32 %v11404_v62, %v11404_v62  ;;  %v7331_v24 = vadd.f32 %v7268_v41, %v7267_v39  ;;  %v7273_v38 = vmul.f32 %v11401_v35, %v11401_v35 }
 0x788   : > { %v7274_v20 = vmul.f32 %v11413_v46, %v11413_v46 }
 0x789   : > { %v7336_v48 = vadd.f32 %v7272_v31, %v7271_v3  ;;  %v6972_v25 = vpop.f32.mrb[132].mxu0  ;;  %v7332_v63 = vadd.f32 %v7331_v24, %v7269_v50 }
 0x78a   : > { %v11420_v0 = vadd.f32 %v6972_v25, %v11370_v59  ;;  %v7198_v1 = vpop.f32.mrb[164].mxu1  ;;  %v6974_v2 = vpop.f32.mrb[133].mxu0 }
 0x78b   : > { %v11423_v43 = vadd.f32 %v7198_v1, %v11373_v42  ;;  %v11426_v14 = vadd.f32 %v6974_v2, %v11376_v13  ;;  %v7200_v52 = vpop.f32.mrb[165].mxu1  ;;  %v6976_v15 = vpop.f32.mrb[134].mxu0  ;;  %v7333_v16 = vadd.f32 %v7332_v63, %v7270_v61  ;;  %v7337_v19 = vadd.f32 %v7336_v48, %v7273_v38 }
 0x78c   : > { %v7275_v55 = vmul.f32 %v11420_v0, %v11420_v0  ;;  %v11433_v56 = vadd.f32 %v6976_v15, %v11370_v59  ;;  %v7202_v21 = vpop.f32.mrb[166].mxu1  ;;  %v6978_v45 = vpop.f32.mrb[135].mxu0  ;;  %v11438_v23 = vadd.f32 %v7200_v52, %v11379_v17 }
 0x78d   : > { %v7276_v11 = vmul.f32 %v11426_v14, %v11426_v14  ;;  %v11441_v8 = vadd.f32 %v7202_v21, %v11373_v42  ;;  %v11444_v10 = vadd.f32 %v6978_v45, %v11376_v13  ;;  %v7204_v53 = vpop.f32.mrb[167].mxu1  ;;  %7334 = vadd.xlane.f32.xlu0 %v7333_v16  ;;  %v7277_v27 = vmul.f32 %v11423_v43, %v11423_v43 }
 0x78e   : > { %v7279_v5 = vmul.f32 %v11433_v56, %v11433_v56  ;;  %v7338_v60 = vadd.f32 %v7337_v19, %v7274_v20  ;;  %v11453_v26 = vadd.f32 %v7204_v53, %v11379_v17  ;;  %v7278_v33 = vmul.f32 %v11438_v23, %v11438_v23 }
 0x78f   : > { %v7280_v57 = vmul.f32 %v11444_v10, %v11444_v10  ;;  %v7341_v22 = vadd.f32 %v7276_v11, %v7275_v55  ;;  %v7281_v54 = vmul.f32 %v11441_v8, %v11441_v8 }
 0x790   : > { %v7282_v40 = vmul.f32 %v11453_v26, %v11453_v26 }
 0x791   : > { %v7346_v4 = vadd.f32 %v7280_v57, %v7279_v5  ;;  %v6982_v44 = vpop.f32.mrb[136].mxu0  ;;  %7339 = vadd.xlane.f32.xlu0 %v7338_v60  ;;  %v7342_v9 = vadd.f32 %v7341_v22, %v7277_v27 }
 0x792   : > { %v11460_v47 = vadd.f32 %v6982_v44, %v11370_v59  ;;  %v7208_v51 = vpop.f32.mrb[168].mxu1  ;;  %v6984_v30 = vpop.f32.mrb[137].mxu0 }
 0x793   : > { %v11463_v58 = vadd.f32 %v7208_v51, %v11373_v42  ;;  %v11466_v7 = vadd.f32 %v6984_v30, %v11376_v13  ;;  %v7210_v12 = vpop.f32.mrb[169].mxu1  ;;  %v6986_v37 = vpop.f32.mrb[138].mxu0  ;;  %v7343_v34 = vadd.f32 %v7342_v9, %v7278_v33  ;;  %v7347_v39 = vadd.f32 %v7346_v4, %v7281_v54 }
 0x794   : > { %v7283_v32 = vmul.f32 %v11460_v47, %v11460_v47  ;;  %v11473_v41 = vadd.f32 %v6986_v37, %v11370_v59  ;;  %v7212_v29 = vpop.f32.mrb[170].mxu1  ;;  %v6988_v3 = vpop.f32.mrb[139].mxu0  ;;  %v11478_v31 = vadd.f32 %v7210_v12, %v11379_v17 }
 0x795   : > { %v7284_v50 = vmul.f32 %v11466_v7, %v11466_v7  ;;  %v11481_v24 = vadd.f32 %v7212_v29, %v11373_v42  ;;  %v11484_v38 = vadd.f32 %v6988_v3, %v11376_v13  ;;  %v7214_v48 = vpop.f32.mrb[171].mxu1  ;;  %7344 = vadd.xlane.f32.xlu1 %v7343_v34  ;;  %v7285_v61 = vmul.f32 %v11463_v58, %v11463_v58 }
 0x796   : > { %v7287_v25 = vmul.f32 %v11473_v41, %v11473_v41  ;;  %v7348_v2 = vadd.f32 %v7347_v39, %v7282_v40  ;;  %v11493_v52 = vadd.f32 %v7214_v48, %v11379_v17  ;;  %v7286_v15 = vmul.f32 %v11478_v31, %v11478_v31 }
 0x797   : > { %v7351_v63 = vadd.f32 %v7284_v50, %v7283_v32  ;;  %v7288_v1 = vmul.f32 %v11484_v38, %v11484_v38  ;;  %v7289_v16 = vmul.f32 %v11481_v24, %v11481_v24 }
 0x798   : > { %v7290_v54 = vmul.f32 %v11493_v52, %v11493_v52 }
 0x799   : > { %v7356_v19 = vadd.f32 %v7288_v1, %v7287_v25  ;;  %v6992_v20 = vpop.f32.mrb[140].mxu0  ;;  %7349 = vadd.xlane.f32.xlu1 %v7348_v2  ;;  %v7352_v55 = vadd.f32 %v7351_v63, %v7285_v61 }
 0x79a   : > { %v11500_v21 = vadd.f32 %v6992_v20, %v11370_v59  ;;  %v7218_v45 = vpop.f32.mrb[172].mxu1  ;;  %v6994_v11 = vpop.f32.mrb[141].mxu0 }
 0x79b   : > { %v11503_v53 = vadd.f32 %v7218_v45, %v11373_v42  ;;  %v11506_v5 = vadd.f32 %v6994_v11, %v11376_v13  ;;  %v7220_v27 = vpop.f32.mrb[173].mxu1  ;;  %v6996_v57 = vpop.f32.mrb[142].mxu0  ;;  %v7353_v60 = vadd.f32 %v7352_v55, %v7286_v15  ;;  %v7357_v22 = vadd.f32 %v7356_v19, %v7289_v16 }
 0x79c   : > { %v7291_v4 = vmul.f32 %v11500_v21, %v11500_v21  ;;  %v11513_v44 = vadd.f32 %v6996_v57, %v11370_v59  ;;  %v7222_v33 = vpop.f32.mrb[174].mxu1  ;;  %v6998_v9 = vpop.f32.mrb[143].mxu0  ;;  %v11518_v30 = vadd.f32 %v7220_v27, %v11379_v17 }
 0x79d   : > { %v7292_v51 = vmul.f32 %v11506_v5, %v11506_v5  ;;  %v11521_v12 = vadd.f32 %v7222_v33, %v11373_v42  ;;  %v11524_v37 = vadd.f32 %v6998_v9, %v11376_v13  ;;  %v7224_v34 = vpop.f32.mrb[175].mxu1  ;;  %7354 = vadd.xlane.f32.xlu0 %v7353_v60  ;;  %v7358_v40 = vadd.f32 %v7357_v22, %v7290_v54 }
 0x79e   : > { %v7295_v39 = vmul.f32 %v11513_v44, %v11513_v44  ;;  %v7293_v32 = vmul.f32 %v11503_v53, %v11503_v53  ;;  %v11533_v50 = vadd.f32 %v7224_v34, %v11379_v17  ;;  %v7294_v48 = vmul.f32 %v11518_v30, %v11518_v30 }
 0x79f   : > { %v7361_v29 = vadd.f32 %v7292_v51, %v7291_v4  ;;  %v7296_v3 = vmul.f32 %v11524_v37, %v11524_v37  ;;  %7359 = vadd.xlane.f32.xlu1 %v7358_v40  ;;  %v7297_v25 = vmul.f32 %v11521_v12, %v11521_v12 }
 0x7a0   : > { %v7298_v57 = vmul.f32 %v11533_v50, %v11533_v50 }
 0x7a1   : > { %v7366_v61 = vadd.f32 %v7296_v3, %v7295_v39  ;;  %v7002_v63 = vpop.f32.mrb[144].mxu0  ;;  %v7362_v1 = vadd.f32 %v7361_v29, %v7293_v32 }
 0x7a2   : > { %v11540_v2 = vadd.f32 %v7002_v63, %v11370_v59  ;;  %v7228_v15 = vpop.f32.mrb[176].mxu1  ;;  %v7004_v16 = vpop.f32.mrb[145].mxu0 }
 0x7a3   : > { %v11543_v19 = vadd.f32 %v7228_v15, %v11373_v42  ;;  %v11546_v20 = vadd.f32 %v7004_v16, %v11376_v13  ;;  %v7230_v55 = vpop.f32.mrb[177].mxu1  ;;  %v7006_v45 = vpop.f32.mrb[146].mxu0  ;;  %v7363_v11 = vadd.f32 %v7362_v1, %v7294_v48  ;;  %v7367_v27 = vadd.f32 %v7366_v61, %v7297_v25 }
 0x7a4   : > { %v7299_v60 = vmul.f32 %v11540_v2, %v11540_v2  ;;  %v11553_v22 = vadd.f32 %v7006_v45, %v11370_v59  ;;  %v7232_v54 = vpop.f32.mrb[178].mxu1  ;;  %v7008_v4 = vpop.f32.mrb[147].mxu0  ;;  %v11558_v9 = vadd.f32 %v7230_v55, %v11379_v17 }
 0x7a5   : > { %v7300_v33 = vmul.f32 %v11546_v20, %v11546_v20  ;;  %v11561_v51 = vadd.f32 %v7232_v54, %v11373_v42  ;;  %v11564_v34 = vadd.f32 %v7008_v4, %v11376_v13  ;;  %v7234_v39 = vpop.f32.mrb[179].mxu1  ;;  %7364 = vadd.xlane.f32.xlu0 %v7363_v11  ;;  %v7368_v32 = vadd.f32 %v7367_v27, %v7298_v57 }
 0x7a6   : > { %v7303_v40 = vmul.f32 %v11553_v22, %v11553_v22  ;;  %v7301_v29 = vmul.f32 %v11543_v19, %v11543_v19  ;;  %v11573_v25 = vadd.f32 %v7234_v39, %v11379_v17  ;;  %v7302_v61 = vmul.f32 %v11558_v9, %v11558_v9 }
 0x7a7   : > { %v7371_v3 = vadd.f32 %v7300_v33, %v7299_v60  ;;  %v7304_v48 = vmul.f32 %v11564_v34, %v11564_v34  ;;  %7369 = vadd.xlane.f32.xlu1 %v7368_v32  ;;  %v7305_v63 = vmul.f32 %v11561_v51, %v11561_v51 }
 0x7a8   : > { %v7306_v39 = vmul.f32 %v11573_v25, %v11573_v25 }
 0x7a9   : > { %v7376_v1 = vadd.f32 %v7304_v48, %v7303_v40  ;;  %v7012_v15 = vpop.f32.mrb[148].mxu0  ;;  %v7372_v16 = vadd.f32 %v7371_v3, %v7301_v29 }
 0x7aa   : > { %v11580_v55 = vadd.f32 %v7012_v15, %v11370_v59  ;;  %v7238_v45 = vpop.f32.mrb[180].mxu1  ;;  %v7014_v11 = vpop.f32.mrb[149].mxu0 }
 0x7ab   : > { %v11583_v27 = vadd.f32 %v7238_v45, %v11373_v42  ;;  %v11586_v57 = vadd.f32 %v7014_v11, %v11376_v13  ;;  %v7240_v60 = vpop.f32.mrb[181].mxu1  ;;  %v7016_v54 = vpop.f32.mrb[150].mxu0  ;;  %v7373_v4 = vadd.f32 %v7372_v16, %v7302_v61  ;;  %v7377_v33 = vadd.f32 %v7376_v1, %v7305_v63 }
 0x7ac   : > { %11948 = vst [vmem:[#allocation20_spill] sm:$0xff] %v11580_v55  ;;  %v7307_v40 = vmul.f32 %v11580_v55, %v11580_v55  ;;  %v11593_v32 = vadd.f32 %v7016_v54, %v11370_v59  ;;  %v7242_v29 = vpop.f32.mrb[182].mxu1  ;;  %v7018_v3 = vpop.f32.mrb[151].mxu0  ;;  %v11598_v15 = vadd.f32 %v7240_v60, %v11379_v17 }
 0x7ad   : > { %11949 = vst [vmem:[#allocation21_spill] sm:$0xff] %v11583_v27  ;;  %11950 = vst [vmem:[#allocation22_spill] sm:$0xff] %v11586_v57  ;;  %v7308_v48 = vmul.f32 %v11586_v57, %v11586_v57  ;;  %v11601_v61 = vadd.f32 %v7242_v29, %v11373_v42  ;;  %v11604_v63 = vadd.f32 %v7018_v3, %v11376_v13  ;;  %v7244_v1 = vpop.f32.mrb[183].mxu1  ;;  %7374 = vadd.xlane.f32.xlu0 %v7373_v4 }
 0x7ae   : > { %11951 = vst [vmem:[#allocation23_spill] sm:$0xff] %v11593_v32  ;;  %11952 = vst [vmem:[#allocation24_spill] sm:$0xff] %v11598_v15  ;;  %v7311_v16 = vmul.f32 %v11593_v32, %v11593_v32  ;;  %v7378_v45 = vadd.f32 %v7377_v33, %v7306_v39  ;;  %v7309_v11 = vmul.f32 %v11583_v27, %v11583_v27 }
 0x7af   : > { %11953 = vst [vmem:[#allocation25_spill] sm:$0xff] %v11601_v61  ;;  %11954 = vst [vmem:[#allocation26_spill] sm:$0xff] %v11604_v63  ;;  %v7381_v54 = vadd.f32 %v7308_v48, %v7307_v40  ;;  %v7312_v60 = vmul.f32 %v11604_v63, %v11604_v63  ;;  %v11613_v57 = vadd.f32 %v7244_v1, %v11379_v17 }
 0x7b0   : > { %7379 = vadd.xlane.f32.xlu1 %v7378_v45  ;;  %v7310_v29 = vmul.f32 %v11598_v15, %v11598_v15  ;;  %v7313_v4 = vmul.f32 %v11601_v61, %v11601_v61 }
 0x7b1   : > { %11955 = vst [vmem:[#allocation27_spill] sm:$0xff] %v11613_v57  ;;  %v7386_v3 = vadd.f32 %v7312_v60, %v7311_v16  ;;  %v7022_v32 = vpop.f32.mrb[152].mxu0  ;;  %v7382_v33 = vadd.f32 %v7381_v54, %v7309_v11  ;;  %v7314_v16 = vmul.f32 %v11613_v57, %v11613_v57 }
 0x7b2   : > { %v11620_v39 = vadd.f32 %v7022_v32, %v11370_v59  ;;  %v7248_v40 = vpop.f32.mrb[184].mxu1  ;;  %v7024_v48 = vpop.f32.mrb[153].mxu0 }
 0x7b3   : > { %v11623_v63 = vadd.f32 %v7248_v40, %v11373_v42  ;;  %v11626_v1 = vadd.f32 %v7024_v48, %v11376_v13  ;;  %v7250_v45 = vpop.f32.mrb[185].mxu1  ;;  %v7026_v27 = vpop.f32.mrb[154].mxu0  ;;  %v7383_v15 = vadd.f32 %v7382_v33, %v7310_v29  ;;  %v7387_v55 = vadd.f32 %v7386_v3, %v7313_v4 }
 0x7b4   : > { %11956 = vst [vmem:[#allocation28_spill] sm:$0xff] %v11620_v39  ;;  %v7315_v11 = vmul.f32 %v11620_v39, %v11620_v39  ;;  %v11633_v32 = vadd.f32 %v7026_v27, %v11370_v59  ;;  %v7252_v54 = vpop.f32.mrb[186].mxu1  ;;  %v7028_v60 = vpop.f32.mrb[155].mxu0  ;;  %v11638_v48 = vadd.f32 %v7250_v45, %v11379_v17 }
 0x7b5   : > { %11957 = vst [vmem:[#allocation29_spill] sm:$0xff] %v11623_v63  ;;  %11958 = vst [vmem:[#allocation30_spill] sm:$0xff] %v11626_v1  ;;  %v7316_v40 = vmul.f32 %v11626_v1, %v11626_v1  ;;  %v11641_v29 = vadd.f32 %v7252_v54, %v11373_v42  ;;  %v11644_v4 = vadd.f32 %v7028_v60, %v11376_v13  ;;  %v7254_v3 = vpop.f32.mrb[187].mxu1  ;;  %7384 = vadd.xlane.f32.xlu0 %v7383_v15 }
 0x7b6   : > { %11959 = vst [vmem:[#allocation31_spill] sm:$0xff] %v11633_v32  ;;  %11960 = vst [vmem:[#allocation32_spill] sm:$0xff] %v11638_v48  ;;  %v7319_v27 = vmul.f32 %v11633_v32, %v11633_v32  ;;  %v7388_v33 = vadd.f32 %v7387_v55, %v7314_v16  ;;  %v7317_v39 = vmul.f32 %v11623_v63, %v11623_v63 }
 0x7b7   : > { %11961 = vst [vmem:[#allocation33_spill] sm:$0xff] %v11644_v4  ;;  %v7391_v57 = vadd.f32 %v7316_v40, %v7315_v11  ;;  %v7320_v45 = vmul.f32 %v11644_v4, %v11644_v4  ;;  %v11653_v1 = vadd.f32 %v7254_v3, %v11379_v17  ;;  %v7318_v54 = vmul.f32 %v11638_v48, %v11638_v48 }
 0x7b8   : > { %7389 = vadd.xlane.f32.xlu1 %v7388_v33  ;;  %v7321_v15 = vmul.f32 %v11641_v29, %v11641_v29 }
 0x7b9   : > { %v7396_v60 = vadd.f32 %v7320_v45, %v7319_v27  ;;  %v7032_v32 = vpop.f32.mrb[156].mxu0  ;;  %v7392_v55 = vadd.f32 %v7391_v57, %v7317_v39  ;;  %v7322_v27 = vmul.f32 %v11653_v1, %v11653_v1 }
 0x7ba   : > { %v11660_v16 = vadd.f32 %v7032_v32, %v11370_v59  ;;  %v7258_v11 = vpop.f32.mrb[188].mxu1  ;;  %v7034_v40 = vpop.f32.mrb[157].mxu0 }
 0x7bb   : > { %v11663_v4 = vadd.f32 %v7258_v11, %v11373_v42  ;;  %v11666_v3 = vadd.f32 %v7034_v40, %v11376_v13  ;;  %v7260_v33 = vpop.f32.mrb[189].mxu1  ;;  %v7036_v63 = vpop.f32.mrb[158].mxu0  ;;  %v7393_v48 = vadd.f32 %v7392_v55, %v7318_v54  ;;  %v7397_v61 = vadd.f32 %v7396_v60, %v7321_v15 }
 0x7bc   : > { %11962 = vst [vmem:[#allocation34_spill] sm:$0xff] %v11660_v16  ;;  %v7323_v57 = vmul.f32 %v11660_v16, %v11660_v16  ;;  %v11673_v39 = vadd.f32 %v7036_v63, %v11370_v59  ;;  %v7262_v32 = vpop.f32.mrb[190].mxu1  ;;  %v7038_v45 = vpop.f32.mrb[159].mxu0  ;;  %v11678_v40 = vadd.f32 %v7260_v33, %v11379_v17 }
 0x7bd   : > { %11963 = vst [vmem:[#allocation35_spill] sm:$0xff] %v11666_v3  ;;  %v7324_v11 = vmul.f32 %v11666_v3, %v11666_v3  ;;  %v11681_v54 = vadd.f32 %v7262_v32, %v11373_v42  ;;  %v11684_v15 = vadd.f32 %v7038_v45, %v11376_v13  ;;  %v7264_v60 = vpop.f32.mrb[191].mxu1  ;;  %7394 = vadd.xlane.f32.xlu0 %v7393_v48 }
 0x7be   : > { %v7327_v59 = vmul.f32 %v11673_v39, %v11673_v39  ;;  %v7398_v63 = vadd.f32 %v7397_v61, %v7322_v27  ;;  %v7325_v55 = vmul.f32 %v11663_v4, %v11663_v4  ;;  %v11693_v3 = vadd.f32 %v7264_v60, %v11379_v17 }
 0x7bf   : > { %11964 = vst [vmem:[#allocation36_spill] sm:$0xff] %v11681_v54  ;;  %v7401_v16 = vadd.f32 %v7324_v11, %v7323_v57  ;;  %v7328_v33 = vmul.f32 %v11684_v15, %v11684_v15  ;;  %v7326_v42 = vmul.f32 %v11678_v40, %v11678_v40  ;;  %v7329_v13 = vmul.f32 %v11681_v54, %v11681_v54 }
 0x7c0   : > { %7399 = vadd.xlane.f32.xlu1 %v7398_v63  ;;  %v7330_v61 = vmul.f32 %v11693_v3, %v11693_v3 }
 0x7c1   : > { %v7406_v48 = vadd.f32 %v7328_v33, %v7327_v59  ;;  %v7402_v32 = vadd.f32 %v7401_v16, %v7325_v55 }
 0x7c3   : > { %v7403_v27 = vadd.f32 %v7402_v32, %v7326_v42  ;;  %v7407_v57 = vadd.f32 %v7406_v48, %v7329_v13 }
 0x7c5   : > { %7404 = vadd.xlane.f32.xlu0 %v7403_v27  ;;  %v7408_v45 = vadd.f32 %v7407_v57, %v7330_v61 }
 0x7c7   : > { %7409 = vadd.xlane.f32.xlu1 %v7408_v45 }
 0x81a   : > { %v7335_v17 = vpop.xlane.xlu0 %7334 }
 0x81b   : > { %10023 = vrsqrt.f32 %v7335_v17 }
 0x81e   : > { %v7340_v11 = vpop.xlane.xlu0 %7339 }
 0x81f   : > { %10025 = vrsqrt.f32 %v7340_v11 }
 0x822   : > { %v7345_v60 = vpop.xlane.xlu1 %7344 }
 0x823   : > { %10027 = vrsqrt.f32 %v7345_v60 }
 0x825   : > { %v10024_v63 = vpop.eup %10023 }
 0x826   : > { %v7427_v54 = vmul.f32 %v10024_v63, %v11382_v28  ;;  %v7428_v16 = vmul.f32 %v10024_v63, %v11388_v36  ;;  %v7429_v59 = vmul.f32 %v10024_v63, %v11385_v18  ;;  %v7430_v55 = vmul.f32 %v10024_v63, %v11398_v6  ;;  %v7350_v33 = vpop.xlane.xlu1 %7349 }
 0x827   : > { %10029 = vrsqrt.f32 %v7350_v33 }
 0x828   : > { %7491 = vst [vmem:[%s11707_s18] sm:$0xff] %v7427_v54  ;;  %7492 = vst [vmem:[%s11707_s18 + $0x8] sm:$0xff] %v7428_v16 }
 0x829   : > { %7493 = vst [vmem:[%s11707_s18 + $0x10] sm:$0xff] %v7429_v59  ;;  %7494 = vst [vmem:[%s11707_s18 + $0x18] sm:$0xff] %v7430_v55  ;;  %v10026_v28 = vpop.eup %10025 }
 0x82a   : > { %v7431_v18 = vmul.f32 %v10026_v28, %v11393_v49  ;;  %v7432_v36 = vmul.f32 %v10026_v28, %v11404_v62  ;;  %v7433_v6 = vmul.f32 %v10026_v28, %v11401_v35  ;;  %v7434_v42 = vmul.f32 %v10026_v28, %v11413_v46  ;;  %v7355_v13 = vpop.xlane.xlu0 %7354 }
 0x82b   : > { %10031 = vrsqrt.f32 %v7355_v13  ;;  %v11967_v13 = vld [vmem:[#allocation21_spill] sm:$0xff] }
 0x82c   : > { %7495 = vst [vmem:[%s11707_s18 + $0x20] sm:$0xff] %v7431_v18  ;;  %7496 = vst [vmem:[%s11707_s18 + $0x28] sm:$0xff] %v7432_v36  ;;  %v7360_v48 = vpop.xlane.xlu1 %7359 }
 0x82d   : > { %7497 = vst [vmem:[%s11707_s18 + $0x30] sm:$0xff] %v7433_v6  ;;  %7498 = vst [vmem:[%s11707_s18 + $0x38] sm:$0xff] %v7434_v42  ;;  %v10028_v54 = vpop.eup %10027  ;;  %10033 = vrsqrt.f32 %v7360_v48  ;;  %v11965_v6 = vld [vmem:[#allocation20_spill] sm:$0xff]  ;;  %v11966_v42 = vld [vmem:[#allocation22_spill] sm:$0xff] }
 0x82e   : > { %v7435_v49 = vmul.f32 %v10028_v54, %v11420_v0  ;;  %v7436_v62 = vmul.f32 %v10028_v54, %v11426_v14  ;;  %v7437_v35 = vmul.f32 %v10028_v54, %v11423_v43  ;;  %v7438_v46 = vmul.f32 %v10028_v54, %v11438_v23  ;;  %v11968_v54 = vld [vmem:[#allocation24_spill] sm:$0xff] }
 0x830   : > { %7499 = vst [vmem:[%s11707_s18 + $0x40] sm:$0xff] %v7435_v49  ;;  %7500 = vst [vmem:[%s11707_s18 + $0x48] sm:$0xff] %v7436_v62  ;;  %v11969_v49 = vld [vmem:[#allocation23_spill] sm:$0xff] }
 0x831   : > { %7501 = vst [vmem:[%s11707_s18 + $0x50] sm:$0xff] %v7437_v35  ;;  %7502 = vst [vmem:[%s11707_s18 + $0x58] sm:$0xff] %v7438_v46  ;;  %v10030_v32 = vpop.eup %10029  ;;  %v11970_v35 = vld [vmem:[#allocation26_spill] sm:$0xff] }
 0x832   : > { %v7439_v61 = vmul.f32 %v10030_v32, %v11433_v56  ;;  %v7440_v0 = vmul.f32 %v10030_v32, %v11444_v10  ;;  %v7441_v14 = vmul.f32 %v10030_v32, %v11441_v8  ;;  %v7442_v43 = vmul.f32 %v10030_v32, %v11453_v26  ;;  %v7365_v27 = vpop.xlane.xlu0 %7364  ;;  %v11971_v32 = vld [vmem:[#allocation25_spill] sm:$0xff] }
 0x833   : > { %10035 = vrsqrt.f32 %v7365_v27 }
 0x834   : > { %7503 = vst [vmem:[%s11707_s18 + $0x60] sm:$0xff] %v7439_v61  ;;  %7504 = vst [vmem:[%s11707_s18 + $0x68] sm:$0xff] %v7440_v0  ;;  %v7370_v57 = vpop.xlane.xlu1 %7369  ;;  %v11972_v0 = vld [vmem:[#allocation27_spill] sm:$0xff] }
 0x835   : > { %7505 = vst [vmem:[%s11707_s18 + $0x70] sm:$0xff] %v7441_v14  ;;  %7506 = vst [vmem:[%s11707_s18 + $0x78] sm:$0xff] %v7442_v43  ;;  %v10032_v23 = vpop.eup %10031  ;;  %10037 = vrsqrt.f32 %v7370_v57  ;;  %v11973_v57 = vld [vmem:[#allocation28_spill] sm:$0xff] }
 0x836   : > { %v7443_v56 = vmul.f32 %v10032_v23, %v11460_v47  ;;  %v7444_v10 = vmul.f32 %v10032_v23, %v11466_v7  ;;  %v7445_v8 = vmul.f32 %v10032_v23, %v11463_v58  ;;  %v7446_v26 = vmul.f32 %v10032_v23, %v11478_v31 }
 0x837   : > { %v10034_v45 = vpop.eup %10033 }
 0x838   : > { %7507 = vst [vmem:[%s11707_s18 + $0x80] sm:$0xff] %v7443_v56  ;;  %7508 = vst [vmem:[%s11707_s18 + $0x88] sm:$0xff] %v7444_v10  ;;  %v7447_v17 = vmul.f32 %v10034_v45, %v11473_v41  ;;  %v7448_v47 = vmul.f32 %v10034_v45, %v11484_v38  ;;  %v7449_v7 = vmul.f32 %v10034_v45, %v11481_v24  ;;  %v11974_v10 = vld [vmem:[#allocation30_spill] sm:$0xff] }
 0x839   : > { %7509 = vst [vmem:[%s11707_s18 + $0x90] sm:$0xff] %v7445_v8  ;;  %7510 = vst [vmem:[%s11707_s18 + $0x98] sm:$0xff] %v7446_v26  ;;  %v7450_v58 = vmul.f32 %v10034_v45, %v11493_v52  ;;  %v11975_v26 = vld [vmem:[#allocation29_spill] sm:$0xff] }
 0x83a   : > { %v7375_v11 = vpop.xlane.xlu0 %7374  ;;  %7511 = vst [vmem:[%s11707_s18 + $0xa0] sm:$0xff] %v7447_v17  ;;  %7512 = vst [vmem:[%s11707_s18 + $0xa8] sm:$0xff] %v7448_v47  ;;  %v11976_v17 = vld [vmem:[#allocation32_spill] sm:$0xff] }
 0x83b   : > { %10039 = vrsqrt.f32 %v7375_v11  ;;  %7513 = vst [vmem:[%s11707_s18 + $0xb0] sm:$0xff] %v7449_v7  ;;  %7514 = vst [vmem:[%s11707_s18 + $0xb8] sm:$0xff] %v7450_v58  ;;  %v11977_v58 = vld [vmem:[#allocation31_spill] sm:$0xff] }
 0x83d   : > { %v10036_v31 = vpop.eup %10035  ;;  %v7380_v60 = vpop.xlane.xlu1 %7379 }
 0x83e   : > { %v7451_v41 = vmul.f32 %v10036_v31, %v11500_v21  ;;  %v7452_v38 = vmul.f32 %v10036_v31, %v11506_v5  ;;  %v7453_v24 = vmul.f32 %v10036_v31, %v11503_v53  ;;  %v7454_v52 = vmul.f32 %v10036_v31, %v11518_v30  ;;  %v11978_v31 = vld [vmem:[#allocation33_spill] sm:$0xff] }
 0x83f   : > { %10041 = vrsqrt.f32 %v7380_v60  ;;  %v10038_v63 = vpop.eup %10037 }
 0x840   : > { %7515 = vst [vmem:[%s11707_s18 + $0xc0] sm:$0xff] %v7451_v41  ;;  %7516 = vst [vmem:[%s11707_s18 + $0xc8] sm:$0xff] %v7452_v38  ;;  %v7455_v16 = vmul.f32 %v10038_v63, %v11513_v44  ;;  %v7456_v21 = vmul.f32 %v10038_v63, %v11524_v37  ;;  %v7457_v5 = vmul.f32 %v10038_v63, %v11521_v12 }
 0x841   : > { %7517 = vst [vmem:[%s11707_s18 + $0xd0] sm:$0xff] %v7453_v24  ;;  %7518 = vst [vmem:[%s11707_s18 + $0xd8] sm:$0xff] %v7454_v52  ;;  %v7458_v53 = vmul.f32 %v10038_v63, %v11533_v50  ;;  %v11979_v52 = vld [vmem:[#allocation34_spill] sm:$0xff] }
 0x842   : > { %v7385_v59 = vpop.xlane.xlu0 %7384  ;;  %7519 = vst [vmem:[%s11707_s18 + $0xe0] sm:$0xff] %v7455_v16  ;;  %7520 = vst [vmem:[%s11707_s18 + $0xe8] sm:$0xff] %v7456_v21  ;;  %v11980_v16 = vld [vmem:[#allocation35_spill] sm:$0xff] }
 0x843   : > { %10043 = vrsqrt.f32 %v7385_v59  ;;  %7521 = vst [vmem:[%s11707_s18 + $0xf0] sm:$0xff] %v7457_v5  ;;  %7522 = vst [vmem:[%s11707_s18 + $0xf8] sm:$0xff] %v7458_v53  ;;  %v11982_v53 = vld [vmem:[#allocation36_spill] sm:$0xff] }
 0x845   : > { %v10040_v30 = vpop.eup %10039  ;;  %v7390_v55 = vpop.xlane.xlu1 %7389 }
 0x846   : > { %v7459_v44 = vmul.f32 %v10040_v30, %v11540_v2  ;;  %v7460_v37 = vmul.f32 %v10040_v30, %v11546_v20  ;;  %v7461_v12 = vmul.f32 %v10040_v30, %v11543_v19  ;;  %v7462_v50 = vmul.f32 %v10040_v30, %v11558_v9 }
 0x847   : > { %10045 = vrsqrt.f32 %v7390_v55 }
 0x848   : > { %7523 = vst [vmem:[%s11707_s18 + $0x100] sm:$0xff] %v7459_v44  ;;  %7524 = vst [vmem:[%s11707_s18 + $0x108] sm:$0xff] %v7460_v37 }
 0x849   : > { %7525 = vst [vmem:[%s11707_s18 + $0x110] sm:$0xff] %v7461_v12  ;;  %7526 = vst [vmem:[%s11707_s18 + $0x118] sm:$0xff] %v7462_v50  ;;  %v10042_v33 = vpop.eup %10041 }
 0x84a   : > { %v7463_v28 = vmul.f32 %v10042_v33, %v11553_v22  ;;  %v7464_v2 = vmul.f32 %v10042_v33, %v11564_v34  ;;  %v7465_v20 = vmul.f32 %v10042_v33, %v11561_v51  ;;  %v7466_v19 = vmul.f32 %v10042_v33, %v11573_v25  ;;  %v7395_v18 = vpop.xlane.xlu0 %7394 }
 0x84b   : > { %10047 = vrsqrt.f32 %v7395_v18 }
 0x84c   : > { %7527 = vst [vmem:[%s11707_s18 + $0x120] sm:$0xff] %v7463_v28  ;;  %7528 = vst [vmem:[%s11707_s18 + $0x128] sm:$0xff] %v7464_v2 }
 0x84d   : > { %7529 = vst [vmem:[%s11707_s18 + $0x130] sm:$0xff] %v7465_v20  ;;  %7530 = vst [vmem:[%s11707_s18 + $0x138] sm:$0xff] %v7466_v19  ;;  %v10044_v9 = vpop.eup %10043  ;;  %v7400_v36 = vpop.xlane.xlu1 %7399 }
 0x84e   : > { %v7467_v22 = vmul.f32 %v10044_v9, %v11965_v6  ;;  %v7468_v34 = vmul.f32 %v10044_v9, %v11966_v42  ;;  %v7469_v51 = vmul.f32 %v10044_v9, %v11967_v13  ;;  %v7470_v25 = vmul.f32 %v10044_v9, %v11968_v54 }
 0x84f   : > { %10049 = vrsqrt.f32 %v7400_v36 }
 0x850   : > { %7531 = vst [vmem:[%s11707_s18 + $0x140] sm:$0xff] %v7467_v22  ;;  %7532 = vst [vmem:[%s11707_s18 + $0x148] sm:$0xff] %v7468_v34 }
 0x851   : > { %7533 = vst [vmem:[%s11707_s18 + $0x150] sm:$0xff] %v7469_v51  ;;  %7534 = vst [vmem:[%s11707_s18 + $0x158] sm:$0xff] %v7470_v25  ;;  %v10046_v48 = vpop.eup %10045 }
 0x852   : > { %v7471_v62 = vmul.f32 %v10046_v48, %v11969_v49  ;;  %v7472_v46 = vmul.f32 %v10046_v48, %v11970_v35  ;;  %v7473_v61 = vmul.f32 %v10046_v48, %v11971_v32  ;;  %v7474_v14 = vmul.f32 %v10046_v48, %v11972_v0  ;;  %v7405_v43 = vpop.xlane.xlu0 %7404 }
 0x853   : > { %10051 = vrsqrt.f32 %v7405_v43 }
 0x854   : > { %7535 = vst [vmem:[%s11707_s18 + $0x160] sm:$0xff] %v7471_v62  ;;  %7536 = vst [vmem:[%s11707_s18 + $0x168] sm:$0xff] %v7472_v46  ;;  %v7410_v27 = vpop.xlane.xlu1 %7409 }
 0x855   : > { %7537 = vst [vmem:[%s11707_s18 + $0x170] sm:$0xff] %v7473_v61  ;;  %7538 = vst [vmem:[%s11707_s18 + $0x178] sm:$0xff] %v7474_v14  ;;  %v10048_v23 = vpop.eup %10047  ;;  %10053 = vrsqrt.f32 %v7410_v27 }
 0x856   : > { %v7475_v56 = vmul.f32 %v10048_v23, %v11973_v57  ;;  %v7476_v8 = vmul.f32 %v10048_v23, %v11974_v10  ;;  %v7477_v45 = vmul.f32 %v10048_v23, %v11975_v26  ;;  %v7478_v47 = vmul.f32 %v10048_v23, %v11976_v17 }
 0x858   : > { %7539 = vst [vmem:[%s11707_s18 + $0x180] sm:$0xff] %v7475_v56  ;;  %7540 = vst [vmem:[%s11707_s18 + $0x188] sm:$0xff] %v7476_v8 }
 0x859   : > { %7541 = vst [vmem:[%s11707_s18 + $0x190] sm:$0xff] %v7477_v45  ;;  %7542 = vst [vmem:[%s11707_s18 + $0x198] sm:$0xff] %v7478_v47  ;;  %v10050_v7 = vpop.eup %10049 }
 0x85a   : > { %v7479_v11 = vmul.f32 %v10050_v7, %v11977_v58  ;;  %v7480_v60 = vmul.f32 %v10050_v7, %v11978_v31  ;;  %v7481_v41 = vmul.f32 %v10050_v7, %v11641_v29  ;;  %v7482_v38 = vmul.f32 %v10050_v7, %v11653_v1 }
 0x85c   : > { %7543 = vst [vmem:[%s11707_s18 + $0x1a0] sm:$0xff] %v7479_v11  ;;  %7544 = vst [vmem:[%s11707_s18 + $0x1a8] sm:$0xff] %v7480_v60 }
 0x85d   : > { %7545 = vst [vmem:[%s11707_s18 + $0x1b0] sm:$0xff] %v7481_v41  ;;  %7546 = vst [vmem:[%s11707_s18 + $0x1b8] sm:$0xff] %v7482_v38  ;;  %v10052_v24 = vpop.eup %10051 }
 0x85e   : > { %v7483_v63 = vmul.f32 %v10052_v24, %v11979_v52  ;;  %v7484_v21 = vmul.f32 %v10052_v24, %v11980_v16  ;;  %v7485_v29 = vmul.f32 %v10052_v24, %v11663_v4  ;;  %v7486_v1 = vmul.f32 %v10052_v24, %v11678_v40 }
 0x85f   : > { %v10054_v5 = vpop.eup %10053 }
 0x860   : > { %7547 = vst [vmem:[%s11707_s18 + $0x1c0] sm:$0xff] %v7483_v63  ;;  %7548 = vst [vmem:[%s11707_s18 + $0x1c8] sm:$0xff] %v7484_v21  ;;  %v7487_v4 = vmul.f32 %v10054_v5, %v11673_v39  ;;  %v7488_v40 = vmul.f32 %v10054_v5, %v11684_v15  ;;  %v7489_v59 = vmul.f32 %v10054_v5, %v11982_v53 }
 0x861   : > { %7549 = vst [vmem:[%s11707_s18 + $0x1d0] sm:$0xff] %v7485_v29  ;;  %7550 = vst [vmem:[%s11707_s18 + $0x1d8] sm:$0xff] %v7486_v1  ;;  %v7490_v30 = vmul.f32 %v10054_v5, %v11693_v3 }
 0x862   : > { %7551 = vst [vmem:[%s11707_s18 + $0x1e0] sm:$0xff] %v7487_v4  ;;  %7552 = vst [vmem:[%s11707_s18 + $0x1e8] sm:$0xff] %v7488_v40 }
 0x863   : > { %7553 = vst [vmem:[%s11707_s18 + $0x1f0] sm:$0xff] %v7489_v59  ;;  %7554 = vst [vmem:[%s11707_s18 + $0x1f8] sm:$0xff] %v7490_v30 }
 0x864   : > { %10266 = shalt.err (!%p10263_p7)
}
 0x865   : > { %s10267_s24 = scalar_lea.hbm %s11826_s14, 8192  ;;  %s10271_s8 = scalar_lea.hbm %s11981_s1, 32768 }
 0x866   : > { %p10268_p6 = scmp.ne.s32.totalorder %s11826_s14, %s10267_s24  ;;  %p10272_p3 = scmp.lt.u32.totalorder %s11826_s14, %s11981_s1 }
 0x867   : > { %p10273_p0 = scmp.lt.u32.totalorder %s10271_s8, %s10267_s24  ;;  %p10275_p5 = scmp.lt.u32.totalorder %s10267_s24, %s11826_s14 }
 0x868   : > { %p10269_p8 = pnand %p10268_p6, %p11983_p4 }
 0x869   : > { %p10274_p2 = por %p10273_p0, %p10272_p3 }
 0x86a   : > { %p10270_p9 = pneg %p10269_p8 }
 0x86b   : > { %p10276_p10 = por %p10275_p5, %p10274_p2 }
 0x86d   : > { %p10277_p1 = pnand %p10276_p10, %p10270_p9 }
 0x86f   : > { %10280 = shalt.err (!%p10277_p1)
}
 0x870   : > { %s10347_s17 = smov 512   ;;  %s10348_s22 = smov 32  }
 0x871   : > { %8974 = dma.vmem_to_hbm [thread:$0]  (%p11983_p4), %s11828_s20, 8192, %s11826_s14, %s7556_s23, %s10347_s17, %s10347_s17, %s10348_s22  }
 0x872 PF: > { %p9016_p11 = scmp.ge.s32.totalorder %s10331_s28, 2  ;;  %s7585_s15 = sand.u32 1, %s10319_s25  }
 0x873   : > { %p11984_p12 = scmp.ne.s32.totalorder %s11935_s29, 0  ;;  %s7586_s13 = scalar_lea.sflag [#allocation4], %s7585_s15 }
 0x875   : > { %p9000_p13 = pnand %p9016_p11, %p11984_p12 }
 0x877   : > { %10314 = dma.done.wait (!%p9000_p13), %s7586_s13, 8192  }
 0x878   : > { %10316 = vsyncadd (!%p9000_p13), %s7586_s13, 4294959104  ;;  %p29_p7 = scmp.ge.s32.totalorder %s10605_s16, 6   ;;  %s11985_s25 = smov %s10323_s26 }
 0x879   : > { %s11986_s26 = smov %s10327_s27  ;;  %s11987_s27 = smov %s10616_s6 }
 0x87a   : > { %s11988_s28 = smov %s10605_s16  ;;  %31 = sbr.rel (!%p29_p7) target bundleno = 15 (0xf), region = 141 }
 0x881   :  { %7591 = vsyncpa [#allocation3], 1 }
 0x882   :  { %7593 = vsyncpa [#allocation3 + $0x1], 1 }
 0x883   :  { %7594 = vsyncpa [#allocation6], 1 }
 0x884   :  { %7595 = vsyncpa [#allocation9], 1 }
 0x885   :  { %7596 = vsyncpa [#allocation12], 1 }
 0x886   :  { %7597 = vsyncpa [#allocation4], 1 }
 0x887   :  { %7599 = vsyncpa [#allocation4 + $0x1], 1 }

</bundles_post_ra>
